<compile_context>
chip_gen: v7x
topology: tpu7x:2x2x1
jax: 0.10.0
libtpu: 0.0.40
codegen_flags: <defaults>
</compile_context>

<pallas_src>
import jax
import jax.numpy as jnp
from jax.experimental import pallas as pl
from jax.experimental.pallas import tpu as pltpu

H1_RAW, H2_RAW = 1000, 200   # PyTorch hidden sizes
H1, H2 = 1024, 256           # lane-padded hidden sizes (multiples of 128)
LANES = 128
TB_MAX = 1024                # max batch rows per grid step
TK_MAX = 2048                # max layer-0 contraction columns per grid step
VMEM_BUDGET = 36 << 20       # per-step working-set target (v7x has 64 MiB VMEM)


def _round_up(n, m):
    return (n + m - 1) // m * m


def _feature_tiling(inp_dim):
    """Returns (D0, tk, KT): padded input width, K-tile width, #K tiles."""
    d0 = _round_up(max(inp_dim, 1), LANES)
    if d0 <= TK_MAX:
        return d0, d0, 1
    d0 = _round_up(d0, TK_MAX)
    return d0, TK_MAX, d0 // TK_MAX


def _vmem_need(tb, tk, kt):
    """Rough per-step VMEM working set in bytes."""
    r = tb // LANES
    need = 2 * tb * tk * 4                         # x tile, f32, double-buffered
    need += (2 if kt > 1 else 1) * tk * H1 * 2     # w0 tile, bf16
    need += H1 * 4 + H1 * H2 * 2 + 2 * H2 * 4 + 4  # b0, w1, b1, w2, b2 (single)
    need += 2 * r * LANES * 4                      # output tile, double-buffered
    need += tb * H1 * 4                            # h0 f32 accumulator scratch
    need += tb * tk * 2 + tb * H1 * 2 + tb * H2 * 4  # transient bf16/f32 temps
    return need


def _choose_tb(B, tk, kt):
    """Adaptive batch tile: big (amortize step overhead), G>=2 when possible,
    shrunk to fit the VMEM budget."""
    b128 = _round_up(max(B, 1), LANES)
    tb = min(b128, TB_MAX)
    # v7x megacore: keep >= 2 steps on the parallel (batch) axis when possible.
    if tb > LANES and pl.cdiv(b128, tb) < 2:
        tb = max(LANES, _round_up(b128 // 2, LANES))
    # Respect the per-step VMEM budget.
    while tb > LANES and _vmem_need(tb, tk, kt) > VMEM_BUDGET:
        tb = max(LANES, _round_up(tb // 2, LANES))
    return tb


def prior_disc_kernel(x_ref, w0_ref, b0_ref, w1_ref, b1_ref, w2_ref, b2_ref,
                      o_ref, h0_acc):
    k = pl.program_id(1)

    @pl.when(k == 0)
    def _():
        h0_acc[...] = jnp.zeros_like(h0_acc)

    # Layer 0 partial product: cast the streamed f32 x tile to bf16 in-kernel,
    # MXU matmul, f32 accumulation across the K grid axis.
    h0_acc[...] += jnp.dot(x_ref[...].astype(jnp.bfloat16), w0_ref[...],
                           preferred_element_type=jnp.float32)

    @pl.when(k == pl.num_programs(1) - 1)
    def _():
        # Layer 0 epilogue (bias + ReLU, f32), then layer 1 (bf16 MXU, f32 acc).
        h0 = jnp.maximum(h0_acc[...] + b0_ref[...], 0.0)
        h1 = jnp.dot(h0.astype(jnp.bfloat16), w1_ref[...],
                     preferred_element_type=jnp.float32)
        h1 = jnp.maximum(h1 + b1_ref[...], 0.0)

        # Layer 2 (out_features = 1): VPU multiply + lane reduce instead of an
        # N=1 MXU pass; lane-dense (R, 128) layout so the store is unmasked.
        tb, h2 = h1.shape
        h1_r = h1.reshape(tb // LANES, LANES, h2)                     # (R,128,H2)
        logits = jnp.sum(h1_r * w2_ref[...], axis=-1) + b2_ref[...]   # (R,128)
        o_ref[...] = jax.nn.sigmoid(logits)[None]                     # (1,R,128)


def prepare_params(params, inp_dim):
    """One-time weight padding / bf16 cast. Call once per model, not per step."""
    w0, b0, w1, b1, w2, b2 = params
    D0, _, _ = _feature_tiling(inp_dim)
    w0p = jnp.pad(w0, ((0, D0 - inp_dim), (0, H1 - H1_RAW))).astype(jnp.bfloat16)
    b0p = jnp.pad(b0, ((0, 0), (0, H1 - H1_RAW)))                       # f32
    w1p = jnp.pad(w1, ((0, H1 - H1_RAW), (0, H2 - H2_RAW))).astype(jnp.bfloat16)
    b1p = jnp.pad(b1, ((0, 0), (0, H2 - H2_RAW)))                       # f32
    w2p = jnp.pad(w2.T, ((0, 0), (0, H2 - H2_RAW))).reshape(1, 1, H2)   # f32
    b2p = b2.reshape(1, 1)                                              # f32
    return w0p, b0p, w1p, b1p, w2p, b2p


def prior_discriminator(x, prepared):
    """x: (B, inp_dim) float32 -> (B, 1) float32 in (0, 1)."""
    w0p, b0p, w1p, b1p, w2p, b2p = prepared
    B, inp_dim = x.shape
    D0, tk, KT = _feature_tiling(inp_dim)
    assert w0p.shape == (D0, H1), "prepared params do not match inp_dim"

    TB = _choose_tb(B, tk, KT)
    R = TB // LANES
    G = pl.cdiv(_round_up(B, LANES), TB)
    B_pad = G * TB

    # x stays f32 (bf16 cast happens in-kernel); pad only if shapes are ragged.
    if B_pad != B or D0 != inp_dim:
        xp = jnp.pad(x, ((0, B_pad - B), (0, D0 - inp_dim)))
    else:
        xp = x

    cost = pl.CostEstimate(
        flops=2 * B_pad * (D0 * H1 + H1 * H2 + H2),
        transcendentals=B_pad,
        bytes_accessed=(xp.size * 4 + w0p.size * 2 + w1p.size * 2
                        + (b0p.size + b1p.size + w2p.size + b2p.size) * 4
                        + B_pad * 4),
    )
    vmem_limit = int(min(60 << 20,
                         max(32 << 20, 1.5 * _vmem_need(TB, tk, KT) + (2 << 20))))

    def call(single_buffer_weights):
        const_pm = (pl.Buffered(buffer_count=1) if single_buffer_weights else None)
        w0_pm = const_pm if KT == 1 else None   # w0 is K-tiled when KT > 1
        return pl.pallas_call(
            prior_disc_kernel,
            out_shape=jax.ShapeDtypeStruct((G, R, LANES), jnp.float32),
            grid=(G, KT),
            in_specs=[
                # x: tiled over (batch, K); default double-buffering.
                pl.BlockSpec((TB, tk), lambda i, k: (i, k)),
                # w0: tiled over K (single-buffered only when grid-constant).
                pl.BlockSpec((tk, H1), lambda i, k: (k, 0), pipeline_mode=w0_pm),
                # Remaining weights/biases: constant index_map -> VMEM-resident
                # across the whole grid; single-buffered.
                pl.BlockSpec((1, H1), lambda i, k: (0, 0), pipeline_mode=const_pm),
                pl.BlockSpec((H1, H2), lambda i, k: (0, 0), pipeline_mode=const_pm),
                pl.BlockSpec((1, H2), lambda i, k: (0, 0), pipeline_mode=const_pm),
                pl.BlockSpec((1, 1, H2), lambda i, k: (0, 0, 0),
                             pipeline_mode=const_pm),
                pl.BlockSpec((1, 1), lambda i, k: (0, 0), pipeline_mode=const_pm),
            ],
            out_specs=pl.BlockSpec((1, R, LANES), lambda i, k: (i, 0, 0)),
            scratch_shapes=[pltpu.VMEM((TB, H1), jnp.float32)],
            compiler_params=pltpu.CompilerParams(
                dimension_semantics=("parallel", "arbitrary"),
                vmem_limit_bytes=vmem_limit),
            cost_estimate=cost,
        )(xp, w0p, b0p, w1p, b1p, w2p, b2p)

    try:
        out3 = call(True)
    except Exception:
        # Fallback for jax builds where BlockSpec.pipeline_mode is not
        # supported by the TPU pallas_call pipeline: default double-buffering.
        out3 = call(False)

    # lane-dense (G, R, 128) -> (B, 1)
    return out3.reshape(B_pad, 1)[:B]


def init_params(key, inp_dim):
    """Deterministic synthetic params, PyTorch-style uniform(-1/sqrt(fan_in), +)."""
    dims = [(inp_dim, H1_RAW), (H1_RAW, H2_RAW), (H2_RAW, 1)]
    params = []
    for i, (fan_in, fan_out) in enumerate(dims):
        kw, kb = jax.random.split(jax.random.fold_in(key, i))
        bound = 1.0 / jnp.sqrt(fan_in)
        w = jax.random.uniform(kw, (fan_in, fan_out), jnp.float32, -bound, bound)
        b = jax.random.uniform(kb, (1, fan_out), jnp.float32, -bound, bound)
        params.extend([w, b])
    return tuple(params)


def reference(x, params):
    w0, b0, w1, b1, w2, b2 = params
    h0 = jnp.maximum(x @ w0 + b0, 0.0)
    h1 = jnp.maximum(h0 @ w1 + b1, 0.0)
    return jax.nn.sigmoid(h1 @ w2 + b2)


if __name__ == "__main__":
    key = jax.random.PRNGKey(0)
    B, inp_dim = 2, 32
    kx, kp = jax.random.split(key)
    x = jax.random.normal(kx, (B, inp_dim), jnp.float32)
    params = init_params(kp, inp_dim)
    prepared = prepare_params(params, inp_dim)   # one-time weight prep

    out = prior_discriminator(x, prepared)
    out = jax.block_until_ready(out)

    ref = reference(x, params)
    assert out.shape == (B, 1)
    # bf16 MXU operands with f32 accumulation -> relaxed tolerance vs f32 ref.
    assert jnp.allclose(out, ref, atol=2e-2, rtol=2e-2), (out, ref)
    print("KERNEL_OK")
</pallas_src>

<mosaic_0001>
module attributes {stable_mosaic.version = 11 : i64} {
  func.func @prior_disc_kernel(%arg0: i32, %arg1: i32, %arg2: memref<128x128xf32, #tpu.memory_space<vmem>>, %arg3: memref<128x1024xbf16, #tpu.memory_space<vmem>>, %arg4: memref<1x1024xf32, #tpu.memory_space<vmem>>, %arg5: memref<1024x256xbf16, #tpu.memory_space<vmem>>, %arg6: memref<1x256xf32, #tpu.memory_space<vmem>>, %arg7: memref<1x1x256xf32, #tpu.memory_space<vmem>>, %arg8: memref<1x1xf32, #tpu.memory_space<vmem>>, %arg9: memref<1x1x128xf32, #tpu.memory_space<vmem>>, %arg10: memref<128x1024xf32, #tpu.memory_space<vmem>>) attributes {dimension_semantics = [#tpu.dimension_semantics<parallel>, #tpu.dimension_semantics<arbitrary>], iteration_bounds = array<i64: 1, 1>, scalar_prefetch = 0 : i64, scratch_operands = 1 : i64, tpu.core_type = #tpu.core_type<tc>, window_params = [{transform_indices = @transform_0, window_bounds = array<i64: 128, 128>}, {pipeline_mode = #tpu.pipeline_mode<synchronous>, transform_indices = @transform_1, window_bounds = array<i64: 128, 1024>}, {pipeline_mode = #tpu.pipeline_mode<synchronous>, transform_indices = @transform_2, window_bounds = array<i64: 1, 1024>}, {pipeline_mode = #tpu.pipeline_mode<synchronous>, transform_indices = @transform_3, window_bounds = array<i64: 1024, 256>}, {pipeline_mode = #tpu.pipeline_mode<synchronous>, transform_indices = @transform_4, window_bounds = array<i64: 1, 256>}, {pipeline_mode = #tpu.pipeline_mode<synchronous>, transform_indices = @transform_5, window_bounds = array<i64: 1, 1, 256>}, {pipeline_mode = #tpu.pipeline_mode<synchronous>, transform_indices = @transform_6, window_bounds = array<i64: 1, 1>}, {transform_indices = @transform_7, window_bounds = array<i64: 1, 1, 128>}]} {
    %c0_i32 = arith.constant 0 : i32
    %0 = arith.cmpi eq, %arg1, %c0_i32 : i32
    %1 = arith.extui %0 : i1 to i32
    %c0_i32_0 = arith.constant 0 : i32
    %2 = arith.cmpi ne, %1, %c0_i32_0 : i32
    scf.if %2 {
      %cst_10 = arith.constant 0.000000e+00 : f32
      %13 = vector.broadcast %cst_10 : f32 to vector<128x1024xf32>
      %c0_11 = arith.constant 0 : index
      %c0_12 = arith.constant 0 : index
      %14 = vector.load %arg10[%c0_11, %c0_12] : memref<128x1024xf32, #tpu.memory_space<vmem>>, vector<128x1024xf32>
      tpu.vector_store %arg10[%c0_11, %c0_12], %13 {strides = array<i32>} : memref<128x1024xf32, #tpu.memory_space<vmem>>, vector<128x1024xf32>,
    } else {
    }
    %c0 = arith.constant 0 : index
    %c0_1 = arith.constant 0 : index
    %3 = vector.load %arg10[%c0, %c0_1] : memref<128x1024xf32, #tpu.memory_space<vmem>>, vector<128x1024xf32>
    %c0_2 = arith.constant 0 : index
    %c0_3 = arith.constant 0 : index
    %4 = vector.load %arg2[%c0_2, %c0_3] : memref<128x128xf32, #tpu.memory_space<vmem>>, vector<128x128xf32>
    %5 = arith.truncf %4 : vector<128x128xf32> to vector<128x128xbf16>
    %c0_4 = arith.constant 0 : index
    %c0_5 = arith.constant 0 : index
    %6 = vector.load %arg3[%c0_4, %c0_5] : memref<128x1024xbf16, #tpu.memory_space<vmem>>, vector<128x1024xbf16>
    %cst = arith.constant dense<0.000000e+00> : vector<128x1024xf32>
    %7 = tpu.matmul %5, %6, %cst {dimension_numbers = #tpu.dot_dimension_numbers<[1], [0], [0], [1], [0, 0, 1, 1], [], []>} : vector<128x128xbf16>, vector<128x1024xbf16>, vector<128x1024xf32> -> vector<128x1024xf32>
    %8 = arith.addf %3, %7 : vector<128x1024xf32>
    %c0_6 = arith.constant 0 : index
    %c0_7 = arith.constant 0 : index
    %9 = vector.load %arg10[%c0_6, %c0_7] : memref<128x1024xf32, #tpu.memory_space<vmem>>, vector<128x1024xf32>
    tpu.vector_store %arg10[%c0_6, %c0_7], %8 {strides = array<i32>} : memref<128x1024xf32, #tpu.memory_space<vmem>>, vector<128x1024xf32>,
    %c0_i32_8 = arith.constant 0 : i32
    %10 = arith.cmpi eq, %arg1, %c0_i32_8 : i32
    %11 = arith.extui %10 : i1 to i32
    %c0_i32_9 = arith.constant 0 : i32
    %12 = arith.cmpi ne, %11, %c0_i32_9 : i32
    scf.if %12 {
      %c0_10 = arith.constant 0 : index
      %c0_11 = arith.constant 0 : index
      %13 = vector.load %arg10[%c0_10, %c0_11] : memref<128x1024xf32, #tpu.memory_space<vmem>>, vector<128x1024xf32>
      %c0_12 = arith.constant 0 : index
      %c0_13 = arith.constant 0 : index
      %14 = vector.load %arg4[%c0_12, %c0_13] : memref<1x1024xf32, #tpu.memory_space<vmem>>, vector<1x1024xf32>
      %15 = vector.broadcast %14 : vector<1x1024xf32> to vector<128x1024xf32>
      %16 = arith.addf %13, %15 : vector<128x1024xf32>
      %cst_14 = arith.constant 0.000000e+00 : f32
      %17 = vector.broadcast %cst_14 : f32 to vector<128x1024xf32>
      %18 = arith.maximumf %16, %17 : vector<128x1024xf32>
      %19 = arith.truncf %18 : vector<128x1024xf32> to vector<128x1024xbf16>
      %c0_15 = arith.constant 0 : index
      %c0_16 = arith.constant 0 : index
      %20 = vector.load %arg5[%c0_15, %c0_16] : memref<1024x256xbf16, #tpu.memory_space<vmem>>, vector<1024x256xbf16>
      %cst_17 = arith.constant dense<0.000000e+00> : vector<128x256xf32>
      %21 = tpu.matmul %19, %20, %cst_17 {dimension_numbers = #tpu.dot_dimension_numbers<[1], [0], [0], [1], [0, 0, 1, 1], [], []>} : vector<128x1024xbf16>, vector<1024x256xbf16>, vector<128x256xf32> -> vector<128x256xf32>
      %c0_18 = arith.constant 0 : index
      %c0_19 = arith.constant 0 : index
      %22 = vector.load %arg6[%c0_18, %c0_19] : memref<1x256xf32, #tpu.memory_space<vmem>>, vector<1x256xf32>
      %23 = vector.broadcast %22 : vector<1x256xf32> to vector<128x256xf32>
      %24 = arith.addf %21, %23 : vector<128x256xf32>
      %cst_20 = arith.constant 0.000000e+00 : f32
      %25 = vector.broadcast %cst_20 : f32 to vector<128x256xf32>
      %26 = arith.maximumf %24, %25 : vector<128x256xf32>
      %27 = vector.shape_cast %26 : vector<128x256xf32> to vector<1x128x256xf32>
      %c0_21 = arith.constant 0 : index
      %c0_22 = arith.constant 0 : index
      %c0_23 = arith.constant 0 : index
      %28 = vector.load %arg7[%c0_21, %c0_22, %c0_23] : memref<1x1x256xf32, #tpu.memory_space<vmem>>, vector<1x1x256xf32>
      %29 = vector.broadcast %28 : vector<1x1x256xf32> to vector<1x128x256xf32>
      %30 = arith.mulf %27, %29 : vector<1x128x256xf32>
      %cst_24 = arith.constant dense<0.000000e+00> : vector<1x128xf32>
      %31 = vector.multi_reduction <add>, %30, %cst_24 [2] : vector<1x128x256xf32> to vector<1x128xf32>
      %c0_25 = arith.constant 0 : index
      %c0_26 = arith.constant 0 : index
      %32 = vector.load %arg8[%c0_25, %c0_26] : memref<1x1xf32, #tpu.memory_space<vmem>>, vector<1x1xf32>
      %33 = vector.broadcast %32 : vector<1x1xf32> to vector<1x128xf32>
      %34 = arith.addf %31, %33 : vector<1x128xf32>
      %35 = arith.negf %34 : vector<1x128xf32>
      %36 = math.exp %35 : vector<1x128xf32>
      %cst_27 = arith.constant 1.000000e+00 : f32
      %37 = vector.broadcast %cst_27 : f32 to vector<1x128xf32>
      %38 = arith.addf %37, %36 : vector<1x128xf32>
      %39 = arith.divf %37, %38 : vector<1x128xf32>
      %40 = vector.shape_cast %39 : vector<1x128xf32> to vector<1x1x128xf32>
      %c0_28 = arith.constant 0 : index
      %c0_29 = arith.constant 0 : index
      %c0_30 = arith.constant 0 : index
      %41 = vector.load %arg9[%c0_28, %c0_29, %c0_30] : memref<1x1x128xf32, #tpu.memory_space<vmem>>, vector<1x1x128xf32>
      tpu.vector_store %arg9[%c0_28, %c0_29, %c0_30], %40 {strides = array<i32>} : memref<1x1x128xf32, #tpu.memory_space<vmem>>, vector<1x1x128xf32>,
    } else {
    }
    return
  }
  func.func @transform_0(%arg0: i32, %arg1: i32) -> (i32, i32) {
    %c0_i32 = arith.constant 0 : i32
    return %arg0, %arg1 : i32, i32
  }
  func.func @transform_1(%arg0: i32, %arg1: i32) -> (i32, i32) {
    %c0_i32 = arith.constant 0 : i32
    %c0_i32_0 = arith.constant 0 : i32
    return %arg1, %c0_i32 : i32, i32
  }
  func.func @transform_2(%arg0: i32, %arg1: i32) -> (i32, i32) {
    %c0_i32 = arith.constant 0 : i32
    %c0_i32_0 = arith.constant 0 : i32
    %c0_i32_1 = arith.constant 0 : i32
    return %c0_i32, %c0_i32_0 : i32, i32
  }
  func.func @transform_3(%arg0: i32, %arg1: i32) -> (i32, i32) {
    %c0_i32 = arith.constant 0 : i32
    %c0_i32_0 = arith.constant 0 : i32
    %c0_i32_1 = arith.constant 0 : i32
    return %c0_i32, %c0_i32_0 : i32, i32
  }
  func.func @transform_4(%arg0: i32, %arg1: i32) -> (i32, i32) {
    %c0_i32 = arith.constant 0 : i32
    %c0_i32_0 = arith.constant 0 : i32
    %c0_i32_1 = arith.constant 0 : i32
    return %c0_i32, %c0_i32_0 : i32, i32
  }
  func.func @transform_5(%arg0: i32, %arg1: i32) -> (i32, i32, i32) {
    %c0_i32 = arith.constant 0 : i32
    %c0_i32_0 = arith.constant 0 : i32
    %c0_i32_1 = arith.constant 0 : i32
    %c0_i32_2 = arith.constant 0 : i32
    return %c0_i32, %c0_i32_0, %c0_i32_1 : i32, i32, i32
  }
  func.func @transform_6(%arg0: i32, %arg1: i32) -> (i32, i32) {
    %c0_i32 = arith.constant 0 : i32
    %c0_i32_0 = arith.constant 0 : i32
    %c0_i32_1 = arith.constant 0 : i32
    return %c0_i32, %c0_i32_0 : i32, i32
  }
  func.func @transform_7(%arg0: i32, %arg1: i32) -> (i32, i32, i32) {
    %c0_i32 = arith.constant 0 : i32
    %c0_i32_0 = arith.constant 0 : i32
    %c0_i32_1 = arith.constant 0 : i32
    return %arg0, %c0_i32, %c0_i32_0 : i32, i32, i32
  }
}

module attributes {stable_mosaic.version = 11 : i64} {
  func.func @prior_disc_kernel(%arg0: i32, %arg1: i32, %arg2: memref<128x128xf32, #tpu.memory_space<vmem>>, %arg3: memref<128x1024xbf16, #tpu.memory_space<vmem>>, %arg4: memref<1x1024xf32, #tpu.memory_space<vmem>>, %arg5: memref<1024x256xbf16, #tpu.memory_space<vmem>>, %arg6: memref<1x256xf32, #tpu.memory_space<vmem>>, %arg7: memref<1x1x256xf32, #tpu.memory_space<vmem>>, %arg8: memref<1x1xf32, #tpu.memory_space<vmem>>, %arg9: memref<1x1x128xf32, #tpu.memory_space<vmem>>, %arg10: memref<128x1024xf32, #tpu.memory_space<vmem>>) attributes {dimension_semantics = [#tpu.dimension_semantics<parallel>, #tpu.dimension_semantics<arbitrary>], iteration_bounds = array<i64: 1, 1>, scalar_prefetch = 0 : i64, scratch_operands = 1 : i64, tpu.core_type = #tpu.core_type<tc>, window_params = [{transform_indices = @transform_0, window_bounds = array<i64: 128, 128>}, {transform_indices = @transform_1, window_bounds = array<i64: 128, 1024>}, {pipeline_mode = #tpu.pipeline_mode<synchronous>, transform_indices = @transform_2, window_bounds = array<i64: 1, 1024>}, {pipeline_mode = #tpu.pipeline_mode<synchronous>, transform_indices = @transform_3, window_bounds = array<i64: 1024, 256>}, {pipeline_mode = #tpu.pipeline_mode<synchronous>, transform_indices = @transform_4, window_bounds = array<i64: 1, 256>}, {pipeline_mode = #tpu.pipeline_mode<synchronous>, transform_indices = @transform_5, window_bounds = array<i64: 1, 1, 256>}, {pipeline_mode = #tpu.pipeline_mode<synchronous>, transform_indices = @transform_6, window_bounds = array<i64: 1, 1>}, {transform_indices = @transform_7, window_bounds = array<i64: 1, 1, 128>}]} {
    %c0_i32 = arith.constant 0 : i32
    %0 = arith.cmpi eq, %arg1, %c0_i32 : i32
    %1 = arith.extui %0 : i1 to i32
    %c0_i32_0 = arith.constant 0 : i32
    %2 = arith.cmpi ne, %1, %c0_i32_0 : i32
    scf.if %2 {
      %cst_10 = arith.constant 0.000000e+00 : f32
      %13 = vector.broadcast %cst_10 : f32 to vector<128x1024xf32>
      %c0_11 = arith.constant 0 : index
      %c0_12 = arith.constant 0 : index
      %14 = vector.load %arg10[%c0_11, %c0_12] : memref<128x1024xf32, #tpu.memory_space<vmem>>, vector<128x1024xf32>
      tpu.vector_store %arg10[%c0_11, %c0_12], %13 {strides = array<i32>} : memref<128x1024xf32, #tpu.memory_space<vmem>>, vector<128x1024xf32>,
    } else {
    }
    %c0 = arith.constant 0 : index
    %c0_1 = arith.constant 0 : index
    %3 = vector.load %arg10[%c0, %c0_1] : memref<128x1024xf32, #tpu.memory_space<vmem>>, vector<128x1024xf32>
    %c0_2 = arith.constant 0 : index
    %c0_3 = arith.constant 0 : index
    %4 = vector.load %arg2[%c0_2, %c0_3] : memref<128x128xf32, #tpu.memory_space<vmem>>, vector<128x128xf32>
    %5 = arith.truncf %4 : vector<128x128xf32> to vector<128x128xbf16>
    %c0_4 = arith.constant 0 : index
    %c0_5 = arith.constant 0 : index
    %6 = vector.load %arg3[%c0_4, %c0_5] : memref<128x1024xbf16, #tpu.memory_space<vmem>>, vector<128x1024xbf16>
    %cst = arith.constant dense<0.000000e+00> : vector<128x1024xf32>
    %7 = tpu.matmul %5, %6, %cst {dimension_numbers = #tpu.dot_dimension_numbers<[1], [0], [0], [1], [0, 0, 1, 1], [], []>} : vector<128x128xbf16>, vector<128x1024xbf16>, vector<128x1024xf32> -> vector<128x1024xf32>
    %8 = arith.addf %3, %7 : vector<128x1024xf32>
    %c0_6 = arith.constant 0 : index
    %c0_7 = arith.constant 0 : index
    %9 = vector.load %arg10[%c0_6, %c0_7] : memref<128x1024xf32, #tpu.memory_space<vmem>>, vector<128x1024xf32>
    tpu.vector_store %arg10[%c0_6, %c0_7], %8 {strides = array<i32>} : memref<128x1024xf32, #tpu.memory_space<vmem>>, vector<128x1024xf32>,
    %c0_i32_8 = arith.constant 0 : i32
    %10 = arith.cmpi eq, %arg1, %c0_i32_8 : i32
    %11 = arith.extui %10 : i1 to i32
    %c0_i32_9 = arith.constant 0 : i32
    %12 = arith.cmpi ne, %11, %c0_i32_9 : i32
    scf.if %12 {
      %c0_10 = arith.constant 0 : index
      %c0_11 = arith.constant 0 : index
      %13 = vector.load %arg10[%c0_10, %c0_11] : memref<128x1024xf32, #tpu.memory_space<vmem>>, vector<128x1024xf32>
      %c0_12 = arith.constant 0 : index
      %c0_13 = arith.constant 0 : index
      %14 = vector.load %arg4[%c0_12, %c0_13] : memref<1x1024xf32, #tpu.memory_space<vmem>>, vector<1x1024xf32>
      %15 = vector.broadcast %14 : vector<1x1024xf32> to vector<128x1024xf32>
      %16 = arith.addf %13, %15 : vector<128x1024xf32>
      %cst_14 = arith.constant 0.000000e+00 : f32
      %17 = vector.broadcast %cst_14 : f32 to vector<128x1024xf32>
      %18 = arith.maximumf %16, %17 : vector<128x1024xf32>
      %19 = arith.truncf %18 : vector<128x1024xf32> to vector<128x1024xbf16>
      %c0_15 = arith.constant 0 : index
      %c0_16 = arith.constant 0 : index
      %20 = vector.load %arg5[%c0_15, %c0_16] : memref<1024x256xbf16, #tpu.memory_space<vmem>>, vector<1024x256xbf16>
      %cst_17 = arith.constant dense<0.000000e+00> : vector<128x256xf32>
      %21 = tpu.matmul %19, %20, %cst_17 {dimension_numbers = #tpu.dot_dimension_numbers<[1], [0], [0], [1], [0, 0, 1, 1], [], []>} : vector<128x1024xbf16>, vector<1024x256xbf16>, vector<128x256xf32> -> vector<128x256xf32>
      %c0_18 = arith.constant 0 : index
      %c0_19 = arith.constant 0 : index
      %22 = vector.load %arg6[%c0_18, %c0_19] : memref<1x256xf32, #tpu.memory_space<vmem>>, vector<1x256xf32>
      %23 = vector.broadcast %22 : vector<1x256xf32> to vector<128x256xf32>
      %24 = arith.addf %21, %23 : vector<128x256xf32>
      %cst_20 = arith.constant 0.000000e+00 : f32
      %25 = vector.broadcast %cst_20 : f32 to vector<128x256xf32>
      %26 = arith.maximumf %24, %25 : vector<128x256xf32>
      %27 = vector.shape_cast %26 : vector<128x256xf32> to vector<1x128x256xf32>
      %c0_21 = arith.constant 0 : index
      %c0_22 = arith.constant 0 : index
      %c0_23 = arith.constant 0 : index
      %28 = vector.load %arg7[%c0_21, %c0_22, %c0_23] : memref<1x1x256xf32, #tpu.memory_space<vmem>>, vector<1x1x256xf32>
      %29 = vector.broadcast %28 : vector<1x1x256xf32> to vector<1x128x256xf32>
      %30 = arith.mulf %27, %29 : vector<1x128x256xf32>
      %cst_24 = arith.constant dense<0.000000e+00> : vector<1x128xf32>
      %31 = vector.multi_reduction <add>, %30, %cst_24 [2] : vector<1x128x256xf32> to vector<1x128xf32>
      %c0_25 = arith.constant 0 : index
      %c0_26 = arith.constant 0 : index
      %32 = vector.load %arg8[%c0_25, %c0_26] : memref<1x1xf32, #tpu.memory_space<vmem>>, vector<1x1xf32>
      %33 = vector.broadcast %32 : vector<1x1xf32> to vector<1x128xf32>
      %34 = arith.addf %31, %33 : vector<1x128xf32>
      %35 = arith.negf %34 : vector<1x128xf32>
      %36 = math.exp %35 : vector<1x128xf32>
      %cst_27 = arith.constant 1.000000e+00 : f32
      %37 = vector.broadcast %cst_27 : f32 to vector<1x128xf32>
      %38 = arith.addf %37, %36 : vector<1x128xf32>
      %39 = arith.divf %37, %38 : vector<1x128xf32>
      %40 = vector.shape_cast %39 : vector<1x128xf32> to vector<1x1x128xf32>
      %c0_28 = arith.constant 0 : index
      %c0_29 = arith.constant 0 : index
      %c0_30 = arith.constant 0 : index
      %41 = vector.load %arg9[%c0_28, %c0_29, %c0_30] : memref<1x1x128xf32, #tpu.memory_space<vmem>>, vector<1x1x128xf32>
      tpu.vector_store %arg9[%c0_28, %c0_29, %c0_30], %40 {strides = array<i32>} : memref<1x1x128xf32, #tpu.memory_space<vmem>>, vector<1x1x128xf32>,
    } else {
    }
    return
  }
  func.func @transform_0(%arg0: i32, %arg1: i32) -> (i32, i32) {
    %c0_i32 = arith.constant 0 : i32
    return %arg0, %arg1 : i32, i32
  }
  func.func @transform_1(%arg0: i32, %arg1: i32) -> (i32, i32) {
    %c0_i32 = arith.constant 0 : i32
    %c0_i32_0 = arith.constant 0 : i32
    return %arg1, %c0_i32 : i32, i32
  }
  func.func @transform_2(%arg0: i32, %arg1: i32) -> (i32, i32) {
    %c0_i32 = arith.constant 0 : i32
    %c0_i32_0 = arith.constant 0 : i32
    %c0_i32_1 = arith.constant 0 : i32
    return %c0_i32, %c0_i32_0 : i32, i32
  }
  func.func @transform_3(%arg0: i32, %arg1: i32) -> (i32, i32) {
    %c0_i32 = arith.constant 0 : i32
    %c0_i32_0 = arith.constant 0 : i32
    %c0_i32_1 = arith.constant 0 : i32
    return %c0_i32, %c0_i32_0 : i32, i32
  }
  func.func @transform_4(%arg0: i32, %arg1: i32) -> (i32, i32) {
    %c0_i32 = arith.constant 0 : i32
    %c0_i32_0 = arith.constant 0 : i32
    %c0_i32_1 = arith.constant 0 : i32
    return %c0_i32, %c0_i32_0 : i32, i32
  }
  func.func @transform_5(%arg0: i32, %arg1: i32) -> (i32, i32, i32) {
    %c0_i32 = arith.constant 0 : i32
    %c0_i32_0 = arith.constant 0 : i32
    %c0_i32_1 = arith.constant 0 : i32
    %c0_i32_2 = arith.constant 0 : i32
    return %c0_i32, %c0_i32_0, %c0_i32_1 : i32, i32, i32
  }
  func.func @transform_6(%arg0: i32, %arg1: i32) -> (i32, i32) {
    %c0_i32 = arith.constant 0 : i32
    %c0_i32_0 = arith.constant 0 : i32
    %c0_i32_1 = arith.constant 0 : i32
    return %c0_i32, %c0_i32_0 : i32, i32
  }
  func.func @transform_7(%arg0: i32, %arg1: i32) -> (i32, i32, i32) {
    %c0_i32 = arith.constant 0 : i32
    %c0_i32_0 = arith.constant 0 : i32
    %c0_i32_1 = arith.constant 0 : i32
    return %arg0, %c0_i32, %c0_i32_0 : i32, i32, i32
  }
}

</mosaic_0001>

<bundles_post_ra>
// kernel: tpu_custom_call.1
= control target key start
LH: loop header
LB: loop body
LE: loop exit
PB: predicated region body
PF: predicated region fallthrough
CT: control target
= control target key end

     0   :  { %s4917_s0 = inlined_call_operand.hbm [shape: f32[128,128], index: 0, kind: input, shape index: {}]   ;;  %s4918_s1 = inlined_call_operand.hbm [shape: bf16[128,1024], index: 1, kind: input, shape index: {}]   ;;  %s4919_s2 = inlined_call_operand.vmem [shape: f32[1,1024], index: 2, kind: input, shape index: {}]   ;;  %s4920_s3 = inlined_call_operand.hbm [shape: bf16[1024,256], index: 3, kind: input, shape index: {}]   ;;  %s4921_s4 = inlined_call_operand.vmem [shape: f32[1,256], index: 4, kind: input, shape index: {}]   ;;  %s4922_s5 = inlined_call_operand.vmem [shape: f32[1,1,256], index: 5, kind: input, shape index: {}]   ;;  %s4923_s6 = inlined_call_operand.<no memory space> [shape: f32[1,1], index: 6, kind: input, shape index: {}]   ;;  %s4924_s7 = inlined_call_operand.hbm [shape: f32[1,1,128], index: 7, kind: output, shape index: {}]  }
   0x1   :  { %v12_v0 = vstv %s4923_s6 }
   0x2   :  { %13 = vst [vmem:[#allocation3] sm:$0x1] %v12_v0 }
   0x3   :  { %14 = vsyncpa [#allocation5], 0 }
   0x4   :  { %15 = vsyncpa [#allocation8], 0 }
   0x5   :  { %16 = vsyncpa [#allocation6], 0  ;;  %s4260_s26 = smov [#allocation7]   ;;  %s4166_s30 = scalar_lea.hbm %s4918_s1, 8192 }
   0x6   :  { %s34_s27 = sshll.u32 %s4260_s26, 4  ;;  %p4167_p0 = scmp.ne.s32.totalorder %s4918_s1, %s4166_s30  ;;  %s35_s27 = int_to_ptr.vmem [resolvable:$true] %s34_s27 }
   0x7   :  { %p4170_p1 = scmp.lt.u32.totalorder %s4166_s30, %s4918_s1 }
   0x9   :  { %p4172_p2 = pnand %p4170_p1, %p4167_p0 }
   0xb   :  { %4175 = shalt.err (!%p4172_p2)
}
   0xc   :  { %s4176_s6 = scalar_lea.vmem %s35_s27, 8192  ;;  %p4181_p4 = scmp.lt.s32.totalorder %s35_s27, %s35_s27 }
   0xd   :  { %p4177_p3 = scmp.ne.s32.totalorder %s35_s27, %s4176_s6  ;;  %p4182_p5 = scmp.lt.s32.totalorder %s4176_s6, %s4176_s6 }
   0xf   :  { %p4183_p6 = por %p4182_p5, %p4181_p4 }
  0x11   :  { %p4184_p7 = pnand %p4183_p6, %p4177_p3 }
  0x13   :  { %4187 = shalt.err (!%p4184_p7)
}
  0x14   :  { %s4261_s12 = smov 512   ;;  %s4262_s13 = smov 32  }
  0x15   :  { %40 = dma.hbm_to_vmem [thread:$0]  %s4918_s1, 8192, %s35_s27, [#allocation8], %s4261_s12, %s4261_s12, %s4262_s13  }
  0x16   :  { %s4263_s16 = smov [#allocation4]   ;;  %s4188_s20 = scalar_lea.hbm %s4917_s0, 2048 }
  0x17   :  { %s22_s17 = sshll.u32 %s4263_s16, 4  ;;  %p4189_p8 = scmp.ne.s32.totalorder %s4917_s0, %s4188_s20  ;;  %s23_s17 = int_to_ptr.vmem [resolvable:$true] %s22_s17 }
  0x18   :  { %p4192_p9 = scmp.lt.u32.totalorder %s4188_s20, %s4917_s0 }
  0x1a   :  { %p4194_p10 = pnand %p4192_p9, %p4189_p8 }
  0x1c   :  { %4197 = shalt.err (!%p4194_p10)
}
  0x1d   :  { %s4198_s25 = scalar_lea.vmem %s23_s17, 2048  ;;  %p4203_p12 = scmp.lt.s32.totalorder %s23_s17, %s23_s17 }
  0x1e   :  { %p4199_p11 = scmp.ne.s32.totalorder %s23_s17, %s4198_s25  ;;  %p4204_p13 = scmp.lt.s32.totalorder %s4198_s25, %s4198_s25 }
  0x20   :  { %p4205_p0 = por %p4204_p13, %p4203_p12 }
  0x22   :  { %p4206_p1 = pnand %p4205_p0, %p4199_p11 }
  0x24   :  { %4209 = shalt.err (!%p4206_p1)
}
  0x25   :  { %s4264_s1 = smov 128   ;;  %s4265_s26 = smov 8  }
  0x26   :  { %28 = dma.hbm_to_vmem [thread:$0]  %s4917_s0, 2048, %s23_s17, [#allocation5], %s4264_s1, %s4264_s1, %s4265_s26  }
  0x27   :  { %s4266_s29 = smov [#allocation9]   ;;  %s4210_s10 = scalar_lea.hbm %s4920_s3, 16384 }
  0x28   :  { %s48_s30 = sshll.u32 %s4266_s29, 4  ;;  %p4211_p2 = scmp.ne.s32.totalorder %s4920_s3, %s4210_s10  ;;  %s49_s30 = int_to_ptr.vmem [resolvable:$true] %s48_s30 }
  0x29   :  { %p4214_p3 = scmp.lt.u32.totalorder %s4210_s10, %s4920_s3 }
  0x2b   :  { %p4216_p4 = pnand %p4214_p3, %p4211_p2 }
  0x2d   :  { %4219 = shalt.err (!%p4216_p4)
}
  0x2e   :  { %s4220_s14 = scalar_lea.vmem %s49_s30, 16384  ;;  %p4225_p6 = scmp.lt.s32.totalorder %s49_s30, %s49_s30 }
  0x2f   :  { %p4221_p5 = scmp.ne.s32.totalorder %s49_s30, %s4220_s14  ;;  %p4226_p7 = scmp.lt.s32.totalorder %s4220_s14, %s4220_s14 }
  0x31   :  { %p4227_p8 = por %p4226_p7, %p4225_p6 }
  0x33   :  { %p4228_p9 = pnand %p4227_p8, %p4221_p5 }
  0x35   :  { %4231 = shalt.err (!%p4228_p9)
}
  0x36   :  { %54 = dma.hbm_to_vmem [thread:$0]  %s4920_s3, 16384, %s49_s30, [#allocation8], %s4264_s1, %s4264_s1, %s4265_s26  }
  0x37   :  { %4254 = dma.done.wait [#allocation5], 2048  }
  0x38   :  { %4255 = vsyncadd [#allocation5], 4294965248 }
  0x39   :  { %4256 = dma.done.wait [#allocation8], 24576  }
  0x3a   :  { %4257 = vsyncadd [#allocation8], 4294942720  ;;  %v4267_v1 = vmov 0   ;;  %v355_v2 = vld [vmem:[#allocation7] sm:$0xff]  ;;  %v357_v24 = vld [vmem:[#allocation7 + $0x10] sm:$0xff]  ;;  %vm3445_vm0 = vcmask 130112  }
  0x3b   :  { %771 = vmatprep.mubr.bf16.mxu1 %v4267_v1  ;;  %997 = vmatprep.mubr.bf16.mxu0 %v4267_v1  ;;  %v359_v3 = vld [vmem:[#allocation7 + $0x20] sm:$0xff]  ;;  %v361_v25 = vld [vmem:[#allocation7 + $0x30] sm:$0xff]  ;;  %v356_v45 = vld [vmem:[#allocation7 + $0x8] sm:$0xff]  ;;  %vm3452_vm1 = vcmask 195712   ;;  %vm3459_vm2 = vcmask 261312   ;;  %vm3466_vm3 = vcmask 326912  }
  0x3c   :  { %3908 = vset.pattern.permute.xlu1 %v4267_v1  ;;  %3909 = vset.pattern.permute.xlu0 %v4267_v1  ;;  %v363_v4 = vld [vmem:[#allocation7 + $0x40] sm:$0xff]  ;;  %v3564_v5 = vcombine.high %v355_v2, %v359_v3  ;;  %v3563_v6 = vcombine.low %v355_v2, %v359_v3  ;;  %v365_v26 = vld [vmem:[#allocation7 + $0x50] sm:$0xff]  ;;  %v3568_v29 = vcombine.high %v357_v24, %v361_v25  ;;  %v360_v46 = vld [vmem:[#allocation7 + $0x28] sm:$0xff]  ;;  %vm3473_vm4 = vcmask 392512  }
  0x3d   :  { %v367_v7 = vld [vmem:[#allocation7 + $0x60] sm:$0xff]  ;;  %v3567_v30 = vcombine.low %v357_v24, %v361_v25  ;;  %v369_v31 = vld [vmem:[#allocation7 + $0x70] sm:$0xff]  ;;  %v332_v54 = vld [vmem:[#allocation4 + $0x8] sm:$0xff]  ;;  %v3566_v56 = vcombine.high %v356_v45, %v360_v46  ;;  %v3565_v63 = vcombine.low %v356_v45, %v360_v46  ;;  %vm3480_vm5 = vcmask 458112  }
  0x3e   :  { %v3572_v8 = vcombine.high %v363_v4, %v367_v7  ;;  %v371_v9 = vld [vmem:[#allocation7 + $0x80] sm:$0xff]  ;;  %739 = vmatprep.subr.bf16.mxu1 %v3564_v5  ;;  %v3571_v11 = vcombine.low %v363_v4, %v367_v7  ;;  %v3576_v33 = vcombine.high %v365_v26, %v369_v31  ;;  %v373_v34 = vld [vmem:[#allocation7 + $0x90] sm:$0xff]  ;;  %965 = vmatprep.subr.bf16.mxu0 %v3568_v29  ;;  %v364_v58 = vld [vmem:[#allocation7 + $0x48] sm:$0xff]  ;;  %vm3487_vm6 = vcmask 523712  }
  0x3f   :  { %v375_v10 = vld [vmem:[#allocation7 + $0xa0] sm:$0xff]  ;;  %740 = vmatpush1.bf16.msra.mxu1 %v3563_v6  ;;  %v377_v35 = vld [vmem:[#allocation7 + $0xb0] sm:$0xff]  ;;  %966 = vmatpush1.bf16.msra.mxu0 %v3567_v30  ;;  %v3575_v39 = vcombine.low %v365_v26, %v369_v31  ;;  %v368_v59 = vld [vmem:[#allocation7 + $0x68] sm:$0xff]  ;;  %vm3494_vm7 = vcmask 589312   ;;  %vm3501_vm8 = vcmask 654912   ;;  %vm3508_vm9 = vcmask 720512  }
  0x40   :  { %741 = vmatprep.subr.bf16.mxu1 %v3572_v8  ;;  %v3580_v12 = vcombine.high %v371_v9, %v375_v10  ;;  %v379_v13 = vld [vmem:[#allocation7 + $0xc0] sm:$0xff]  ;;  %v3579_v15 = vcombine.low %v371_v9, %v375_v10  ;;  %v381_v40 = vld [vmem:[#allocation7 + $0xd0] sm:$0xff]  ;;  %967 = vmatprep.subr.bf16.mxu0 %v3576_v33  ;;  %v3584_v43 = vcombine.high %v373_v34, %v377_v35  ;;  %v372_v0 = vld [vmem:[#allocation7 + $0x88] sm:$0xff]  ;;  %vm3515_vm10 = vcmask 786112  }
  0x41   :  { %v383_v14 = vld [vmem:[#allocation7 + $0xe0] sm:$0xff]  ;;  %v385_v41 = vld [vmem:[#allocation7 + $0xf0] sm:$0xff]  ;;  %v3583_v47 = vcombine.low %v373_v34, %v377_v35  ;;  %v376_v2 = vld [vmem:[#allocation7 + $0xa8] sm:$0xff]  ;;  %v3574_v3 = vcombine.high %v364_v58, %v368_v59  ;;  %v3573_v10 = vcombine.low %v364_v58, %v368_v59  ;;  %vm3522_vm11 = vcmask 851712  }
  0x42   :  { %v3588_v16 = vcombine.high %v379_v13, %v383_v14  ;;  %v387_v17 = vld [vmem:[#allocation7 + $0x100] sm:$0xff]  ;;  %v3587_v19 = vcombine.low %v379_v13, %v383_v14  ;;  %v3592_v49 = vcombine.high %v381_v40, %v385_v41  ;;  %v389_v50 = vld [vmem:[#allocation7 + $0x110] sm:$0xff]  ;;  %v3591_v55 = vcombine.low %v381_v40, %v385_v41  ;;  %v334_v6 = vld [vmem:[#allocation4 + $0x18] sm:$0xff] }
  0x43   :  { %742 = vmatpush1.bf16.msra.mxu1 %v3571_v11  ;;  %v391_v18 = vld [vmem:[#allocation7 + $0x120] sm:$0xff]  ;;  %968 = vmatpush1.bf16.msra.mxu0 %v3575_v39  ;;  %v393_v51 = vld [vmem:[#allocation7 + $0x130] sm:$0xff]  ;;  %v380_v11 = vld [vmem:[#allocation7 + $0xc8] sm:$0xff]  ;;  %v3582_v13 = vcombine.high %v372_v0, %v376_v2  ;;  %vm3529_vm12 = vcmask 917312   ;;  %vm3536_vm13 = vcmask 982912   ;;  %vm3543_vm14 = vcmask 1048512  }
  0x44   :  { %743 = vmatprep.subr.bf16.mxu1 %v3580_v12  ;;  %v3596_v20 = vcombine.high %v387_v17, %v391_v18  ;;  %v395_v21 = vld [vmem:[#allocation7 + $0x140] sm:$0xff]  ;;  %v3595_v23 = vcombine.low %v387_v17, %v391_v18  ;;  %969 = vmatprep.subr.bf16.mxu0 %v3584_v43  ;;  %v3600_v57 = vcombine.high %v389_v50, %v393_v51  ;;  %v397_v61 = vld [vmem:[#allocation7 + $0x150] sm:$0xff]  ;;  %v384_v12 = vld [vmem:[#allocation7 + $0xe8] sm:$0xff] }
  0x45   :  { %v399_v22 = vld [vmem:[#allocation7 + $0x160] sm:$0xff]  ;;  %v401_v62 = vld [vmem:[#allocation7 + $0x170] sm:$0xff]  ;;  %v3599_v4 = vcombine.low %v389_v50, %v393_v51  ;;  %v336_v26 = vld [vmem:[#allocation4 + $0x28] sm:$0xff] }
  0x46   :  { %v3604_v27 = vcombine.high %v395_v21, %v399_v22  ;;  %v403_v28 = vld [vmem:[#allocation7 + $0x180] sm:$0xff]  ;;  %v3603_v36 = vcombine.low %v395_v21, %v399_v22  ;;  %v333_v5 = vld [vmem:[#allocation4 + $0x10] sm:$0xff]  ;;  %v3608_v7 = vcombine.high %v397_v61, %v401_v62  ;;  %v3607_v14 = vcombine.low %v397_v61, %v401_v62  ;;  %v392_v21 = vld [vmem:[#allocation7 + $0x128] sm:$0xff] }
  0x47   :  { %744 = vmatpush1.bf16.msra.mxu1 %v3579_v15  ;;  %v407_v32 = vld [vmem:[#allocation7 + $0x1a0] sm:$0xff]  ;;  %970 = vmatpush1.bf16.msra.mxu0 %v3583_v47  ;;  %v405_v8 = vld [vmem:[#allocation7 + $0x190] sm:$0xff]  ;;  %v4356_v18 = vpack.c.bf16 %v334_v6, %v333_v5  ;;  %v3590_v22 = vcombine.high %v380_v11, %v384_v12  ;;  %v400_v29 = vld [vmem:[#allocation7 + $0x168] sm:$0xff] }
  0x48   :  { %745 = vmatprep.subr.bf16.mxu1 %v3588_v16  ;;  %v411_v37 = vld [vmem:[#allocation7 + $0x1c0] sm:$0xff]  ;;  %v3612_v42 = vcombine.high %v403_v28, %v407_v32  ;;  %v3611_v44 = vcombine.low %v403_v28, %v407_v32  ;;  %971 = vmatprep.subr.bf16.mxu0 %v3592_v49  ;;  %v409_v9 = vld [vmem:[#allocation7 + $0x1b0] sm:$0xff]  ;;  %v396_v28 = vld [vmem:[#allocation7 + $0x148] sm:$0xff] }
  0x49   :  { %v415_v38 = vld [vmem:[#allocation7 + $0x1e0] sm:$0xff]  ;;  %v413_v15 = vld [vmem:[#allocation7 + $0x1d0] sm:$0xff]  ;;  %v3616_v17 = vcombine.high %v405_v8, %v409_v9  ;;  %v404_v34 = vld [vmem:[#allocation7 + $0x188] sm:$0xff]  ;;  %v3605_v39 = vcombine.low %v396_v28, %v400_v29 }
  0x4a   :  { %v3620_v48 = vcombine.high %v411_v37, %v415_v38  ;;  %v3619_v52 = vcombine.low %v411_v37, %v415_v38  ;;  %v331_v53 = vld [vmem:[#allocation4] sm:$0xff]  ;;  %v417_v16 = vld [vmem:[#allocation7 + $0x1f0] sm:$0xff]  ;;  %v408_v35 = vld [vmem:[#allocation7 + $0x1a8] sm:$0xff] }
  0x4b   :  { %746 = vmatpush1.bf16.msra.mxu1 %v3587_v19  ;;  %v4352_v60 = vpack.c.bf16 %v332_v54, %v331_v53  ;;  %972 = vmatpush1.bf16.msra.mxu0 %v3591_v55  ;;  %v3581_v19 = vcombine.low %v372_v0, %v376_v2  ;;  %v3624_v24 = vcombine.high %v413_v15, %v417_v16  ;;  %v335_v25 = vld [vmem:[#allocation4 + $0x20] sm:$0xff]  ;;  %v337_v37 = vld [vmem:[#allocation4 + $0x30] sm:$0xff]  ;;  %v338_v38 = vld [vmem:[#allocation4 + $0x38] sm:$0xff] }
  0x4c   :  { %747 = vmatprep.subr.bf16.mxu1 %v3596_v20  ;;  %973 = vmatprep.subr.bf16.mxu0 %v3600_v57  ;;  %v388_v20 = vld [vmem:[#allocation7 + $0x108] sm:$0xff]  ;;  %v3623_v31 = vcombine.low %v413_v15, %v417_v16  ;;  %v4360_v32 = vpack.c.bf16 %v336_v26, %v335_v25  ;;  %v4366_v43 = vpack.c.bf16 %v338_v38, %v337_v37  ;;  %v358_v45 = vld [vmem:[#allocation7 + $0x18] sm:$0xff]  ;;  %v341_v53 = vld [vmem:[#allocation4 + $0x50] sm:$0xff] }
  0x4d   :  { %v3598_v30 = vcombine.high %v388_v20, %v392_v21  ;;  %v3597_v33 = vcombine.low %v388_v20, %v392_v21  ;;  %v412_v40 = vld [vmem:[#allocation7 + $0x1c8] sm:$0xff]  ;;  %v362_v46 = vld [vmem:[#allocation7 + $0x38] sm:$0xff]  ;;  %v345_v59 = vld [vmem:[#allocation4 + $0x70] sm:$0xff] }
  0x4e   :  { %v416_v41 = vld [vmem:[#allocation7 + $0x1e8] sm:$0xff]  ;;  %v3570_v51 = vcombine.high %v358_v45, %v362_v46  ;;  %v342_v54 = vld [vmem:[#allocation4 + $0x58] sm:$0xff]  ;;  %v3569_v2 = vcombine.low %v358_v45, %v362_v46 }
  0x4f   :  { %748 = vmatpush1.bf16.msra.mxu1 %v3595_v23  ;;  %974 = vmatpush1.bf16.msra.mxu0 %v3599_v4  ;;  %v3615_v23 = vcombine.low %v405_v8, %v409_v9  ;;  %v3622_v47 = vcombine.high %v412_v40, %v416_v41  ;;  %v340_v49 = vld [vmem:[#allocation4 + $0x48] sm:$0xff]  ;;  %v3621_v50 = vcombine.low %v412_v40, %v416_v41  ;;  %v346_v61 = vld [vmem:[#allocation4 + $0x78] sm:$0xff] }
  0x50   :  { %749 = vmatprep.subr.bf16.mxu1 %v3604_v27  ;;  %975 = vmatprep.subr.bf16.mxu0 %v3608_v7  ;;  %v3589_v27 = vcombine.low %v380_v11, %v384_v12  ;;  %v4378_v55 = vpack.c.bf16 %v342_v54, %v341_v53  ;;  %v344_v57 = vld [vmem:[#allocation4 + $0x68] sm:$0xff]  ;;  %v4390_v62 = vpack.c.bf16 %v346_v61, %v345_v59  ;;  %v370_v0 = vld [vmem:[#allocation7 + $0x78] sm:$0xff] }
  0x51   :  { %v374_v4 = vld [vmem:[#allocation7 + $0x98] sm:$0xff]  ;;  %v3964_v37 = vld [vmem:[#allocation9 + $0x120] ss:$8 sps:$4 sm:$0xff]   ;;  %v3972_v40 = vld [vmem:[#allocation9 + $0x144] ss:$8 sps:$4 sm:$0xff]  }
  0x52   :  { %v378_v5 = vld [vmem:[#allocation7 + $0xb8] sm:$0xff]  ;;  %v3970_v41 = vld [vmem:[#allocation9 + $0x140] ss:$8 sps:$4 sm:$0xff]   ;;  %v3978_v45 = vld [vmem:[#allocation9 + $0x164] ss:$8 sps:$4 sm:$0xff]  }
  0x53   :  { %750 = vmatpush1.bf16.msra.mxu1 %v3603_v36  ;;  %976 = vmatpush1.bf16.msra.mxu0 %v3607_v14  ;;  %v3606_v36 = vcombine.high %v396_v28, %v400_v29  ;;  %v3586_v7 = vcombine.high %v374_v4, %v378_v5  ;;  %v382_v8 = vld [vmem:[#allocation7 + $0xd8] sm:$0xff]  ;;  %v3976_v46 = vld [vmem:[#allocation9 + $0x160] ss:$8 sps:$4 sm:$0xff]   ;;  %v3918_v59 = vld [vmem:[#allocation9 + $0x24] ss:$8 sps:$4 sm:$0xff]  }
  0x54   :  { %751 = vmatprep.subr.bf16.mxu1 %v3612_v42  ;;  %977 = vmatprep.subr.bf16.mxu0 %v3616_v17  ;;  %v3614_v42 = vcombine.high %v404_v34, %v408_v35  ;;  %v386_v9 = vld [vmem:[#allocation7 + $0xf8] sm:$0xff]  ;;  %v3990_v61 = vld [vmem:[#allocation9 + $0x1a4] ss:$8 sps:$4 sm:$0xff]  }
  0x55   :  { %v3594_v11 = vcombine.high %v382_v8, %v386_v9  ;;  %v390_v12 = vld [vmem:[#allocation7 + $0x118] sm:$0xff]  ;;  %v3593_v14 = vcombine.low %v382_v8, %v386_v9  ;;  %v3994_v8 = vld [vmem:[#allocation9 + $0x1c0] ss:$8 sps:$4 sm:$0xff]  }
  0x56   :  { %v398_v16 = vld [vmem:[#allocation7 + $0x158] sm:$0xff] }
  0x57   :  { %752 = vmatpush1.bf16.msra.mxu1 %v3611_v44  ;;  %978 = vmatpush1.bf16.msra.mxu0 %v3615_v23  ;;  %v3613_v44 = vcombine.low %v404_v34, %v408_v35  ;;  %v402_v17 = vld [vmem:[#allocation7 + $0x178] sm:$0xff] }
  0x58   :  { %753 = vmatprep.subr.bf16.mxu1 %v3620_v48  ;;  %979 = vmatprep.subr.bf16.mxu0 %v3624_v24  ;;  %v339_v48 = vld [vmem:[#allocation4 + $0x40] sm:$0xff]  ;;  %v3610_v20 = vcombine.high %v398_v16, %v402_v17  ;;  %v406_v21 = vld [vmem:[#allocation7 + $0x198] sm:$0xff]  ;;  %v3609_v23 = vcombine.low %v398_v16, %v402_v17 }
  0x59   :  { %v414_v25 = vld [vmem:[#allocation7 + $0x1d8] sm:$0xff] }
  0x5a   :  { %v418_v26 = vld [vmem:[#allocation7 + $0x1f8] sm:$0xff] }
  0x5b   :  { %754 = vmatpush1.bf16.msra.mxu1 %v3619_v52  ;;  %980 = vmatpush1.bf16.msra.mxu0 %v3623_v31  ;;  %v4372_v52 = vpack.c.bf16 %v340_v49, %v339_v48  ;;  %v3626_v28 = vcombine.high %v414_v25, %v418_v26  ;;  %v3625_v29 = vcombine.low %v414_v25, %v418_v26  ;;  %v3960_v31 = vld [vmem:[#allocation9 + $0x104] ss:$8 sps:$4 sm:$0xff]   ;;  %v3963_v34 = vld [vmem:[#allocation9 + $0x114] ss:$8 sps:$4 sm:$0xff]   ;;  %v3961_v35 = vld [vmem:[#allocation9 + $0x110] ss:$8 sps:$4 sm:$0xff]  }
  0x5c   :  { %852 = vmatprep.subr.bf16.mxu1 %v3566_v56  ;;  %v343_v56 = vld [vmem:[#allocation4 + $0x60] sm:$0xff]  ;;  %2833 = vmatprep.subr.bf16.mxu0 %v3960_v31  ;;  %v3969_v38 = vld [vmem:[#allocation9 + $0x134] ss:$8 sps:$4 sm:$0xff]   ;;  %v3979_v48 = vld [vmem:[#allocation9 + $0x170] ss:$8 sps:$4 sm:$0xff]  }
  0x5d   :  { %v4384_v58 = vpack.c.bf16 %v344_v57, %v343_v56  ;;  %v3984_v49 = vld [vmem:[#allocation9 + $0x184] ss:$8 sps:$4 sm:$0xff]   ;;  %v3915_v53 = vld [vmem:[#allocation9 + $0x14] ss:$8 sps:$4 sm:$0xff]   ;;  %v3913_v56 = vld [vmem:[#allocation9 + $0x10] ss:$8 sps:$4 sm:$0xff]  }
  0x5e   :  { %772 = vmatmul.mubr.bf16.vlgmr.msra.gmra.mrb[0].mxu1 %v4352_v60  ;;  %998 = vmatmul.mubr.bf16.vlgmr.msra.gmra.mrb[0].mxu0 %v4352_v60  ;;  %v3987_v54 = vld [vmem:[#allocation9 + $0x194] ss:$8 sps:$4 sm:$0xff]   ;;  %v3985_v57 = vld [vmem:[#allocation9 + $0x190] ss:$8 sps:$4 sm:$0xff]   ;;  %v3940_v25 = vld [vmem:[#allocation9 + $0xa0] ss:$8 sps:$4 sm:$0xff]  }
  0x5f   :  { %853 = vmatpush1.bf16.msra.mxu1 %v3565_v63  ;;  %781 = vmatprep.mubr.bf16.mxu1 %v4267_v1  ;;  %v366_v63 = vld [vmem:[#allocation7 + $0x58] sm:$0xff]  ;;  %v3954_v31 = vld [vmem:[#allocation9 + $0xe4] ss:$8 sps:$4 sm:$0xff]  }
  0x60   :  { %854 = vmatprep.subr.bf16.mxu1 %v3574_v3  ;;  %1007 = vmatprep.mubr.bf16.mxu0 %v4267_v1  ;;  %v3578_v3 = vcombine.high %v366_v63, %v370_v0  ;;  %v3577_v6 = vcombine.low %v366_v63, %v370_v0  ;;  %v3916_v63 = vld [vmem:[#allocation9 + $0x20] ss:$8 sps:$4 sm:$0xff]   ;;  %v3927_v9 = vld [vmem:[#allocation9 + $0x54] ss:$8 sps:$4 sm:$0xff]   ;;  %v3931_v17 = vld [vmem:[#allocation9 + $0x70] ss:$8 sps:$4 sm:$0xff]  }
  0x61   :  { %v3988_v0 = vld [vmem:[#allocation9 + $0x1a0] ss:$8 sps:$4 sm:$0xff]   ;;  %v3933_v16 = vld [vmem:[#allocation9 + $0x74] ss:$8 sps:$4 sm:$0xff]  }
  0x62   :  { %v3945_v26 = vld [vmem:[#allocation9 + $0xb4] ss:$8 sps:$4 sm:$0xff]  }
  0x63   :  { %855 = vmatpush1.bf16.msra.mxu1 %v3573_v10  ;;  %v3585_v10 = vcombine.low %v374_v4, %v378_v5  ;;  %v3991_v4 = vld [vmem:[#allocation9 + $0x1b0] ss:$8 sps:$4 sm:$0xff]   ;;  %v3924_v5 = vld [vmem:[#allocation9 + $0x44] ss:$8 sps:$4 sm:$0xff]  }
  0x64   :  { %856 = vmatprep.subr.bf16.mxu1 %v3582_v13  ;;  %v394_v13 = vld [vmem:[#allocation7 + $0x138] sm:$0xff] }
  0x65   :  { %v3602_v15 = vcombine.high %v390_v12, %v394_v13 }
  0x66   :  { %782 = vmatmul.mubr.bf16.gmra.mrb[4].mxu1 %v4356_v18  ;;  %1008 = vmatmul.mubr.bf16.gmra.mrb[4].mxu0 %v4356_v18 }
  0x67   :  { %791 = vmatprep.mubr.bf16.mxu1 %v4267_v1  ;;  %857 = vmatpush1.bf16.msra.mxu1 %v3581_v19  ;;  %v3601_v19 = vcombine.low %v390_v12, %v394_v13  ;;  %v3930_v12 = vld [vmem:[#allocation9 + $0x64] ss:$8 sps:$4 sm:$0xff]  }
  0x68   :  { %858 = vmatprep.subr.bf16.mxu1 %v3590_v22  ;;  %1017 = vmatprep.mubr.bf16.mxu0 %v4267_v1  ;;  %v410_v22 = vld [vmem:[#allocation7 + $0x1b8] sm:$0xff]  ;;  %v4002_v13 = vld [vmem:[#allocation9 + $0x1e4] ss:$8 sps:$4 sm:$0xff]  }
  0x69   :  { %v3618_v24 = vcombine.high %v406_v21, %v410_v22 }
  0x6b   :  { %859 = vmatpush1.bf16.msra.mxu1 %v3589_v27  ;;  %v3617_v27 = vcombine.low %v406_v21, %v410_v22  ;;  %v4008_v21 = vld [vmem:[#allocation9 + $0x204] ss:$8 sps:$4 sm:$0xff]   ;;  %v3934_v22 = vld [vmem:[#allocation9 + $0x80] ss:$8 sps:$4 sm:$0xff]  }
  0x6c   :  { %860 = vmatprep.subr.bf16.mxu1 %v3598_v30  ;;  %v3912_v30 = vld [vmem:[#allocation9 + $0x4] ss:$8 sps:$4 sm:$0xff]  }
  0x6e   :  { %792 = vmatmul.mubr.bf16.gmra.mrb[8].mxu1 %v4360_v32  ;;  %1018 = vmatmul.mubr.bf16.gmra.mrb[8].mxu0 %v4360_v32 }
  0x6f   :  { %801 = vmatprep.mubr.bf16.mxu1 %v4267_v1  ;;  %861 = vmatpush1.bf16.msra.mxu1 %v3597_v33  ;;  %v3958_v33 = vld [vmem:[#allocation9 + $0x100] ss:$8 sps:$4 sm:$0xff]  }
  0x70   :  { %862 = vmatprep.subr.bf16.mxu1 %v3606_v36  ;;  %1027 = vmatprep.mubr.bf16.mxu0 %v4267_v1  ;;  %v3966_v36 = vld [vmem:[#allocation9 + $0x124] ss:$8 sps:$4 sm:$0xff]  }
  0x71   :  { %2834 = vmatpush1.bf16.msra.mxu0 %v3958_v33  ;;  %v3957_v33 = vld [vmem:[#allocation9 + $0xf4] ss:$8 sps:$4 sm:$0xff]  }
  0x72   :  { %2835 = vmatprep.subr.bf16.mxu0 %v3963_v34  ;;  %v3955_v34 = vld [vmem:[#allocation9 + $0xf0] ss:$8 sps:$4 sm:$0xff]  }
  0x73   :  { %863 = vmatpush1.bf16.msra.mxu1 %v3605_v39  ;;  %v3967_v39 = vld [vmem:[#allocation9 + $0x130] ss:$8 sps:$4 sm:$0xff]  }
  0x74   :  { %864 = vmatprep.subr.bf16.mxu1 %v3614_v42  ;;  %v3975_v42 = vld [vmem:[#allocation9 + $0x154] ss:$8 sps:$4 sm:$0xff]  }
  0x75   :  { %2836 = vmatpush1.bf16.msra.mxu0 %v3961_v35  ;;  %v1580_v35 = vlaneseq }
  0x76   :  { %802 = vmatmul.mubr.bf16.gmra.mrb[12].mxu1 %v4366_v43  ;;  %1028 = vmatmul.mubr.bf16.gmra.mrb[12].mxu0 %v4366_v43 }
  0x77   :  { %811 = vmatprep.mubr.bf16.mxu1 %v4267_v1  ;;  %865 = vmatpush1.bf16.msra.mxu1 %v3613_v44  ;;  %v3973_v44 = vld [vmem:[#allocation9 + $0x150] ss:$8 sps:$4 sm:$0xff]  }
  0x78   :  { %866 = vmatprep.subr.bf16.mxu1 %v3622_v47  ;;  %1037 = vmatprep.mubr.bf16.mxu0 %v4267_v1  ;;  %v3981_v47 = vld [vmem:[#allocation9 + $0x174] ss:$8 sps:$4 sm:$0xff]  }
  0x79   :  { %2837 = vmatprep.subr.bf16.mxu0 %v3966_v36  ;;  %v4431_v36 = vshrl.u32 %v1580_v35, 7 }
  0x7a   :  { %2838 = vmatpush1.bf16.msra.mxu0 %v3964_v37 }
  0x7b   :  { %867 = vmatpush1.bf16.msra.mxu1 %v3621_v50  ;;  %2839 = vmatprep.subr.bf16.mxu0 %v3969_v38  ;;  %v3910_v50 = vld [vmem:[#allocation9] ss:$8 sps:$4 sm:$0xff]   ;;  %v4442_v37 = vsub.s32 1, %v4431_v36 }
  0x7c   :  { %1078 = vmatprep.subr.bf16.mxu1 %v3570_v51  ;;  %v3982_v51 = vld [vmem:[#allocation9 + $0x180] ss:$8 sps:$4 sm:$0xff]  }
  0x7e   :  { %812 = vmatmul.mubr.bf16.gmra.mrb[16].mxu1 %v4372_v52  ;;  %1038 = vmatmul.mubr.bf16.gmra.mrb[16].mxu0 %v4372_v52 }
  0x7f   :  { %821 = vmatprep.mubr.bf16.mxu1 %v4267_v1  ;;  %1047 = vmatprep.mubr.bf16.mxu0 %v4267_v1 }
  0x80   :  { %2840 = vmatpush1.bf16.msra.mxu0 %v3967_v39 }
  0x81   :  { %2841 = vmatprep.subr.bf16.mxu0 %v3972_v40 }
  0x84   :  { %2842 = vmatpush1.bf16.msra.mxu0 %v3970_v41 }
  0x85   :  { %2843 = vmatprep.subr.bf16.mxu0 %v3975_v42 }
  0x86   :  { %822 = vmatmul.mubr.bf16.gmra.mrb[20].mxu1 %v4378_v55  ;;  %1048 = vmatmul.mubr.bf16.gmra.mrb[20].mxu0 %v4378_v55 }
  0x87   :  { %831 = vmatprep.mubr.bf16.mxu1 %v4267_v1  ;;  %1057 = vmatprep.mubr.bf16.mxu0 %v4267_v1 }
  0x88   :  { %2844 = vmatpush1.bf16.msra.mxu0 %v3973_v44 }
  0x89   :  { %2845 = vmatprep.subr.bf16.mxu0 %v3978_v45 }
  0x8c   :  { %2846 = vmatpush1.bf16.msra.mxu0 %v3976_v46 }
  0x8d   :  { %2847 = vmatprep.subr.bf16.mxu0 %v3981_v47 }
  0x8e   :  { %832 = vmatmul.mubr.bf16.gmra.mrb[24].mxu1 %v4384_v58  ;;  %1058 = vmatmul.mubr.bf16.gmra.mrb[24].mxu0 %v4384_v58 }
  0x8f   :  { %841 = vmatprep.mubr.bf16.mxu1 %v4267_v1  ;;  %1067 = vmatprep.mubr.bf16.mxu0 %v4267_v1 }
  0x90   :  { %2848 = vmatpush1.bf16.msra.mxu0 %v3979_v48 }
  0x91   :  { %2849 = vmatprep.subr.bf16.mxu0 %v3984_v49 }
  0x94   :  { %2850 = vmatpush1.bf16.msra.mxu0 %v3982_v51 }
  0x95   :  { %2851 = vmatprep.subr.bf16.mxu0 %v3987_v54 }
  0x96   :  { %842 = vmatmul.mubr.bf16.gmra.mrb[28].mxu1 %v4390_v62  ;;  %1068 = vmatmul.mubr.bf16.gmra.mrb[28].mxu0 %v4390_v62 }
  0x97   :  { %884 = vmatprep.mubr.bf16.mxu1 %v4267_v1 }
  0x98   :  { %2852 = vmatpush1.bf16.msra.mxu0 %v3985_v57 }
  0x99   :  { %2853 = vmatprep.subr.bf16.mxu0 %v3990_v61 }
  0x9c   :  { %2854 = vmatpush1.bf16.msra.mxu0 %v3988_v0 }
  0x9e   :  { %885 = vmatmul.mubr.bf16.vlgmr.msra.gmra.mrb[32].mxu1 %v4352_v60 }
  0x9f   :  { %894 = vmatprep.mubr.bf16.mxu1 %v4267_v1  ;;  %1079 = vmatpush1.bf16.msra.mxu1 %v3569_v2  ;;  %v3921_v2 = vld [vmem:[#allocation9 + $0x34] ss:$8 sps:$4 sm:$0xff]  }
  0xa0   :  { %1080 = vmatprep.subr.bf16.mxu1 %v3578_v3  ;;  %v3919_v3 = vld [vmem:[#allocation9 + $0x30] ss:$8 sps:$4 sm:$0xff]  }
  0xa3   :  { %1081 = vmatpush1.bf16.msra.mxu1 %v3577_v6  ;;  %v3996_v6 = vld [vmem:[#allocation9 + $0x1c4] ss:$8 sps:$4 sm:$0xff]  }
  0xa4   :  { %1082 = vmatprep.subr.bf16.mxu1 %v3586_v7  ;;  %v3922_v7 = vld [vmem:[#allocation9 + $0x40] ss:$8 sps:$4 sm:$0xff]  }
  0xa6   :  { %895 = vmatmul.mubr.bf16.gmra.mrb[36].mxu1 %v4356_v18 }
  0xa7   :  { %904 = vmatprep.mubr.bf16.mxu1 %v4267_v1  ;;  %1083 = vmatpush1.bf16.msra.mxu1 %v3585_v10  ;;  %v3925_v10 = vld [vmem:[#allocation9 + $0x50] ss:$8 sps:$4 sm:$0xff]  }
  0xa8   :  { %1084 = vmatprep.subr.bf16.mxu1 %v3594_v11  ;;  %v3997_v11 = vld [vmem:[#allocation9 + $0x1d0] ss:$8 sps:$4 sm:$0xff]  }
  0xab   :  { %1085 = vmatpush1.bf16.msra.mxu1 %v3593_v14  ;;  %v3928_v14 = vld [vmem:[#allocation9 + $0x60] ss:$8 sps:$4 sm:$0xff]  }
  0xac   :  { %1086 = vmatprep.subr.bf16.mxu1 %v3602_v15  ;;  %v4000_v15 = vld [vmem:[#allocation9 + $0x1e0] ss:$8 sps:$4 sm:$0xff]  }
  0xae   :  { %905 = vmatmul.mubr.bf16.gmra.mrb[40].mxu1 %v4360_v32 }
  0xaf   :  { %914 = vmatprep.mubr.bf16.mxu1 %v4267_v1  ;;  %1087 = vmatpush1.bf16.msra.mxu1 %v3601_v19  ;;  %v4003_v19 = vld [vmem:[#allocation9 + $0x1f0] ss:$8 sps:$4 sm:$0xff]  }
  0xb0   :  { %1088 = vmatprep.subr.bf16.mxu1 %v3610_v20  ;;  %v3936_v20 = vld [vmem:[#allocation9 + $0x84] ss:$8 sps:$4 sm:$0xff]  }
  0xb3   :  { %1089 = vmatpush1.bf16.msra.mxu1 %v3609_v23  ;;  %v3939_v23 = vld [vmem:[#allocation9 + $0x94] ss:$8 sps:$4 sm:$0xff]  }
  0xb4   :  { %1090 = vmatprep.subr.bf16.mxu1 %v3618_v24  ;;  %v3942_v24 = vld [vmem:[#allocation9 + $0xa4] ss:$8 sps:$4 sm:$0xff]  }
  0xb6   :  { %915 = vmatmul.mubr.bf16.gmra.mrb[44].mxu1 %v4366_v43 }
  0xb7   :  { %924 = vmatprep.mubr.bf16.mxu1 %v4267_v1  ;;  %1091 = vmatpush1.bf16.msra.mxu1 %v3617_v27  ;;  %v3943_v27 = vld [vmem:[#allocation9 + $0xb0] ss:$8 sps:$4 sm:$0xff]  }
  0xb8   :  { %1092 = vmatprep.subr.bf16.mxu1 %v3626_v28  ;;  %v3948_v28 = vld [vmem:[#allocation9 + $0xc4] ss:$8 sps:$4 sm:$0xff]  }
  0xbb   :  { %1093 = vmatpush1.bf16.msra.mxu1 %v3625_v29  ;;  %v3951_v29 = vld [vmem:[#allocation9 + $0xd4] ss:$8 sps:$4 sm:$0xff]  }
  0xbc   :  { %2720 = vmatprep.subr.bf16.mxu1 %v3912_v30  ;;  %v3949_v30 = vld [vmem:[#allocation9 + $0xd0] ss:$8 sps:$4 sm:$0xff]  }
  0xbe   :  { %925 = vmatmul.mubr.bf16.gmra.mrb[48].mxu1 %v4372_v52 }
  0xbf   :  { %934 = vmatprep.mubr.bf16.mxu1 %v4267_v1 }
  0xc6   :  { %935 = vmatmul.mubr.bf16.gmra.mrb[52].mxu1 %v4378_v55 }
  0xc7   :  { %944 = vmatprep.mubr.bf16.mxu1 %v4267_v1 }
  0xce   :  { %945 = vmatmul.mubr.bf16.gmra.mrb[56].mxu1 %v4384_v58 }
  0xcf   :  { %954 = vmatprep.mubr.bf16.mxu1 %v4267_v1 }
  0xd6   :  { %955 = vmatmul.mubr.bf16.gmra.mrb[60].mxu1 %v4390_v62 }
  0xd7   :  { %1110 = vmatprep.mubr.bf16.mxu1 %v4267_v1 }
  0xde   :  { %1111 = vmatmul.mubr.bf16.vlgmr.msra.gmra.mrb[64].mxu1 %v4352_v60  ;;  %v3993_v60 = vld [vmem:[#allocation9 + $0x1b4] ss:$8 sps:$4 sm:$0xff]  }
  0xdf   :  { %2721 = vmatpush1.bf16.msra.mxu1 %v3910_v50  ;;  %1120 = vmatprep.mubr.bf16.mxu1 %v4267_v1 }
  0xe0   :  { %2722 = vmatprep.subr.bf16.mxu1 %v3915_v53  ;;  %2855 = vmatprep.subr.bf16.mxu0 %v3993_v60  ;;  %v1598_v60 = vsub.s32 4, %v4431_v36 }
  0xe1   :  { %2856 = vmatpush1.bf16.msra.mxu0 %v3991_v4  ;;  %v1602_v4 = vsub.s32 5, %v4431_v36 }
  0xe2   :  { %2857 = vmatprep.subr.bf16.mxu0 %v3996_v6 }
  0xe3   :  { %2723 = vmatpush1.bf16.msra.mxu1 %v3913_v56 }
  0xe4   :  { %2724 = vmatprep.subr.bf16.mxu1 %v3918_v59 }
  0xe5   :  { %2858 = vmatpush1.bf16.msra.mxu0 %v3994_v8 }
  0xe6   :  { %1121 = vmatmul.mubr.bf16.gmra.mrb[68].mxu1 %v4356_v18  ;;  %v3999_v18 = vld [vmem:[#allocation9 + $0x1d4] ss:$8 sps:$4 sm:$0xff]  }
  0xe7   :  { %2725 = vmatpush1.bf16.msra.mxu1 %v3916_v63  ;;  %1130 = vmatprep.mubr.bf16.mxu1 %v4267_v1 }
  0xe8   :  { %2726 = vmatprep.subr.bf16.mxu1 %v3921_v2  ;;  %2859 = vmatprep.subr.bf16.mxu0 %v3999_v18 }
  0xe9   :  { %2860 = vmatpush1.bf16.msra.mxu0 %v3997_v11 }
  0xea   :  { %2861 = vmatprep.subr.bf16.mxu0 %v4002_v13 }
  0xeb   :  { %2727 = vmatpush1.bf16.msra.mxu1 %v3919_v3 }
  0xec   :  { %2728 = vmatprep.subr.bf16.mxu1 %v3924_v5 }
  0xed   :  { %2862 = vmatpush1.bf16.msra.mxu0 %v4000_v15 }
  0xee   :  { %1131 = vmatmul.mubr.bf16.gmra.mrb[72].mxu1 %v4360_v32  ;;  %v4005_v32 = vld [vmem:[#allocation9 + $0x1f4] ss:$8 sps:$4 sm:$0xff]  }
  0xef   :  { %2729 = vmatpush1.bf16.msra.mxu1 %v3922_v7  ;;  %1140 = vmatprep.mubr.bf16.mxu1 %v4267_v1 }
  0xf0   :  { %2730 = vmatprep.subr.bf16.mxu1 %v3927_v9  ;;  %2863 = vmatprep.subr.bf16.mxu0 %v4005_v32 }
  0xf1   :  { %2864 = vmatpush1.bf16.msra.mxu0 %v4003_v19 }
  0xf2   :  { %2946 = vmatprep.subr.bf16.mxu0 %v4008_v21 }
  0xf3   :  { %2731 = vmatpush1.bf16.msra.mxu1 %v3925_v10 }
  0xf4   :  { %2732 = vmatprep.subr.bf16.mxu1 %v3930_v12 }
  0xf6   :  { %1141 = vmatmul.mubr.bf16.gmra.mrb[76].mxu1 %v4366_v43  ;;  %v3937_v43 = vld [vmem:[#allocation9 + $0x90] ss:$8 sps:$4 sm:$0xff]  }
  0xf7   :  { %2733 = vmatpush1.bf16.msra.mxu1 %v3928_v14  ;;  %1150 = vmatprep.mubr.bf16.mxu1 %v4267_v1 }
  0xf8   :  { %2734 = vmatprep.subr.bf16.mxu1 %v3933_v16 }
  0xfb   :  { %2735 = vmatpush1.bf16.msra.mxu1 %v3931_v17 }
  0xfc   :  { %2736 = vmatprep.subr.bf16.mxu1 %v3936_v20 }
  0xfe   :  { %1151 = vmatmul.mubr.bf16.gmra.mrb[80].mxu1 %v4372_v52  ;;  %v3946_v52 = vld [vmem:[#allocation9 + $0xc0] ss:$8 sps:$4 sm:$0xff]  }
  0xff   :  { %2737 = vmatpush1.bf16.msra.mxu1 %v3934_v22  ;;  %1160 = vmatprep.mubr.bf16.mxu1 %v4267_v1 }
 0x100   :  { %2738 = vmatprep.subr.bf16.mxu1 %v3939_v23 }
 0x103   :  { %2739 = vmatpush1.bf16.msra.mxu1 %v3937_v43 }
 0x104   :  { %2740 = vmatprep.subr.bf16.mxu1 %v3942_v24 }
 0x106   :  { %1161 = vmatmul.mubr.bf16.gmra.mrb[84].mxu1 %v4378_v55  ;;  %v3952_v55 = vld [vmem:[#allocation9 + $0xe0] ss:$8 sps:$4 sm:$0xff]  }
 0x107   :  { %2741 = vmatpush1.bf16.msra.mxu1 %v3940_v25  ;;  %1170 = vmatprep.mubr.bf16.mxu1 %v4267_v1 }
 0x108   :  { %2742 = vmatprep.subr.bf16.mxu1 %v3945_v26 }
 0x10b   :  { %2743 = vmatpush1.bf16.msra.mxu1 %v3943_v27 }
 0x10c   :  { %2744 = vmatprep.subr.bf16.mxu1 %v3948_v28 }
 0x10e   :  { %1171 = vmatmul.mubr.bf16.gmra.mrb[88].mxu1 %v4384_v58  ;;  %v4434_v58 = vsub.s32 0, %v4431_v36 }
 0x10f   :  { %2745 = vmatpush1.bf16.msra.mxu1 %v3946_v52  ;;  %1180 = vmatprep.mubr.bf16.mxu1 %v4267_v1  ;;  %v4439_v1 = vld [vmem:[%s4919_s2] sm:$0xff] }
 0x110   :  { %2746 = vmatprep.subr.bf16.mxu1 %v3951_v29  ;;  %v4450_v38 = vrot.slane %v4439_v1, %v4442_v37  ;;  %v4463_v18 = vrot.slane %v4439_v1, %v1598_v60  ;;  %v4466_v12 = vrot.slane %v4439_v1, %v1602_v4 }
 0x113   :  { %2747 = vmatpush1.bf16.msra.mxu1 %v3949_v30 }
 0x114   :  { %2748 = vmatprep.subr.bf16.mxu1 %v3954_v31 }
 0x116   :  { %1181 = vmatmul.mubr.bf16.gmra.mrb[92].mxu1 %v4390_v62  ;;  %v4446_v62 = vrot.slane %v4439_v1, %v4434_v58 }
 0x117   :  { %2749 = vmatpush1.bf16.msra.mxu1 %v3952_v55 }
 0x118   :  { %2750 = vmatprep.subr.bf16.mxu1 %v3957_v33 }
 0x11b   :  { %2751 = vmatpush1.bf16.msra.mxu1 %v3955_v34 }
 0x131   :  { %v773_v39 = vpop.f32.mrb[0].mxu1  ;;  %v999_v32 = vpop.f32.mrb[0].mxu0 }
 0x132   :  { %v1620_v40 = vadd.f32 %v4446_v62, %v773_v39  ;;  %v775_v41 = vpop.f32.mrb[1].mxu1  ;;  %v1624_v20 = vadd.f32 %v4463_v18, %v999_v32  ;;  %v1001_v21 = vpop.f32.mrb[1].mxu0 }
 0x133   :  { %v1621_v42 = vadd.f32 %v4450_v38, %v775_v41  ;;  %v777_v44 = vpop.f32.mrb[2].mxu1  ;;  %v1625_v23 = vadd.f32 %v4466_v12, %v1001_v21  ;;  %v1003_v43 = vpop.f32.mrb[2].mxu0 }
 0x134   :  { %v1628_v45 = vadd.f32 %v4446_v62, %v777_v44  ;;  %v779_v46 = vpop.f32.mrb[3].mxu1  ;;  %v1748_v48 = vmax.f32 %v1620_v40, 0.0  ;;  %v1752_v26 = vmax.f32 %v1624_v20, 0.0  ;;  %v1632_v27 = vadd.f32 %v4463_v18, %v1003_v43  ;;  %v1005_v28 = vpop.f32.mrb[3].mxu0 }
 0x135   :  { %v1629_v47 = vadd.f32 %v4450_v38, %v779_v46  ;;  %v1749_v50 = vmax.f32 %v1621_v42, 0.0  ;;  %v1753_v30 = vmax.f32 %v1625_v23, 0.0  ;;  %v1633_v31 = vadd.f32 %v4466_v12, %v1005_v28 }
 0x136   :  { %v1756_v49 = vmax.f32 %v1628_v45, 0.0  ;;  %v1760_v33 = vmax.f32 %v1632_v27, 0.0 }
 0x137   :  { %v1757_v51 = vmax.f32 %v1629_v47, 0.0  ;;  %v1761_v40 = vmax.f32 %v1633_v31, 0.0 }
 0x138   :  { %v1876_v53 = vpack.c.bf16 %v1756_v49, %v1748_v48  ;;  %v4477_v44 = vpack.c.bf16 %v1760_v33, %v1752_v26 }
 0x139   :  { %v1877_v54 = vpack.c.bf16 %v1757_v51, %v1749_v50  ;;  %v783_v56 = vpop.f32.mrb[4].mxu1  ;;  %v4480_v47 = vpack.c.bf16 %v1761_v40, %v1753_v30  ;;  %v1009_v48 = vpop.f32.mrb[4].mxu0 }
 0x13a   :  { %v1636_v57 = vadd.f32 %v4446_v62, %v783_v56  ;;  %v785_v59 = vpop.f32.mrb[5].mxu1  ;;  %v1640_v51 = vadd.f32 %v4463_v18, %v1009_v48 }
 0x13b   :  { %v1637_v61 = vadd.f32 %v4450_v38, %v785_v59  ;;  %v787_v63 = vpop.f32.mrb[6].mxu1  ;;  %2752 = vmatprep.mubr.bf16.mxu1 %v1877_v54 }
 0x13c   :  { %v1644_v0 = vadd.f32 %v4446_v62, %v787_v63  ;;  %v789_v2 = vpop.f32.mrb[7].mxu1  ;;  %2753 = vmatmul.mubr.bf16.vlgmr.msra.gmra.mrb[96].mxu1 %v1876_v53  ;;  %v1764_v5 = vmax.f32 %v1636_v57, 0.0  ;;  %v1011_v53 = vpop.f32.mrb[5].mxu0  ;;  %v1768_v63 = vmax.f32 %v1640_v51, 0.0 }
 0x13d   :  { %v1645_v3 = vadd.f32 %v4450_v38, %v789_v2  ;;  %v1765_v7 = vmax.f32 %v1637_v61, 0.0  ;;  %v1641_v56 = vadd.f32 %v4466_v12, %v1011_v53  ;;  %v1013_v57 = vpop.f32.mrb[6].mxu0 }
 0x13e   :  { %v1772_v6 = vmax.f32 %v1644_v0, 0.0  ;;  %v1648_v0 = vadd.f32 %v4463_v18, %v1013_v57  ;;  %v1015_v2 = vpop.f32.mrb[7].mxu0 }
 0x13f   :  { %v1773_v8 = vmax.f32 %v1645_v3, 0.0  ;;  %v1769_v4 = vmax.f32 %v1641_v56, 0.0 }
 0x140   :  { %v1884_v9 = vpack.c.bf16 %v1772_v6, %v1764_v5  ;;  %v1649_v5 = vadd.f32 %v4466_v12, %v1015_v2 }
 0x141   :  { %v1885_v10 = vpack.c.bf16 %v1773_v8, %v1765_v7  ;;  %v793_v11 = vpop.f32.mrb[8].mxu1  ;;  %v1776_v7 = vmax.f32 %v1648_v0, 0.0 }
 0x142   :  { %v1652_v13 = vadd.f32 %v4446_v62, %v793_v11  ;;  %v795_v14 = vpop.f32.mrb[9].mxu1 }
 0x143   :  { %v1653_v15 = vadd.f32 %v4450_v38, %v795_v14  ;;  %v797_v16 = vpop.f32.mrb[10].mxu1  ;;  %2762 = vmatprep.mubr.bf16.mxu1 %v1885_v10  ;;  %v1777_v10 = vmax.f32 %v1649_v5, 0.0  ;;  %v4489_v14 = vpack.c.bf16 %v1776_v7, %v1768_v63 }
 0x144   :  { %v1660_v17 = vadd.f32 %v4446_v62, %v797_v16  ;;  %v799_v19 = vpop.f32.mrb[11].mxu1  ;;  %2763 = vmatmul.mubr.bf16.gmra.mrb[100].mxu1 %v1884_v9  ;;  %v1780_v24 = vmax.f32 %v1652_v13, 0.0 }
 0x145   :  { %v1661_v22 = vadd.f32 %v4450_v38, %v799_v19  ;;  %v1781_v52 = vmax.f32 %v1653_v15, 0.0  ;;  %v4492_v32 = vpack.c.bf16 %v1777_v10, %v1769_v4 }
 0x146   :  { %v1788_v25 = vmax.f32 %v1660_v17, 0.0  ;;  %v1019_v17 = vpop.f32.mrb[8].mxu0 }
 0x147   :  { %v1789_v29 = vmax.f32 %v1661_v22, 0.0  ;;  %v1656_v21 = vadd.f32 %v4463_v18, %v1019_v17  ;;  %v1021_v22 = vpop.f32.mrb[9].mxu0 }
 0x148   :  { %v1892_v55 = vpack.c.bf16 %v1788_v25, %v1780_v24  ;;  %v1657_v43 = vadd.f32 %v4466_v12, %v1021_v22  ;;  %v1023_v24 = vpop.f32.mrb[10].mxu0 }
 0x149   :  { %v1893_v34 = vpack.c.bf16 %v1789_v29, %v1781_v52  ;;  %v803_v39 = vpop.f32.mrb[12].mxu1  ;;  %v1784_v27 = vmax.f32 %v1656_v21, 0.0  ;;  %v1664_v28 = vadd.f32 %v4463_v18, %v1023_v24  ;;  %v1025_v52 = vpop.f32.mrb[11].mxu0 }
 0x14a   :  { %v1668_v41 = vadd.f32 %v4446_v62, %v803_v39  ;;  %v805_v42 = vpop.f32.mrb[13].mxu1  ;;  %v1785_v31 = vmax.f32 %v1657_v43, 0.0  ;;  %v1029_v51 = vpop.f32.mrb[12].mxu0 }
 0x14b   :  { %v1669_v45 = vadd.f32 %v4450_v38, %v805_v42  ;;  %v807_v46 = vpop.f32.mrb[14].mxu1  ;;  %2772 = vmatprep.mubr.bf16.mxu1 %v1893_v34  ;;  %v1792_v34 = vmax.f32 %v1664_v28, 0.0  ;;  %v1672_v56 = vadd.f32 %v4463_v18, %v1029_v51  ;;  %v1031_v57 = vpop.f32.mrb[13].mxu0  ;;  %v1590_v51 = vsub.s32 2, %v4431_v36 }
 0x14c   :  { %v1676_v49 = vadd.f32 %v4446_v62, %v807_v46  ;;  %v809_v50 = vpop.f32.mrb[15].mxu1  ;;  %2773 = vmatmul.mubr.bf16.gmra.mrb[104].mxu1 %v1892_v55  ;;  %v1796_v59 = vmax.f32 %v1668_v41, 0.0  ;;  %v1665_v55 = vadd.f32 %v4466_v12, %v1025_v52  ;;  %v1033_v63 = vpop.f32.mrb[14].mxu0 }
 0x14d   :  { %v1677_v54 = vadd.f32 %v4450_v38, %v809_v50  ;;  %v1797_v60 = vmax.f32 %v1669_v45, 0.0  ;;  %v4501_v46 = vpack.c.bf16 %v1792_v34, %v1784_v27  ;;  %v1035_v4 = vpop.f32.mrb[15].mxu0 }
 0x14e   :  { %v1804_v61 = vmax.f32 %v1676_v49, 0.0  ;;  %v1793_v41 = vmax.f32 %v1665_v55, 0.0 }
 0x14f   :  { %v1805_v3 = vmax.f32 %v1677_v54, 0.0 }
 0x150   :  { %v1900_v6 = vpack.c.bf16 %v1804_v61, %v1796_v59  ;;  %v4504_v50 = vpack.c.bf16 %v1793_v41, %v1785_v31  ;;  %v1673_v61 = vadd.f32 %v4466_v12, %v1031_v57 }
 0x151   :  { %v1901_v8 = vpack.c.bf16 %v1805_v3, %v1797_v60  ;;  %v813_v9 = vpop.f32.mrb[16].mxu1  ;;  %v1800_v60 = vmax.f32 %v1672_v56, 0.0  ;;  %v1680_v3 = vadd.f32 %v4463_v18, %v1033_v63 }
 0x152   :  { %v1684_v11 = vadd.f32 %v4446_v62, %v813_v9  ;;  %v815_v13 = vpop.f32.mrb[17].mxu1  ;;  %v1801_v7 = vmax.f32 %v1673_v61, 0.0 }
 0x153   :  { %v1685_v15 = vadd.f32 %v4450_v38, %v815_v13  ;;  %v817_v16 = vpop.f32.mrb[18].mxu1  ;;  %2782 = vmatprep.mubr.bf16.mxu1 %v1901_v8  ;;  %v1681_v8 = vadd.f32 %v4466_v12, %v1035_v4  ;;  %v1808_v10 = vmax.f32 %v1680_v3, 0.0 }
 0x154   :  { %v1692_v19 = vadd.f32 %v4446_v62, %v817_v16  ;;  %v819_v20 = vpop.f32.mrb[19].mxu1  ;;  %2783 = vmatmul.mubr.bf16.gmra.mrb[108].mxu1 %v1900_v6  ;;  %v1812_v25 = vmax.f32 %v1684_v11, 0.0 }
 0x155   :  { %v1693_v23 = vadd.f32 %v4450_v38, %v819_v20  ;;  %v1813_v29 = vmax.f32 %v1685_v15, 0.0  ;;  %v1809_v15 = vmax.f32 %v1681_v8, 0.0 }
 0x156   :  { %v1820_v26 = vmax.f32 %v1692_v19, 0.0  ;;  %v4513_v19 = vpack.c.bf16 %v1808_v10, %v1800_v60 }
 0x157   :  { %v1821_v30 = vmax.f32 %v1693_v23, 0.0  ;;  %v4516_v22 = vpack.c.bf16 %v1809_v15, %v1801_v7  ;;  %v1039_v23 = vpop.f32.mrb[16].mxu0  ;;  %v4536_v7 = vrot.slane %v4439_v1, %v1590_v51 }
 0x158   :  { %v1908_v33 = vpack.c.bf16 %v1820_v26, %v1812_v25  ;;  %v1688_v25 = vadd.f32 %v4463_v18, %v1039_v23  ;;  %v1041_v26 = vpop.f32.mrb[17].mxu0 }
 0x159   :  { %v1909_v39 = vpack.c.bf16 %v1821_v30, %v1813_v29  ;;  %v823_v40 = vpop.f32.mrb[20].mxu1  ;;  %v1689_v28 = vadd.f32 %v4466_v12, %v1041_v26  ;;  %v1043_v52 = vpop.f32.mrb[18].mxu0 }
 0x15a   :  { %v1700_v42 = vadd.f32 %v4446_v62, %v823_v40  ;;  %v825_v45 = vpop.f32.mrb[21].mxu1  ;;  %v1816_v31 = vmax.f32 %v1688_v25, 0.0  ;;  %v1696_v55 = vadd.f32 %v4463_v18, %v1043_v52 }
 0x15b   :  { %v1701_v48 = vadd.f32 %v4450_v38, %v825_v45  ;;  %v827_v49 = vpop.f32.mrb[22].mxu1  ;;  %2792 = vmatprep.mubr.bf16.mxu1 %v1909_v39  ;;  %v1817_v40 = vmax.f32 %v1689_v28, 0.0 }
 0x15c   :  { %v1708_v53 = vadd.f32 %v4446_v62, %v827_v49  ;;  %v829_v54 = vpop.f32.mrb[23].mxu1  ;;  %2793 = vmatmul.mubr.bf16.gmra.mrb[112].mxu1 %v1908_v33  ;;  %v1828_v0 = vmax.f32 %v1700_v42, 0.0  ;;  %v1045_v33 = vpop.f32.mrb[19].mxu0  ;;  %v1824_v45 = vmax.f32 %v1696_v55, 0.0 }
 0x15d   :  { %v1709_v59 = vadd.f32 %v4450_v38, %v829_v54  ;;  %v1829_v5 = vmax.f32 %v1701_v48, 0.0  ;;  %v1697_v41 = vadd.f32 %v4466_v12, %v1045_v33 }
 0x15e   :  { %v1836_v2 = vmax.f32 %v1708_v53, 0.0  ;;  %v1594_v53 = vsub.s32 3, %v4431_v36 }
 0x15f   :  { %v1837_v6 = vmax.f32 %v1709_v59, 0.0  ;;  %v1825_v54 = vmax.f32 %v1697_v41, 0.0  ;;  %v4527_v59 = vpack.c.bf16 %v1824_v45, %v1816_v31 }
 0x160   :  { %v1916_v9 = vpack.c.bf16 %v1836_v2, %v1828_v0  ;;  %v1049_v2 = vpop.f32.mrb[20].mxu0  ;;  %v4539_v8 = vrot.slane %v4439_v1, %v1594_v53 }
 0x161   :  { %v1917_v11 = vpack.c.bf16 %v1837_v6, %v1829_v5  ;;  %v833_v13 = vpop.f32.mrb[24].mxu1  ;;  %v4530_v0 = vpack.c.bf16 %v1825_v54, %v1817_v40  ;;  %v1704_v4 = vadd.f32 %v4463_v18, %v1049_v2  ;;  %v1051_v5 = vpop.f32.mrb[21].mxu0 }
 0x162   :  { %v1716_v16 = vadd.f32 %v4446_v62, %v833_v13  ;;  %v835_v17 = vpop.f32.mrb[25].mxu1  ;;  %v1053_v10 = vpop.f32.mrb[22].mxu0 }
 0x163   :  { %v1717_v20 = vadd.f32 %v4450_v38, %v835_v17  ;;  %v837_v21 = vpop.f32.mrb[26].mxu1  ;;  %2802 = vmatprep.mubr.bf16.mxu1 %v1917_v11  ;;  %v1832_v15 = vmax.f32 %v1704_v4, 0.0 }
 0x164   :  { %v1724_v43 = vadd.f32 %v4446_v62, %v837_v21  ;;  %v839_v24 = vpop.f32.mrb[27].mxu1  ;;  %2803 = vmatmul.mubr.bf16.gmra.mrb[116].mxu1 %v1916_v9  ;;  %v1844_v29 = vmax.f32 %v1716_v16, 0.0  ;;  %v1705_v9 = vadd.f32 %v4466_v12, %v1051_v5  ;;  %v1055_v16 = vpop.f32.mrb[23].mxu0  ;;  %v4006_v5 = vld [vmem:[#allocation9 + $0x200] ss:$8 sps:$4 sm:$0xff]  }
 0x165   :  { %v1725_v27 = vadd.f32 %v4450_v38, %v839_v24  ;;  %v1845_v34 = vmax.f32 %v1717_v20, 0.0  ;;  %v1059_v55 = vpop.f32.mrb[24].mxu0 }
 0x166   :  { %v1852_v30 = vmax.f32 %v1724_v43, 0.0  ;;  %v1833_v21 = vmax.f32 %v1705_v9, 0.0  ;;  %v1061_v40 = vpop.f32.mrb[25].mxu0 }
 0x167   :  { %v1853_v39 = vmax.f32 %v1725_v27, 0.0  ;;  %v1063_v45 = vpop.f32.mrb[26].mxu0 }
 0x168   :  { %v1924_v42 = vpack.c.bf16 %v1852_v30, %v1844_v29  ;;  %v1728_v53 = vadd.f32 %v4463_v18, %v1063_v45  ;;  %v1065_v54 = vpop.f32.mrb[27].mxu0 }
 0x169   :  { %v1925_v48 = vpack.c.bf16 %v1853_v39, %v1845_v34  ;;  %v843_v49 = vpop.f32.mrb[28].mxu1  ;;  %v1720_v39 = vadd.f32 %v4463_v18, %v1059_v55 }
 0x16a   :  { %v1732_v56 = vadd.f32 %v4446_v62, %v843_v49  ;;  %v845_v57 = vpop.f32.mrb[29].mxu1 }
 0x16b   :  { %v1733_v61 = vadd.f32 %v4450_v38, %v845_v57  ;;  %v847_v63 = vpop.f32.mrb[30].mxu1  ;;  %2812 = vmatprep.mubr.bf16.mxu1 %v1925_v48  ;;  %v1848_v51 = vmax.f32 %v1720_v39, 0.0 }
 0x16c   :  { %v1740_v60 = vadd.f32 %v4446_v62, %v847_v63  ;;  %v849_v3 = vpop.f32.mrb[31].mxu1  ;;  %2813 = vmatmul.mubr.bf16.gmra.mrb[120].mxu1 %v1924_v42  ;;  %v1860_v11 = vmax.f32 %v1732_v56, 0.0  ;;  %v1712_v62 = vadd.f32 %v4463_v18, %v1053_v10  ;;  %v1721_v42 = vadd.f32 %v4466_v12, %v1061_v40 }
 0x16d   :  { %v1741_v6 = vadd.f32 %v4450_v38, %v849_v3  ;;  %v1861_v17 = vmax.f32 %v1733_v61, 0.0  ;;  %v1713_v38 = vadd.f32 %v4466_v12, %v1055_v16  ;;  %v1729_v63 = vadd.f32 %v4466_v12, %v1065_v54 }
 0x16e   :  { %v1868_v13 = vmax.f32 %v1740_v60, 0.0  ;;  %v1840_v43 = vmax.f32 %v1712_v62, 0.0  ;;  %v1849_v61 = vmax.f32 %v1721_v42, 0.0  ;;  %v1856_v60 = vmax.f32 %v1728_v53, 0.0 }
 0x16f   :  { %v1869_v20 = vmax.f32 %v1741_v6, 0.0  ;;  %v1841_v26 = vmax.f32 %v1713_v38, 0.0  ;;  %v1857_v6 = vmax.f32 %v1729_v63, 0.0 }
 0x170   :  { %v1932_v23 = vpack.c.bf16 %v1868_v13, %v1860_v11  ;;  %v4545_v52 = vpack.c.bf16 %v1840_v43, %v1832_v15  ;;  %v4011_v11 = vld [vmem:[#allocation9 + $0x214] ss:$8 sps:$4 sm:$0xff]   ;;  %v4557_v13 = vpack.c.bf16 %v1856_v60, %v1848_v51  ;;  %v4012_v51 = vld [vmem:[#allocation9 + $0x220] ss:$8 sps:$4 sm:$0xff]  }
 0x171   :  { %v1933_v24 = vpack.c.bf16 %v1869_v20, %v1861_v17  ;;  %v886_v25 = vpop.f32.mrb[32].mxu1  ;;  %v4548_v31 = vpack.c.bf16 %v1841_v26, %v1833_v21  ;;  %v4560_v16 = vpack.c.bf16 %v1857_v6, %v1849_v61  ;;  %v1069_v17 = vpop.f32.mrb[28].mxu0 }
 0x172   :  { %v1622_v27 = vadd.f32 %v4536_v7, %v886_v25  ;;  %v888_v28 = vpop.f32.mrb[33].mxu1  ;;  %v1736_v38 = vadd.f32 %v4463_v18, %v1069_v17 }
 0x173   :  { %v1623_v29 = vadd.f32 %v4539_v8, %v888_v28  ;;  %v890_v30 = vpop.f32.mrb[34].mxu1  ;;  %2822 = vmatprep.mubr.bf16.mxu1 %v1933_v24  ;;  %v4009_v24 = vld [vmem:[#allocation9 + $0x210] ss:$8 sps:$4 sm:$0xff]  }
 0x174   :  { %v1630_v33 = vadd.f32 %v4536_v7, %v890_v30  ;;  %v892_v34 = vpop.f32.mrb[35].mxu1  ;;  %2823 = vmatmul.mubr.bf16.gmra.mrb[124].mxu1 %v1932_v23  ;;  %v1750_v48 = vmax.f32 %v1622_v27, 0.0  ;;  %v1071_v23 = vpop.f32.mrb[29].mxu0  ;;  %v1864_v30 = vmax.f32 %v1736_v38, 0.0 }
 0x175   :  { %v1631_v41 = vadd.f32 %v4539_v8, %v892_v34  ;;  %v1751_v56 = vmax.f32 %v1623_v29, 0.0  ;;  %v1737_v25 = vadd.f32 %v4466_v12, %v1071_v23  ;;  %v1073_v26 = vpop.f32.mrb[30].mxu0  ;;  %v4014_v29 = vld [vmem:[#allocation9 + $0x224] ss:$8 sps:$4 sm:$0xff]   ;;  %v4023_v23 = vld [vmem:[#allocation9 + $0x254] ss:$8 sps:$4 sm:$0xff]  }
 0x176   :  { %v1758_v49 = vmax.f32 %v1630_v33, 0.0  ;;  %v1744_v55 = vadd.f32 %v4463_v18, %v1073_v26  ;;  %v1075_v33 = vpop.f32.mrb[31].mxu0 }
 0x177   :  { %v1759_v57 = vmax.f32 %v1631_v41, 0.0  ;;  %v1865_v40 = vmax.f32 %v1737_v25, 0.0  ;;  %v1745_v41 = vadd.f32 %v4466_v12, %v1075_v33 }
 0x178   :  { %v1878_v2 = vpack.c.bf16 %v1758_v49, %v1750_v48  ;;  %v1872_v45 = vmax.f32 %v1744_v55, 0.0  ;;  %v4026_v55 = vld [vmem:[#allocation9 + $0x264] ss:$8 sps:$4 sm:$0xff]  }
 0x179   :  { %v1879_v3 = vpack.c.bf16 %v1759_v57, %v1751_v56  ;;  %v896_v4 = vpop.f32.mrb[36].mxu1  ;;  %v1873_v53 = vmax.f32 %v1745_v41, 0.0  ;;  %v4017_v57 = vld [vmem:[#allocation9 + $0x234] ss:$8 sps:$4 sm:$0xff]  }
 0x17a   :  { %v1638_v9 = vadd.f32 %v4536_v7, %v896_v4  ;;  %v898_v10 = vpop.f32.mrb[37].mxu1  ;;  %v4569_v61 = vpack.c.bf16 %v1872_v45, %v1864_v30  ;;  %v4015_v4 = vld [vmem:[#allocation9 + $0x230] ss:$8 sps:$4 sm:$0xff]  }
 0x17b   :  { %v1639_v15 = vadd.f32 %v4539_v8, %v898_v10  ;;  %v900_v62 = vpop.f32.mrb[38].mxu1  ;;  %2865 = vmatprep.mubr.bf16.mxu0 %v1879_v3 }
 0x17c   :  { %v1646_v20 = vadd.f32 %v4536_v7, %v900_v62  ;;  %v902_v21 = vpop.f32.mrb[39].mxu1  ;;  %2866 = vmatmul.mubr.bf16.vlgmr.msra.gmra.mrb[32].mxu0 %v1878_v2  ;;  %v1766_v27 = vmax.f32 %v1638_v9, 0.0  ;;  %v4572_v2 = vpack.c.bf16 %v1873_v53, %v1865_v40  ;;  %v4020_v9 = vld [vmem:[#allocation9 + $0x244] ss:$8 sps:$4 sm:$0xff]  }
 0x17d   :  { %v1647_v43 = vadd.f32 %v4539_v8, %v902_v21  ;;  %2947 = vmatpush1.bf16.msra.mxu0 %v4006_v5  ;;  %v1767_v34 = vmax.f32 %v1639_v15, 0.0 }
 0x17e   :  { %v1774_v28 = vmax.f32 %v1646_v20, 0.0  ;;  %2948 = vmatprep.subr.bf16.mxu0 %v4011_v11  ;;  %v4018_v20 = vld [vmem:[#allocation9 + $0x240] ss:$8 sps:$4 sm:$0xff]  }
 0x17f   :  { %v1775_v39 = vmax.f32 %v1647_v43, 0.0 }
 0x180   :  { %v1886_v42 = vpack.c.bf16 %v1774_v28, %v1766_v27  ;;  %v4021_v28 = vld [vmem:[#allocation9 + $0x250] ss:$8 sps:$4 sm:$0xff]  }
 0x181   :  { %v1887_v48 = vpack.c.bf16 %v1775_v39, %v1767_v34  ;;  %v906_v49 = vpop.f32.mrb[40].mxu1  ;;  %2949 = vmatpush1.bf16.msra.mxu0 %v4009_v24 }
 0x182   :  { %v1654_v54 = vadd.f32 %v4536_v7, %v906_v49  ;;  %v908_v56 = vpop.f32.mrb[41].mxu1  ;;  %2950 = vmatprep.subr.bf16.mxu0 %v4014_v29  ;;  %v4029_v49 = vld [vmem:[#allocation9 + $0x274] ss:$8 sps:$4 sm:$0xff]  }
 0x183   :  { %v1655_v18 = vadd.f32 %v4539_v8, %v908_v56  ;;  %v910_v63 = vpop.f32.mrb[42].mxu1  ;;  %2875 = vmatprep.mubr.bf16.mxu0 %v1887_v48 }
 0x184   :  { %v1662_v12 = vadd.f32 %v4536_v7, %v910_v63  ;;  %v912_v60 = vpop.f32.mrb[43].mxu1  ;;  %2876 = vmatmul.mubr.bf16.gmra.mrb[36].mxu0 %v1886_v42  ;;  %v1782_v5 = vmax.f32 %v1654_v54, 0.0  ;;  %v4024_v42 = vld [vmem:[#allocation9 + $0x260] ss:$8 sps:$4 sm:$0xff]  }
 0x185   :  { %v1663_v3 = vadd.f32 %v4539_v8, %v912_v60  ;;  %2951 = vmatpush1.bf16.msra.mxu0 %v4012_v51  ;;  %v1783_v10 = vmax.f32 %v1655_v18, 0.0  ;;  %v4027_v18 = vld [vmem:[#allocation9 + $0x270] ss:$8 sps:$4 sm:$0xff]   ;;  %v4032_v60 = vld [vmem:[#allocation9 + $0x284] ss:$8 sps:$4 sm:$0xff]  }
 0x186   :  { %v1790_v6 = vmax.f32 %v1662_v12, 0.0  ;;  %2952 = vmatprep.subr.bf16.mxu0 %v4017_v57 }
 0x187   :  { %v1791_v11 = vmax.f32 %v1663_v3, 0.0 }
 0x188   :  { %v1894_v15 = vpack.c.bf16 %v1790_v6, %v1782_v5 }
 0x189   :  { %v1895_v62 = vpack.c.bf16 %v1791_v11, %v1783_v10  ;;  %v916_v17 = vpop.f32.mrb[44].mxu1  ;;  %2953 = vmatpush1.bf16.msra.mxu0 %v4015_v4  ;;  %v4030_v10 = vld [vmem:[#allocation9 + $0x280] ss:$8 sps:$4 sm:$0xff]  }
 0x18a   :  { %v1670_v21 = vadd.f32 %v4536_v7, %v916_v17  ;;  %v918_v38 = vpop.f32.mrb[45].mxu1  ;;  %2954 = vmatprep.subr.bf16.mxu0 %v4020_v9 }
 0x18b   :  { %v1671_v43 = vadd.f32 %v4539_v8, %v918_v38  ;;  %v920_v24 = vpop.f32.mrb[46].mxu1  ;;  %2885 = vmatprep.mubr.bf16.mxu0 %v1895_v62  ;;  %v4035_v62 = vld [vmem:[#allocation9 + $0x294] ss:$8 sps:$4 sm:$0xff]  }
 0x18c   :  { %v1678_v25 = vadd.f32 %v4536_v7, %v920_v24  ;;  %v922_v26 = vpop.f32.mrb[47].mxu1  ;;  %2886 = vmatmul.mubr.bf16.gmra.mrb[40].mxu0 %v1894_v15  ;;  %v1798_v29 = vmax.f32 %v1670_v21, 0.0 }
 0x18d   :  { %v1679_v27 = vadd.f32 %v4539_v8, %v922_v26  ;;  %2955 = vmatpush1.bf16.msra.mxu0 %v4018_v20  ;;  %v1799_v33 = vmax.f32 %v1671_v43, 0.0  ;;  %v4033_v43 = vld [vmem:[#allocation9 + $0x290] ss:$8 sps:$4 sm:$0xff]   ;;  %v4038_v26 = vld [vmem:[#allocation9 + $0x2a4] ss:$8 sps:$4 sm:$0xff]  }
 0x18e   :  { %v1806_v30 = vmax.f32 %v1678_v25, 0.0  ;;  %2956 = vmatprep.subr.bf16.mxu0 %v4023_v23 }
 0x18f   :  { %v1807_v34 = vmax.f32 %v1679_v27, 0.0 }
 0x190   :  { %v1902_v39 = vpack.c.bf16 %v1806_v30, %v1798_v29 }
 0x191   :  { %v1903_v40 = vpack.c.bf16 %v1807_v34, %v1799_v33  ;;  %v926_v41 = vpop.f32.mrb[48].mxu1  ;;  %2957 = vmatpush1.bf16.msra.mxu0 %v4021_v28  ;;  %v4036_v33 = vld [vmem:[#allocation9 + $0x2a0] ss:$8 sps:$4 sm:$0xff]  }
 0x192   :  { %v1686_v45 = vadd.f32 %v4536_v7, %v926_v41  ;;  %v928_v48 = vpop.f32.mrb[49].mxu1  ;;  %2958 = vmatprep.subr.bf16.mxu0 %v4026_v55 }
 0x193   :  { %v1687_v51 = vadd.f32 %v4539_v8, %v928_v48  ;;  %v930_v53 = vpop.f32.mrb[50].mxu1  ;;  %2895 = vmatprep.mubr.bf16.mxu0 %v1903_v40  ;;  %v4041_v40 = vld [vmem:[#allocation9 + $0x2b4] ss:$8 sps:$4 sm:$0xff]  }
 0x194   :  { %v1694_v54 = vadd.f32 %v4536_v7, %v930_v53  ;;  %v932_v56 = vpop.f32.mrb[51].mxu1  ;;  %2896 = vmatmul.mubr.bf16.gmra.mrb[44].mxu0 %v1902_v39  ;;  %v1814_v63 = vmax.f32 %v1686_v45, 0.0 }
 0x195   :  { %v1695_v57 = vadd.f32 %v4539_v8, %v932_v56  ;;  %2959 = vmatpush1.bf16.msra.mxu0 %v4024_v42  ;;  %v1815_v3 = vmax.f32 %v1687_v51, 0.0  ;;  %v4039_v51 = vld [vmem:[#allocation9 + $0x2b0] ss:$8 sps:$4 sm:$0xff]   ;;  %v4044_v56 = vld [vmem:[#allocation9 + $0x2c4] ss:$8 sps:$4 sm:$0xff]  }
 0x196   :  { %v1822_v12 = vmax.f32 %v1694_v54, 0.0  ;;  %2960 = vmatprep.subr.bf16.mxu0 %v4029_v49 }
 0x197   :  { %v1823_v4 = vmax.f32 %v1695_v57, 0.0 }
 0x198   :  { %v1910_v5 = vpack.c.bf16 %v1822_v12, %v1814_v63 }
 0x199   :  { %v1911_v6 = vpack.c.bf16 %v1823_v4, %v1815_v3  ;;  %v936_v9 = vpop.f32.mrb[52].mxu1  ;;  %2961 = vmatpush1.bf16.msra.mxu0 %v4027_v18  ;;  %v4042_v3 = vld [vmem:[#allocation9 + $0x2c0] ss:$8 sps:$4 sm:$0xff]  }
 0x19a   :  { %v1702_v11 = vadd.f32 %v4536_v7, %v936_v9  ;;  %v938_v15 = vpop.f32.mrb[53].mxu1  ;;  %2962 = vmatprep.subr.bf16.mxu0 %v4032_v60  ;;  %v1606_v9 = vsub.s32 6, %v4431_v36 }
 0x19b   :  { %v1703_v17 = vadd.f32 %v4539_v8, %v938_v15  ;;  %v940_v20 = vpop.f32.mrb[54].mxu1  ;;  %2905 = vmatprep.mubr.bf16.mxu0 %v1911_v6  ;;  %v4047_v6 = vld [vmem:[#allocation9 + $0x2d4] ss:$8 sps:$4 sm:$0xff]   ;;  %v1610_v15 = vsub.s32 7, %v4431_v36 }
 0x19c   :  { %v1710_v21 = vadd.f32 %v4536_v7, %v940_v20  ;;  %v942_v38 = vpop.f32.mrb[55].mxu1  ;;  %2906 = vmatmul.mubr.bf16.gmra.mrb[48].mxu0 %v1910_v5  ;;  %v1830_v24 = vmax.f32 %v1702_v11, 0.0 }
 0x19d   :  { %v1711_v23 = vadd.f32 %v4539_v8, %v942_v38  ;;  %2963 = vmatpush1.bf16.msra.mxu0 %v4030_v10  ;;  %v1831_v27 = vmax.f32 %v1703_v17, 0.0 }
 0x19e   :  { %v1838_v25 = vmax.f32 %v1710_v21, 0.0  ;;  %2964 = vmatprep.subr.bf16.mxu0 %v4035_v62  ;;  %v4045_v21 = vld [vmem:[#allocation9 + $0x2d0] ss:$8 sps:$4 sm:$0xff]  }
 0x19f   :  { %v1839_v28 = vmax.f32 %v1711_v23, 0.0 }
 0x1a0   :  { %v1918_v29 = vpack.c.bf16 %v1838_v25, %v1830_v24  ;;  %v4599_v24 = vrot.slane %v4439_v1, %v1606_v9  ;;  %v4057_v9 = vld [vmem:[#allocation9 + $0x310] ss:$8 sps:$4 sm:$0xff]  }
 0x1a1   :  { %v1919_v30 = vpack.c.bf16 %v1839_v28, %v1831_v27  ;;  %v946_v55 = vpop.f32.mrb[56].mxu1  ;;  %2965 = vmatpush1.bf16.msra.mxu0 %v4033_v43  ;;  %v4050_v43 = vld [vmem:[#allocation9 + $0x2e4] ss:$8 sps:$4 sm:$0xff]   ;;  %v4602_v27 = vrot.slane %v4439_v1, %v1610_v15 }
 0x1a2   :  { %v1718_v34 = vadd.f32 %v4536_v7, %v946_v55  ;;  %v948_v39 = vpop.f32.mrb[57].mxu1  ;;  %2966 = vmatprep.subr.bf16.mxu0 %v4038_v26  ;;  %v4062_v15 = vld [vmem:[#allocation9 + $0x324] ss:$8 sps:$4 sm:$0xff]  }
 0x1a3   :  { %v1719_v41 = vadd.f32 %v4539_v8, %v948_v39  ;;  %v950_v42 = vpop.f32.mrb[58].mxu1  ;;  %2915 = vmatprep.mubr.bf16.mxu0 %v1919_v30 }
 0x1a4   :  { %v1726_v45 = vadd.f32 %v4536_v7, %v950_v42  ;;  %v952_v48 = vpop.f32.mrb[59].mxu1  ;;  %2916 = vmatmul.mubr.bf16.gmra.mrb[52].mxu0 %v1918_v29  ;;  %v1846_v53 = vmax.f32 %v1718_v34, 0.0  ;;  %v4048_v29 = vld [vmem:[#allocation9 + $0x2e0] ss:$8 sps:$4 sm:$0xff]   ;;  %v4051_v42 = vld [vmem:[#allocation9 + $0x2f0] ss:$8 sps:$4 sm:$0xff]  }
 0x1a5   :  { %v1727_v49 = vadd.f32 %v4539_v8, %v952_v48  ;;  %2967 = vmatpush1.bf16.msra.mxu0 %v4036_v33  ;;  %v1847_v57 = vmax.f32 %v1719_v41, 0.0 }
 0x1a6   :  { %v1854_v54 = vmax.f32 %v1726_v45, 0.0  ;;  %2968 = vmatprep.subr.bf16.mxu0 %v4041_v40 }
 0x1a7   :  { %v1855_v18 = vmax.f32 %v1727_v49, 0.0  ;;  %v4056_v49 = vld [vmem:[#allocation9 + $0x304] ss:$8 sps:$4 sm:$0xff]  }
 0x1a8   :  { %v1926_v63 = vpack.c.bf16 %v1854_v54, %v1846_v53 }
 0x1a9   :  { %v1927_v12 = vpack.c.bf16 %v1855_v18, %v1847_v57  ;;  %v956_v60 = vpop.f32.mrb[60].mxu1  ;;  %2969 = vmatpush1.bf16.msra.mxu0 %v4039_v51 }
 0x1aa   :  { %v1734_v4 = vadd.f32 %v4536_v7, %v956_v60  ;;  %v958_v5 = vpop.f32.mrb[61].mxu1  ;;  %2970 = vmatprep.subr.bf16.mxu0 %v4044_v56  ;;  %v4054_v56 = vld [vmem:[#allocation9 + $0x300] ss:$8 sps:$4 sm:$0xff]  }
 0x1ab   :  { %v1735_v10 = vadd.f32 %v4539_v8, %v958_v5  ;;  %v960_v11 = vpop.f32.mrb[62].mxu1  ;;  %2925 = vmatprep.mubr.bf16.mxu0 %v1927_v12 }
 0x1ac   :  { %v1742_v62 = vadd.f32 %v4536_v7, %v960_v11  ;;  %v962_v17 = vpop.f32.mrb[63].mxu1  ;;  %2926 = vmatmul.mubr.bf16.gmra.mrb[56].mxu0 %v1926_v63  ;;  %v1862_v38 = vmax.f32 %v1734_v4, 0.0  ;;  %v4059_v63 = vld [vmem:[#allocation9 + $0x314] ss:$8 sps:$4 sm:$0xff]  }
 0x1ad   :  { %v1743_v20 = vadd.f32 %v4539_v8, %v962_v17  ;;  %2971 = vmatpush1.bf16.msra.mxu0 %v4042_v3  ;;  %v1863_v25 = vmax.f32 %v1735_v10, 0.0  ;;  %v4053_v8 = vld [vmem:[#allocation9 + $0x2f4] ss:$8 sps:$4 sm:$0xff]  }
 0x1ae   :  { %v1870_v23 = vmax.f32 %v1742_v62, 0.0  ;;  %2972 = vmatprep.subr.bf16.mxu0 %v4047_v6 }
 0x1af   :  { %v1871_v26 = vmax.f32 %v1743_v20, 0.0 }
 0x1b0   :  { %v1934_v28 = vpack.c.bf16 %v1870_v23, %v1862_v38  ;;  %v4065_v23 = vld [vmem:[#allocation9 + $0x334] ss:$8 sps:$4 sm:$0xff]  }
 0x1b1   :  { %v1935_v7 = vpack.c.bf16 %v1871_v26, %v1863_v25  ;;  %2973 = vmatpush1.bf16.msra.mxu0 %v4045_v21  ;;  %v1112_v30 = vpop.f32.mrb[64].mxu1  ;;  %v4060_v21 = vld [vmem:[#allocation9 + $0x320] ss:$8 sps:$4 sm:$0xff]  }
 0x1b2   :  { %2974 = vmatprep.subr.bf16.mxu0 %v4050_v43  ;;  %v1626_v55 = vadd.f32 %v4599_v24, %v1112_v30  ;;  %v1114_v33 = vpop.f32.mrb[65].mxu1  ;;  %v4063_v30 = vld [vmem:[#allocation9 + $0x330] ss:$8 sps:$4 sm:$0xff]  }
 0x1b3   :  { %2935 = vmatprep.mubr.bf16.mxu0 %v1935_v7  ;;  %v1627_v34 = vadd.f32 %v4602_v27, %v1114_v33  ;;  %v1116_v39 = vpop.f32.mrb[66].mxu1  ;;  %v4068_v33 = vld [vmem:[#allocation9 + $0x344] ss:$8 sps:$4 sm:$0xff]  }
 0x1b4   :  { %2936 = vmatmul.mubr.bf16.gmra.mrb[60].mxu0 %v1934_v28  ;;  %v1754_v40 = vmax.f32 %v1626_v55, 0.0  ;;  %v1634_v41 = vadd.f32 %v4599_v24, %v1116_v39  ;;  %v1118_v1 = vpop.f32.mrb[67].mxu1 }
 0x1b5   :  { %2975 = vmatpush1.bf16.msra.mxu0 %v4048_v29  ;;  %2978 = vmatprep.mubr.bf16.mxu0 %v4480_v47  ;;  %v1755_v45 = vmax.f32 %v1627_v34, 0.0  ;;  %v1635_v48 = vadd.f32 %v4602_v27, %v1118_v1 }
 0x1b6   :  { %2976 = vmatprep.subr.bf16.mxu0 %v4053_v8  ;;  %v1762_v51 = vmax.f32 %v1634_v41, 0.0  ;;  %v4066_v41 = vld [vmem:[#allocation9 + $0x340] ss:$8 sps:$4 sm:$0xff]  }
 0x1b7   :  { %v1763_v53 = vmax.f32 %v1635_v48, 0.0 }
 0x1b8   :  { %v4609_v54 = vpack.c.bf16 %v1762_v51, %v1754_v40 }
 0x1b9   :  { %2977 = vmatpush1.bf16.msra.mxu0 %v4051_v42  ;;  %v4611_v57 = vpack.c.bf16 %v1763_v53, %v1755_v45  ;;  %v1122_v18 = vpop.f32.mrb[68].mxu1  ;;  %v4071_v42 = vld [vmem:[#allocation9 + $0x354] ss:$8 sps:$4 sm:$0xff]  }
 0x1ba   :  { %3059 = vmatprep.subr.bf16.mxu0 %v4056_v49  ;;  %v1642_v12 = vadd.f32 %v4599_v24, %v1122_v18  ;;  %v1124_v60 = vpop.f32.mrb[69].mxu1  ;;  %v4069_v18 = vld [vmem:[#allocation9 + $0x350] ss:$8 sps:$4 sm:$0xff]  }
 0x1bb   :  { %v1643_v47 = vadd.f32 %v4602_v27, %v1124_v60  ;;  %v1126_v3 = vpop.f32.mrb[70].mxu1  ;;  %v4074_v60 = vld [vmem:[#allocation9 + $0x364] ss:$8 sps:$4 sm:$0xff]  }
 0x1bc   :  { %2979 = vmatmul.mubr.bf16.vlgmr.msra.gmra.mrb[32].mxu0 %v4477_v44  ;;  %v1770_v4 = vmax.f32 %v1642_v12, 0.0  ;;  %v1650_v5 = vadd.f32 %v4599_v24, %v1126_v3  ;;  %v1128_v6 = vpop.f32.mrb[71].mxu1 }
 0x1bd   :  { %3060 = vmatpush1.bf16.msra.mxu0 %v4054_v56  ;;  %2988 = vmatprep.mubr.bf16.mxu0 %v4492_v32  ;;  %v1771_v10 = vmax.f32 %v1643_v47, 0.0  ;;  %v1651_v11 = vadd.f32 %v4602_v27, %v1128_v6 }
 0x1be   :  { %3061 = vmatprep.subr.bf16.mxu0 %v4059_v63  ;;  %v1778_v62 = vmax.f32 %v1650_v5, 0.0  ;;  %v4072_v5 = vld [vmem:[#allocation9 + $0x360] ss:$8 sps:$4 sm:$0xff]  }
 0x1bf   :  { %v1779_v17 = vmax.f32 %v1651_v11, 0.0 }
 0x1c0   :  { %v4619_v20 = vpack.c.bf16 %v1778_v62, %v1770_v4 }
 0x1c1   :  { %3062 = vmatpush1.bf16.msra.mxu0 %v4057_v9  ;;  %v4621_v44 = vpack.c.bf16 %v1779_v17, %v1771_v10  ;;  %v1132_v38 = vpop.f32.mrb[72].mxu1  ;;  %v4077_v9 = vld [vmem:[#allocation9 + $0x374] ss:$8 sps:$4 sm:$0xff]  }
 0x1c2   :  { %3063 = vmatprep.subr.bf16.mxu0 %v4062_v15  ;;  %v1658_v43 = vadd.f32 %v4599_v24, %v1132_v38  ;;  %v1134_v25 = vpop.f32.mrb[73].mxu1  ;;  %v4075_v38 = vld [vmem:[#allocation9 + $0x370] ss:$8 sps:$4 sm:$0xff]  }
 0x1c3   :  { %v1659_v32 = vadd.f32 %v4602_v27, %v1134_v25  ;;  %v1136_v26 = vpop.f32.mrb[74].mxu1  ;;  %v4080_v25 = vld [vmem:[#allocation9 + $0x384] ss:$8 sps:$4 sm:$0xff]  }
 0x1c4   :  { %2989 = vmatmul.mubr.bf16.gmra.mrb[36].mxu0 %v4489_v14  ;;  %v1786_v28 = vmax.f32 %v1658_v43, 0.0  ;;  %v1666_v7 = vadd.f32 %v4599_v24, %v1136_v26  ;;  %v1138_v29 = vpop.f32.mrb[75].mxu1 }
 0x1c5   :  { %3064 = vmatpush1.bf16.msra.mxu0 %v4060_v21  ;;  %2998 = vmatprep.mubr.bf16.mxu0 %v4504_v50  ;;  %v1787_v8 = vmax.f32 %v1659_v32, 0.0  ;;  %v1667_v55 = vadd.f32 %v4602_v27, %v1138_v29 }
 0x1c6   :  { %3065 = vmatprep.subr.bf16.mxu0 %v4065_v23  ;;  %v1794_v34 = vmax.f32 %v1666_v7, 0.0  ;;  %v4078_v7 = vld [vmem:[#allocation9 + $0x380] ss:$8 sps:$4 sm:$0xff]  }
 0x1c7   :  { %v1795_v39 = vmax.f32 %v1667_v55, 0.0 }
 0x1c8   :  { %v4629_v40 = vpack.c.bf16 %v1794_v34, %v1786_v28 }
 0x1c9   :  { %3066 = vmatpush1.bf16.msra.mxu0 %v4063_v30  ;;  %v4631_v14 = vpack.c.bf16 %v1795_v39, %v1787_v8  ;;  %v1142_v1 = vpop.f32.mrb[76].mxu1  ;;  %v4083_v30 = vld [vmem:[#allocation9 + $0x394] ss:$8 sps:$4 sm:$0xff]  }
 0x1ca   :  { %3067 = vmatprep.subr.bf16.mxu0 %v4068_v33  ;;  %v1674_v45 = vadd.f32 %v4599_v24, %v1142_v1  ;;  %v1144_v48 = vpop.f32.mrb[77].mxu1  ;;  %v4081_v1 = vld [vmem:[#allocation9 + $0x390] ss:$8 sps:$4 sm:$0xff]  }
 0x1cb   :  { %v1675_v50 = vadd.f32 %v4602_v27, %v1144_v48  ;;  %v1146_v49 = vpop.f32.mrb[78].mxu1  ;;  %v4086_v48 = vld [vmem:[#allocation9 + $0x3a4] ss:$8 sps:$4 sm:$0xff]  }
 0x1cc   :  { %2999 = vmatmul.mubr.bf16.gmra.mrb[40].mxu0 %v4501_v46  ;;  %v1802_v51 = vmax.f32 %v1674_v45, 0.0  ;;  %v1682_v53 = vadd.f32 %v4599_v24, %v1146_v49  ;;  %v1148_v56 = vpop.f32.mrb[79].mxu1 }
 0x1cd   :  { %3068 = vmatpush1.bf16.msra.mxu0 %v4066_v41  ;;  %3008 = vmatprep.mubr.bf16.mxu0 %v4516_v22  ;;  %v1803_v63 = vmax.f32 %v1675_v50, 0.0  ;;  %v1683_v12 = vadd.f32 %v4602_v27, %v1148_v56 }
 0x1ce   :  { %3069 = vmatprep.subr.bf16.mxu0 %v4071_v42  ;;  %v1810_v47 = vmax.f32 %v1682_v53, 0.0  ;;  %v4084_v53 = vld [vmem:[#allocation9 + $0x3a0] ss:$8 sps:$4 sm:$0xff]  }
 0x1cf   :  { %v1811_v3 = vmax.f32 %v1683_v12, 0.0 }
 0x1d0   :  { %v4639_v4 = vpack.c.bf16 %v1810_v47, %v1802_v51 }
 0x1d1   :  { %3070 = vmatpush1.bf16.msra.mxu0 %v4069_v18  ;;  %v4641_v46 = vpack.c.bf16 %v1811_v3, %v1803_v63  ;;  %v1152_v6 = vpop.f32.mrb[80].mxu1  ;;  %v4089_v18 = vld [vmem:[#allocation9 + $0x3b4] ss:$8 sps:$4 sm:$0xff]  }
 0x1d2   :  { %3071 = vmatprep.subr.bf16.mxu0 %v4074_v60  ;;  %v1690_v10 = vadd.f32 %v4599_v24, %v1152_v6  ;;  %v1154_v11 = vpop.f32.mrb[81].mxu1  ;;  %v4087_v6 = vld [vmem:[#allocation9 + $0x3b0] ss:$8 sps:$4 sm:$0xff]  }
 0x1d3   :  { %v1691_v22 = vadd.f32 %v4602_v27, %v1154_v11  ;;  %v1156_v15 = vpop.f32.mrb[82].mxu1  ;;  %v4092_v11 = vld [vmem:[#allocation9 + $0x3c4] ss:$8 sps:$4 sm:$0xff]  }
 0x1d4   :  { %3009 = vmatmul.mubr.bf16.gmra.mrb[44].mxu0 %v4513_v19  ;;  %v1818_v62 = vmax.f32 %v1690_v10, 0.0  ;;  %v1698_v17 = vadd.f32 %v4599_v24, %v1156_v15  ;;  %v1158_v21 = vpop.f32.mrb[83].mxu1 }
 0x1d5   :  { %3072 = vmatpush1.bf16.msra.mxu0 %v4072_v5  ;;  %3018 = vmatprep.mubr.bf16.mxu0 %v4530_v0  ;;  %v1819_v23 = vmax.f32 %v1691_v22, 0.0  ;;  %v1699_v43 = vadd.f32 %v4602_v27, %v1158_v21 }
 0x1d6   :  { %3073 = vmatprep.subr.bf16.mxu0 %v4077_v9  ;;  %v1826_v32 = vmax.f32 %v1698_v17, 0.0  ;;  %v4090_v17 = vld [vmem:[#allocation9 + $0x3c0] ss:$8 sps:$4 sm:$0xff]  }
 0x1d7   :  { %v1827_v26 = vmax.f32 %v1699_v43, 0.0 }
 0x1d8   :  { %v4649_v28 = vpack.c.bf16 %v1826_v32, %v1818_v62 }
 0x1d9   :  { %3074 = vmatpush1.bf16.msra.mxu0 %v4075_v38  ;;  %v4651_v19 = vpack.c.bf16 %v1827_v26, %v1819_v23  ;;  %v1162_v29 = vpop.f32.mrb[84].mxu1  ;;  %v4095_v38 = vld [vmem:[#allocation9 + $0x3d4] ss:$8 sps:$4 sm:$0xff]  }
 0x1da   :  { %3075 = vmatprep.subr.bf16.mxu0 %v4080_v25  ;;  %v1706_v8 = vadd.f32 %v4599_v24, %v1162_v29  ;;  %v1164_v55 = vpop.f32.mrb[85].mxu1  ;;  %v4093_v29 = vld [vmem:[#allocation9 + $0x3d0] ss:$8 sps:$4 sm:$0xff]  }
 0x1db   :  { %v1707_v0 = vadd.f32 %v4602_v27, %v1164_v55  ;;  %v1166_v33 = vpop.f32.mrb[86].mxu1  ;;  %v4098_v55 = vld [vmem:[#allocation9 + $0x3e4] ss:$8 sps:$4 sm:$0xff]  }
 0x1dc   :  { %3019 = vmatmul.mubr.bf16.gmra.mrb[48].mxu0 %v4527_v59  ;;  %v1834_v34 = vmax.f32 %v1706_v8, 0.0  ;;  %v1714_v39 = vadd.f32 %v4599_v24, %v1166_v33  ;;  %v1168_v41 = vpop.f32.mrb[87].mxu1 }
 0x1dd   :  { %3076 = vmatpush1.bf16.msra.mxu0 %v4078_v7  ;;  %3028 = vmatprep.mubr.bf16.mxu0 %v4548_v31  ;;  %v1835_v42 = vmax.f32 %v1707_v0, 0.0  ;;  %v1715_v45 = vadd.f32 %v4602_v27, %v1168_v41 }
 0x1de   :  { %3077 = vmatprep.subr.bf16.mxu0 %v4083_v30  ;;  %v1842_v50 = vmax.f32 %v1714_v39, 0.0  ;;  %v4096_v39 = vld [vmem:[#allocation9 + $0x3e0] ss:$8 sps:$4 sm:$0xff]  }
 0x1df   :  { %v1843_v49 = vmax.f32 %v1715_v45, 0.0 }
 0x1e0   :  { %v4659_v51 = vpack.c.bf16 %v1842_v50, %v1834_v34 }
 0x1e1   :  { %3078 = vmatpush1.bf16.msra.mxu0 %v4081_v1  ;;  %v4661_v59 = vpack.c.bf16 %v1843_v49, %v1835_v42  ;;  %v1172_v56 = vpop.f32.mrb[88].mxu1 }
 0x1e2   :  { %3079 = vmatprep.subr.bf16.mxu0 %v4086_v48  ;;  %v1722_v63 = vadd.f32 %v4599_v24, %v1172_v56  ;;  %v1174_v12 = vpop.f32.mrb[89].mxu1 }
 0x1e3   :  { %v1723_v31 = vadd.f32 %v4602_v27, %v1174_v12  ;;  %v1176_v60 = vpop.f32.mrb[90].mxu1 }
 0x1e4   :  { %3029 = vmatmul.mubr.bf16.gmra.mrb[52].mxu0 %v4545_v52  ;;  %v1850_v47 = vmax.f32 %v1722_v63, 0.0  ;;  %v1730_v3 = vadd.f32 %v4599_v24, %v1176_v60  ;;  %v1178_v5 = vpop.f32.mrb[91].mxu1 }
 0x1e5   :  { %3080 = vmatpush1.bf16.msra.mxu0 %v4084_v53  ;;  %3038 = vmatprep.mubr.bf16.mxu0 %v4560_v16  ;;  %v1851_v9 = vmax.f32 %v1723_v31, 0.0  ;;  %v1731_v10 = vadd.f32 %v4602_v27, %v1178_v5 }
 0x1e6   :  { %3081 = vmatprep.subr.bf16.mxu0 %v4089_v18  ;;  %v1858_v22 = vmax.f32 %v1730_v3, 0.0 }
 0x1e7   :  { %v1859_v15 = vmax.f32 %v1731_v10, 0.0 }
 0x1e8   :  { %v4669_v62 = vpack.c.bf16 %v1858_v22, %v1850_v47 }
 0x1e9   :  { %3082 = vmatpush1.bf16.msra.mxu0 %v4087_v6  ;;  %v1931_v52 = vpack.c.bf16 %v1859_v15, %v1851_v9  ;;  %v1182_v21 = vpop.f32.mrb[92].mxu1 }
 0x1ea   :  { %3083 = vmatprep.subr.bf16.mxu0 %v4092_v11  ;;  %v1738_v23 = vadd.f32 %v4599_v24, %v1182_v21  ;;  %v1184_v43 = vpop.f32.mrb[93].mxu1 }
 0x1eb   :  { %v1739_v16 = vadd.f32 %v4602_v27, %v1184_v43  ;;  %v1186_v25 = vpop.f32.mrb[94].mxu1 }
 0x1ec   :  { %3039 = vmatmul.mubr.bf16.gmra.mrb[56].mxu0 %v4557_v13  ;;  %v1866_v32 = vmax.f32 %v1738_v23, 0.0  ;;  %v1746_v26 = vadd.f32 %v4599_v24, %v1186_v25  ;;  %v1188_v7 = vpop.f32.mrb[95].mxu1  ;;  %v4101_v13 = vld [vmem:[#allocation9 + $0x3f4] ss:$8 sps:$4 sm:$0xff]   ;;  %v4099_v24 = vld [vmem:[#allocation9 + $0x3f0] ss:$8 sps:$4 sm:$0xff]  }
 0x1ed   :  { %3084 = vmatpush1.bf16.msra.mxu0 %v4090_v17  ;;  %3048 = vmatprep.mubr.bf16.mxu0 %v4572_v2  ;;  %v1867_v30 = vmax.f32 %v1739_v16, 0.0  ;;  %v1747_v8 = vadd.f32 %v4602_v27, %v1188_v7 }
 0x1ee   :  { %3085 = vmatprep.subr.bf16.mxu0 %v4095_v38  ;;  %v1874_v0 = vmax.f32 %v1746_v26, 0.0 }
 0x1ef   :  { %v1875_v33 = vmax.f32 %v1747_v8, 0.0 }
 0x1f0   :  { %v1938_v34 = vpack.c.bf16 %v1874_v0, %v1866_v32 }
 0x1f1   :  { %3086 = vmatpush1.bf16.msra.mxu0 %v4093_v29  ;;  %v1939_v41 = vpack.c.bf16 %v1875_v33, %v1867_v30 }
 0x1f2   :  { %3087 = vmatprep.subr.bf16.mxu0 %v4098_v55 }
 0x1f4   :  { %3049 = vmatmul.mubr.bf16.gmra.mrb[60].mxu0 %v4569_v61 }
 0x1f5   :  { %3088 = vmatpush1.bf16.msra.mxu0 %v4096_v39  ;;  %3091 = vmatprep.mubr.bf16.mxu0 %v4611_v57 }
 0x1f6   :  { %3089 = vmatprep.subr.bf16.mxu0 %v4101_v13 }
 0x1f9   :  { %3090 = vmatpush1.bf16.msra.mxu0 %v4099_v24 }
 0x1fc   :  { %3092 = vmatmul.mubr.bf16.vlgmr.msra.gmra.mrb[32].mxu0 %v4609_v54 }
 0x1fd   :  { %3101 = vmatprep.mubr.bf16.mxu0 %v4621_v44 }
 0x204   :  { %3102 = vmatmul.mubr.bf16.gmra.mrb[36].mxu0 %v4619_v20 }
 0x205   :  { %3111 = vmatprep.mubr.bf16.mxu0 %v4631_v14 }
 0x20c   :  { %3112 = vmatmul.mubr.bf16.gmra.mrb[40].mxu0 %v4629_v40 }
 0x20d   :  { %3121 = vmatprep.mubr.bf16.mxu0 %v4641_v46 }
 0x20f   :  { %v2754_v2 = vpop.f32.mrb[96].mxu1 }
 0x210   :  { %v2756_v61 = vpop.f32.mrb[97].mxu1 }
 0x211   :  { %v2758_v27 = vpop.f32.mrb[98].mxu1 }
 0x212   :  { %v2760_v1 = vpop.f32.mrb[99].mxu1 }
 0x214   :  { %3122 = vmatmul.mubr.bf16.gmra.mrb[44].mxu0 %v4639_v4 }
 0x215   :  { %3131 = vmatprep.mubr.bf16.mxu0 %v4651_v19 }
 0x217   :  { %v2764_v57 = vpop.f32.mrb[100].mxu1 }
 0x218   :  { %v2766_v54 = vpop.f32.mrb[101].mxu1 }
 0x219   :  { %v4687_v42 = vpop.f32.mrb[102].mxu1 }
 0x21a   :  { %v4689_v44 = vpop.f32.mrb[103].mxu1 }
 0x21c   :  { %3132 = vmatmul.mubr.bf16.gmra.mrb[48].mxu0 %v4649_v28 }
 0x21d   :  { %3141 = vmatprep.mubr.bf16.mxu0 %v4661_v59 }
 0x21f   :  { %v4693_v20 = vpop.f32.mrb[104].mxu1 }
 0x220   :  { %v4695_v40 = vpop.f32.mrb[105].mxu1 }
 0x221   :  { %v4697_v14 = vpop.f32.mrb[106].mxu1 }
 0x222   :  { %v4699_v46 = vpop.f32.mrb[107].mxu1 }
 0x224   :  { %3142 = vmatmul.mubr.bf16.gmra.mrb[52].mxu0 %v4659_v51  ;;  %v2068_v51 = vld [vmem:[%s4921_s4] sm:$0x3] }
 0x225   :  { %3151 = vmatprep.mubr.bf16.mxu0 %v1931_v52  ;;  %v4725_v56 = vrot.slane %v2068_v51, %v4434_v58  ;;  %v4730_v63 = vrot.slane %v2068_v51, %v4442_v37 }
 0x227   :  { %v4702_v4 = vpop.f32.mrb[108].mxu1  ;;  %v2755_v17 = vadd.f32 %v2754_v2, %v4725_v56  ;;  %v2757_v52 = vadd.f32 %v2756_v61, %v4730_v63  ;;  %v2759_v38 = vadd.f32 %v2758_v27, %v4725_v56  ;;  %v2761_v25 = vadd.f32 %v2760_v1, %v4730_v63 }
 0x228   :  { %v4704_v19 = vpop.f32.mrb[109].mxu1  ;;  %v2765_v13 = vadd.f32 %v2764_v57, %v4725_v56  ;;  %v2767_v2 = vadd.f32 %v2766_v54, %v4730_v63  ;;  %v2769_v1 = vadd.f32 %v4687_v42, %v4725_v56 }
 0x229   :  { %v4706_v45 = vpop.f32.mrb[110].mxu1 }
 0x22a   :  { %v4708_v28 = vpop.f32.mrb[111].mxu1 }
 0x22c   :  { %3152 = vmatmul.mubr.bf16.gmra.mrb[56].mxu0 %v4669_v62  ;;  %v3204_v62 = vld [vmem:[%s4922_s5] sm:$0x3]  ;;  %s4268_s5 = smov [#allocation10]  }
 0x22d   :  { %3161 = vmatprep.mubr.bf16.mxu0 %v1939_v41  ;;  %v4761_v16 = vrot.slane %v3204_v62, %v4434_v58  ;;  %v4765_v7 = vrot.slane %v3204_v62, %v4442_v37  ;;  %s3553_s19 = sshll.u32 %s4268_s5, 4  ;;  %s3554_s19 = int_to_ptr.vmem [resolvable:$true] %s3553_s19 }
 0x22e   :  { %s4232_s20 = scalar_lea.vmem %s3554_s19, 16  ;;  %s4236_s21 = scalar_lea.vmem %s3554_s19, 32 }
 0x22f   :  { %v4711_v48 = vpop.f32.mrb[112].mxu1  ;;  %p4233_p10 = scmp.ne.s32.totalorder %s3554_s19, %s4232_s20  ;;  %p4237_p11 = scmp.lt.s32.totalorder %s3554_s19, %s3554_s19 }
 0x230   :  { %v4713_v50 = vpop.f32.mrb[113].mxu1  ;;  %p4238_p12 = scmp.lt.s32.totalorder %s4236_s21, %s4232_s20 }
 0x231   :  { %v4715_v49 = vpop.f32.mrb[114].mxu1 }
 0x232   :  { %v4717_v53 = vpop.f32.mrb[115].mxu1  ;;  %p4239_p13 = por %p4238_p12, %p4237_p11 }
 0x234   :  { %3162 = vmatmul.mubr.bf16.gmra.mrb[60].mxu0 %v1938_v34  ;;  %p4240_p0 = pnand %p4239_p13, %p4233_p10 }
 0x237   :  { %v4722_v59 = vpop.f32.mrb[116].mxu1 }
 0x238   :  { %v4727_v18 = vpop.f32.mrb[117].mxu1 }
 0x239   :  { %v2808_v12 = vpop.f32.mrb[118].mxu1 }
 0x23a   :  { %v4733_v31 = vadd.f32 %v2808_v12, %v4725_v56  ;;  %v2810_v60 = vpop.f32.mrb[119].mxu1 }
 0x23b   :  { %v4736_v47 = vadd.f32 %v2810_v60, %v4730_v63  ;;  %v2771_v60 = vadd.f32 %v4689_v44, %v4730_v63 }
 0x23f   :  { %v4738_v3 = vpop.f32.mrb[120].mxu1 }
 0x240   :  { %v4740_v5 = vpop.f32.mrb[121].mxu1 }
 0x241   :  { %v4742_v6 = vpop.f32.mrb[122].mxu1 }
 0x242   :  { %v4744_v9 = vpop.f32.mrb[123].mxu1 }
 0x247   :  { %v4746_v10 = vpop.f32.mrb[124].mxu1 }
 0x248   :  { %v4748_v11 = vpop.f32.mrb[125].mxu1 }
 0x249   :  { %v4750_v22 = vpop.f32.mrb[126].mxu1 }
 0x24a   :  { %v4752_v15 = vpop.f32.mrb[127].mxu1 }
 0x2cf   :  { %v3093_v21 = vpop.f32.mrb[32].mxu0 }
 0x2d0   :  { %v3772_v23 = vadd.f32 %v3093_v21, %v2755_v17  ;;  %v3095_v43 = vpop.f32.mrb[33].mxu0 }
 0x2d1   :  { %v3774_v32 = vadd.f32 %v3095_v43, %v2757_v52  ;;  %v3097_v26 = vpop.f32.mrb[34].mxu0 }
 0x2d2   :  { %v3172_v29 = vmax.f32 %v3772_v23, 0.0  ;;  %v3776_v30 = vadd.f32 %v3097_v26, %v2759_v38  ;;  %v3099_v8 = vpop.f32.mrb[35].mxu0  ;;  %v2775_v26 = vadd.f32 %v4693_v20, %v4725_v56 }
 0x2d3   :  { %v3173_v55 = vmax.f32 %v3774_v32, 0.0  ;;  %v3778_v0 = vadd.f32 %v3099_v8, %v2761_v25 }
 0x2d4   :  { %v3174_v33 = vmax.f32 %v3776_v30, 0.0  ;;  %v3216_v34 = vmul.f32 %v4761_v16, %v3172_v29  ;;  %v2777_v29 = vadd.f32 %v4695_v40, %v4730_v63 }
 0x2d5   :  { %v3175_v39 = vmax.f32 %v3778_v0, 0.0  ;;  %v3217_v41 = vmul.f32 %v4765_v7, %v3173_v55  ;;  %v2779_v0 = vadd.f32 %v4697_v14, %v4725_v56 }
 0x2d6   :  { %v3218_v24 = vmul.f32 %v4761_v16, %v3174_v33 }
 0x2d7   :  { %v3219_v37 = vmul.f32 %v4765_v7, %v3175_v39  ;;  %v3103_v61 = vpop.f32.mrb[36].mxu0  ;;  %v3248_v27 = vadd.f32 %v3217_v41, %v3216_v34  ;;  %v2781_v39 = vadd.f32 %v4699_v46, %v4730_v63 }
 0x2d8   :  { %v3780_v51 = vadd.f32 %v3103_v61, %v2765_v13  ;;  %v3105_v12 = vpop.f32.mrb[37].mxu0 }
 0x2d9   :  { %v3782_v62 = vadd.f32 %v3105_v12, %v2767_v2  ;;  %v3107_v17 = vpop.f32.mrb[38].mxu0  ;;  %3249 = vadd.xlane.f32.xlu0 %v3248_v27  ;;  %v3251_v57 = vadd.f32 %v3219_v37, %v3218_v24  ;;  %v2785_v12 = vadd.f32 %v4702_v4, %v4725_v56 }
 0x2da   :  { %v3176_v52 = vmax.f32 %v3780_v51, 0.0  ;;  %v3784_v21 = vadd.f32 %v3107_v17, %v2769_v1  ;;  %v3109_v38 = vpop.f32.mrb[39].mxu0 }
 0x2db   :  { %v3177_v54 = vmax.f32 %v3782_v62, 0.0  ;;  %v3786_v23 = vadd.f32 %v3109_v38, %v2771_v60  ;;  %v2787_v60 = vadd.f32 %v4704_v19, %v4730_v63 }
 0x2dc   :  { %v3178_v43 = vmax.f32 %v3784_v21, 0.0  ;;  %v3220_v25 = vmul.f32 %v4761_v16, %v3176_v52  ;;  %v2789_v52 = vadd.f32 %v4706_v45, %v4725_v56 }
 0x2dd   :  { %v3179_v32 = vmax.f32 %v3786_v23, 0.0  ;;  %3252 = vadd.xlane.f32.xlu0 %v3251_v57  ;;  %v3221_v42 = vmul.f32 %v4765_v7, %v3177_v54  ;;  %v2791_v54 = vadd.f32 %v4708_v28, %v4730_v63 }
 0x2de   :  { %v3222_v44 = vmul.f32 %v4761_v16, %v3178_v43 }
 0x2df   :  { %v3223_v30 = vmul.f32 %v4765_v7, %v3179_v32  ;;  %v3113_v8 = vpop.f32.mrb[40].mxu0  ;;  %v3254_v55 = vadd.f32 %v3221_v42, %v3220_v25 }
 0x2e0   :  { %v3788_v33 = vadd.f32 %v3113_v8, %v2775_v26  ;;  %v3115_v34 = vpop.f32.mrb[41].mxu0  ;;  %v2795_v8 = vadd.f32 %v4711_v48, %v4725_v56 }
 0x2e1   :  { %v3790_v41 = vadd.f32 %v3115_v34, %v2777_v29  ;;  %v3117_v13 = vpop.f32.mrb[42].mxu0  ;;  %3255 = vadd.xlane.f32.xlu1 %v3254_v55  ;;  %v3257_v20 = vadd.f32 %v3223_v30, %v3222_v44  ;;  %v2797_v55 = vadd.f32 %v4713_v50, %v4730_v63 }
 0x2e2   :  { %v3180_v24 = vmax.f32 %v3788_v33, 0.0  ;;  %v3792_v2 = vadd.f32 %v3117_v13, %v2779_v0  ;;  %v3119_v37 = vpop.f32.mrb[43].mxu0 }
 0x2e3   :  { %v3181_v40 = vmax.f32 %v3790_v41, 0.0  ;;  %v3794_v61 = vadd.f32 %v3119_v37, %v2781_v39  ;;  %v2799_v39 = vadd.f32 %v4715_v49, %v4725_v56 }
 0x2e4   :  { %v3224_v27 = vmul.f32 %v4761_v16, %v3180_v24  ;;  %v3182_v1 = vmax.f32 %v3792_v2, 0.0 }
 0x2e5   :  { %v3225_v51 = vmul.f32 %v4765_v7, %v3181_v40  ;;  %v3183_v14 = vmax.f32 %v3794_v61, 0.0  ;;  %3258 = vadd.xlane.f32.xlu1 %v3257_v20  ;;  %v2801_v20 = vadd.f32 %v4717_v53, %v4730_v63 }
 0x2e6   :  { %v3226_v46 = vmul.f32 %v4761_v16, %v3182_v1 }
 0x2e7   :  { %v3227_v62 = vmul.f32 %v4765_v7, %v3183_v14  ;;  %v3123_v17 = vpop.f32.mrb[44].mxu0  ;;  %v3260_v57 = vadd.f32 %v3225_v51, %v3224_v27 }
 0x2e8   :  { %v3796_v21 = vadd.f32 %v3123_v17, %v2785_v12  ;;  %v3125_v38 = vpop.f32.mrb[45].mxu0  ;;  %v2805_v12 = vadd.f32 %v4722_v59, %v4725_v56 }
 0x2e9   :  { %v3798_v23 = vadd.f32 %v3125_v38, %v2787_v60  ;;  %v3127_v43 = vpop.f32.mrb[46].mxu0  ;;  %3261 = vadd.xlane.f32.xlu0 %v3260_v57  ;;  %v3263_v4 = vadd.f32 %v3227_v62, %v3226_v46  ;;  %v2807_v46 = vadd.f32 %v4727_v18, %v4730_v63 }
 0x2ea   :  { %v3184_v25 = vmax.f32 %v3796_v21, 0.0  ;;  %v3800_v32 = vadd.f32 %v3127_v43, %v2789_v52  ;;  %v3129_v42 = vpop.f32.mrb[47].mxu0 }
 0x2eb   :  { %v3185_v19 = vmax.f32 %v3798_v23, 0.0  ;;  %v3802_v26 = vadd.f32 %v3129_v42, %v2791_v54  ;;  %3264 = vadd.xlane.f32.xlu1 %v3263_v4  ;;  %v3296_v54 = vld [vmem:[#allocation3] sm:$0x1] }
 0x2ec   :  { %v3228_v44 = vmul.f32 %v4761_v16, %v3184_v25  ;;  %v3186_v29 = vmax.f32 %v3800_v32, 0.0 }
 0x2ed   :  { %v3229_v45 = vmul.f32 %v4765_v7, %v3185_v19  ;;  %v3187_v30 = vmax.f32 %v3802_v26, 0.0 }
 0x2ee   :  { %v3230_v28 = vmul.f32 %v4761_v16, %v3186_v29 }
 0x2ef   :  { %v3231_v0 = vmul.f32 %v4765_v7, %v3187_v30  ;;  %v3133_v33 = vpop.f32.mrb[48].mxu0  ;;  %v3266_v34 = vadd.f32 %v3229_v45, %v3228_v44  ;;  %v2815_v44 = vadd.f32 %v4738_v3, %v4725_v56 }
 0x2f0   :  { %v3804_v41 = vadd.f32 %v3133_v33, %v2795_v8  ;;  %v3135_v13 = vpop.f32.mrb[49].mxu0  ;;  %v2819_v8 = vadd.f32 %v4742_v6, %v4725_v56 }
 0x2f1   :  { %v3806_v24 = vadd.f32 %v3135_v13, %v2797_v55  ;;  %v3137_v2 = vpop.f32.mrb[50].mxu0  ;;  %3267 = vadd.xlane.f32.xlu0 %v3266_v34  ;;  %v3269_v48 = vadd.f32 %v3231_v0, %v3230_v28  ;;  %v2821_v0 = vadd.f32 %v4744_v9, %v4730_v63 }
 0x2f2   :  { %v3188_v37 = vmax.f32 %v3804_v41, 0.0  ;;  %v3808_v40 = vadd.f32 %v3137_v2, %v2799_v39  ;;  %v3139_v61 = vpop.f32.mrb[51].mxu0 }
 0x2f3   :  { %v3189_v50 = vmax.f32 %v3806_v24, 0.0  ;;  %v3810_v27 = vadd.f32 %v3139_v61, %v2801_v20 }
 0x2f4   :  { %v3232_v1 = vmul.f32 %v4761_v16, %v3188_v37  ;;  %v3190_v51 = vmax.f32 %v3808_v40, 0.0  ;;  %v2825_v37 = vadd.f32 %v4746_v10, %v4725_v56  ;;  %v2827_v40 = vadd.f32 %v4748_v11, %v4730_v63 }
 0x2f5   :  { %v3233_v14 = vmul.f32 %v4765_v7, %v3189_v50  ;;  %v3191_v49 = vmax.f32 %v3810_v27, 0.0  ;;  %3270 = vadd.xlane.f32.xlu0 %v3269_v48 }
 0x2f6   :  { %v3234_v53 = vmul.f32 %v4761_v16, %v3190_v51 }
 0x2f7   :  { %v3235_v60 = vmul.f32 %v4765_v7, %v3191_v49  ;;  %v3143_v62 = vpop.f32.mrb[52].mxu0  ;;  %v3272_v17 = vadd.f32 %v3233_v14, %v3232_v1  ;;  %v2829_v1 = vadd.f32 %v4750_v22, %v4725_v56  ;;  %v2831_v49 = vadd.f32 %v4752_v15, %v4730_v63 }
 0x2f8   :  { %v3812_v57 = vadd.f32 %v3143_v62, %v2805_v12  ;;  %v3145_v52 = vpop.f32.mrb[53].mxu0 }
 0x2f9   :  { %v3814_v21 = vadd.f32 %v3145_v52, %v2807_v46  ;;  %v3147_v38 = vpop.f32.mrb[54].mxu0  ;;  %3273 = vadd.xlane.f32.xlu0 %v3272_v17  ;;  %v3275_v23 = vadd.f32 %v3235_v60, %v3234_v53 }
 0x2fa   :  { %v3192_v43 = vmax.f32 %v3812_v57, 0.0  ;;  %v3816_v4 = vadd.f32 %v3147_v38, %v4733_v31  ;;  %v3149_v59 = vpop.f32.mrb[55].mxu0  ;;  %v2817_v31 = vadd.f32 %v4740_v5, %v4730_v63 }
 0x2fb   :  { %v3193_v25 = vmax.f32 %v3814_v21, 0.0  ;;  %v3818_v32 = vadd.f32 %v3149_v59, %v4736_v47 }
 0x2fc   :  { %v3236_v18 = vmul.f32 %v4761_v16, %v3192_v43  ;;  %v3194_v42 = vmax.f32 %v3816_v4, 0.0  ;;  %3299 = vperm.xlu1 %3908, %v3296_v54  }
 0x2fd   :  { %v3237_v19 = vmul.f32 %v4765_v7, %v3193_v25  ;;  %v3195_v26 = vmax.f32 %v3818_v32, 0.0  ;;  %3276 = vadd.xlane.f32.xlu0 %v3275_v23 }
 0x2fe   :  { %v3238_v29 = vmul.f32 %v4761_v16, %v3194_v42 }
 0x2ff   :  { %v3239_v45 = vmul.f32 %v4765_v7, %v3195_v26  ;;  %v3153_v30 = vpop.f32.mrb[56].mxu0  ;;  %v3278_v47 = vadd.f32 %v3237_v19, %v3236_v18 }
 0x300   :  { %v3820_v28 = vadd.f32 %v3153_v30, %v2815_v44  ;;  %v3155_v55 = vpop.f32.mrb[57].mxu0 }
 0x301   :  { %v3822_v33 = vadd.f32 %v3155_v55, %v2817_v31  ;;  %v3157_v34 = vpop.f32.mrb[58].mxu0  ;;  %3279 = vadd.xlane.f32.xlu0 %v3278_v47  ;;  %v3281_v3 = vadd.f32 %v3239_v45, %v3238_v29 }
 0x302   :  { %v3196_v39 = vmax.f32 %v3820_v28, 0.0  ;;  %v3824_v41 = vadd.f32 %v3157_v34, %v2819_v8  ;;  %v3159_v13 = vpop.f32.mrb[59].mxu0 }
 0x303   :  { %v3197_v5 = vmax.f32 %v3822_v33, 0.0  ;;  %v3826_v20 = vadd.f32 %v3159_v13, %v2821_v0 }
 0x304   :  { %v3240_v24 = vmul.f32 %v4761_v16, %v3196_v39  ;;  %v3198_v2 = vmax.f32 %v3824_v41, 0.0 }
 0x305   :  { %v3241_v48 = vmul.f32 %v4765_v7, %v3197_v5  ;;  %v3199_v6 = vmax.f32 %v3826_v20, 0.0 }
 0x306   :  { %v3242_v9 = vmul.f32 %v4761_v16, %v3198_v2 }
 0x307   :  { %v3243_v61 = vmul.f32 %v4765_v7, %v3199_v6  ;;  %v3163_v50 = vpop.f32.mrb[60].mxu0  ;;  %v3284_v27 = vadd.f32 %v3241_v48, %v3240_v24 }
 0x308   :  { %v3828_v51 = vadd.f32 %v3163_v50, %v2825_v37  ;;  %v3165_v14 = vpop.f32.mrb[61].mxu0 }
 0x309   :  { %v3830_v12 = vadd.f32 %v3165_v14, %v2827_v40  ;;  %3285 = vadd.xlane.f32.xlu0 %v3284_v27  ;;  %v3167_v10 = vpop.f32.mrb[62].mxu0  ;;  %v3287_v53 = vadd.f32 %v3243_v61, %v3242_v9 }
 0x30a   :  { %v3200_v46 = vmax.f32 %v3828_v51, 0.0  ;;  %v3832_v60 = vadd.f32 %v3167_v10, %v2829_v1  ;;  %v3169_v62 = vpop.f32.mrb[63].mxu0  ;;  %v4866_v51 = vand.u32 127, %v1580_v35 }
 0x30b   :  { %v3201_v11 = vmax.f32 %v3830_v12, 0.0  ;;  %v3834_v17 = vadd.f32 %v3169_v62, %v2831_v49 }
 0x30c   :  { %v3244_v57 = vmul.f32 %v4761_v16, %v3200_v46  ;;  %v3202_v52 = vmax.f32 %v3832_v60, 0.0 }
 0x30d   :  { %v3245_v21 = vmul.f32 %v4765_v7, %v3201_v11  ;;  %v3203_v56 = vmax.f32 %v3834_v17, 0.0  ;;  %3288 = vadd.xlane.f32.xlu0 %v3287_v53  ;;  %v3440_v11 = vadd.s32 4294967288, %v4866_v51 }
 0x30e   :  { %v3246_v22 = vmul.f32 %v4761_v16, %v3202_v52 }
 0x30f   :  { %v3247_v63 = vmul.f32 %v4765_v7, %v3203_v56  ;;  %v3290_v15 = vadd.f32 %v3245_v21, %v3244_v57 }
 0x311   :  { %3291 = vadd.xlane.f32.xlu0 %v3290_v15  ;;  %v3293_v38 = vadd.f32 %v3247_v63, %v3246_v22  ;;  %v3447_v22 = vadd.s32 4294967280, %v4866_v51 }
 0x315   :  { %3294 = vadd.xlane.f32.xlu0 %v3293_v38  ;;  %v3438_v38 = vsub.s32 %v4866_v51, %v4431_v36 }
 0x320   :  { %3282 = vadd.xlane.f32.xlu1 %v3281_v3 }
 0x366   :  { %v3250_v54 = vpop.xlane.xlu0 %3249 }
 0x36a   :  { %v3253_v43 = vpop.xlane.xlu0 %3252 }
 0x36e   :  { %v3256_v23 = vpop.xlane.xlu1 %3255 }
 0x372   :  { %v3259_v4 = vpop.xlane.xlu1 %3258 }
 0x376   :  { %v3262_v59 = vpop.xlane.xlu0 %3261 }
 0x378   :  { %v3265_v25 = vpop.xlane.xlu1 %3264 }
 0x37c   :  { %v3300_v18 = vpop.permute.xlu1 %3299 }
 0x37d   :  { %v4852_v19 = vrot.slane %v3300_v18, %v4434_v58  ;;  %v3450_v18 = vsub.s32 %v3447_v22, %v4431_v36 }
 0x37e   :  { %v3268_v32 = vpop.xlane.xlu0 %3267 }
 0x37f   :  { %v3306_v7 = vadd.f32 %v4852_v19, %v3250_v54  ;;  %v3307_v26 = vadd.f32 %v4852_v19, %v3253_v43  ;;  %v3308_v29 = vadd.f32 %v4852_v19, %v3256_v23  ;;  %v3309_v47 = vadd.f32 %v4852_v19, %v3259_v4 }
 0x380   :  { %v3310_v28 = vadd.f32 %v4852_v19, %v3262_v59  ;;  %v3311_v0 = vadd.f32 %v4852_v19, %v3265_v25  ;;  %v3312_v34 = vadd.f32 %v4852_v19, %v3268_v32  ;;  %v3443_v54 = vsub.s32 %v3440_v11, %v4431_v36 }
 0x381   :  { %v3755_v31 = vmul.f32 -1.442695, %v3306_v7  ;;  %v3756_v45 = vmul.f32 -1.442695, %v3307_v26  ;;  %v3757_v30 = vmul.f32 -1.442695, %v3308_v29 }
 0x382   :  { %v3271_v42 = vpop.xlane.xlu0 %3270  ;;  %v3758_v58 = vmul.f32 -1.442695, %v3309_v47  ;;  %v3759_v33 = vmul.f32 -1.442695, %v3310_v28  ;;  %v3760_v13 = vmul.f32 -1.442695, %v3311_v0 }
 0x383   :  { %4102 = vpow2.f32 %v3755_v31  ;;  %v3761_v5 = vmul.f32 -1.442695, %v3312_v34  ;;  %v3313_v20 = vadd.f32 %v4852_v19, %v3271_v42  ;;  %v3454_v42 = vadd.s32 4294967272, %v4866_v51 }
 0x384   :  { %4104 = vpow2.f32 %v3756_v45 }
 0x385   :  { %4106 = vpow2.f32 %v3757_v30  ;;  %v3762_v40 = vmul.f32 -1.442695, %v3313_v20 }
 0x386   :  { %v3274_v16 = vpop.xlane.xlu0 %3273  ;;  %4108 = vpow2.f32 %v3758_v58  ;;  %v3457_v58 = vsub.s32 %v3454_v42, %v4431_v36  ;;  %v3531_v42 = vadd.s32 4294967184, %v4866_v51 }
 0x387   :  { %4110 = vpow2.f32 %v3759_v33  ;;  %v3314_v6 = vadd.f32 %v4852_v19, %v3274_v16  ;;  %v3468_v33 = vadd.s32 4294967256, %v4866_v51 }
 0x388   :  { %4112 = vpow2.f32 %v3760_v13 }
 0x389   :  { %4114 = vpow2.f32 %v3761_v5  ;;  %v3763_v27 = vmul.f32 -1.442695, %v3314_v6  ;;  %v3471_v6 = vsub.s32 %v3468_v33, %v4431_v36 }
 0x38a   :  { %v3277_v44 = vpop.xlane.xlu0 %3276 }
 0x38b   :  { %v3315_v9 = vadd.f32 %v4852_v19, %v3277_v44 }
 0x38d   :  { %v4103_v39 = vpop.eup %4102  ;;  %v3764_v14 = vmul.f32 -1.442695, %v3315_v9 }
 0x38e   :  { %v3280_v8 = vpop.xlane.xlu0 %3279  ;;  %v4105_v41 = vpop.eup %4104  ;;  %v3370_v24 = vadd.f32 1.0, %v4103_v39  ;;  %v3475_v39 = vadd.s32 4294967248, %v4866_v51 }
 0x38f   :  { %v4107_v2 = vpop.eup %4106  ;;  %v3371_v48 = vadd.f32 1.0, %v4105_v41  ;;  %v3316_v61 = vadd.f32 %v4852_v19, %v3280_v8 }
 0x390   :  { %v3372_v50 = vadd.f32 1.0, %v4107_v2  ;;  %4116 = vrcp.f32 %v3370_v24  ;;  %v4109_v1 = vpop.eup %4108 }
 0x391   :  { %4118 = vrcp.f32 %v3371_v48  ;;  %v3765_v12 = vmul.f32 -1.442695, %v3316_v61  ;;  %v4111_v46 = vpop.eup %4110  ;;  %v3373_v60 = vadd.f32 1.0, %v4109_v1  ;;  %v3478_v1 = vsub.s32 %v3475_v39, %v4431_v36 }
 0x392   :  { %4120 = vpow2.f32 %v3762_v40  ;;  %v4113_v52 = vpop.eup %4112  ;;  %v3374_v21 = vadd.f32 1.0, %v4111_v46 }
 0x393   :  { %4122 = vrcp.f32 %v3372_v50  ;;  %v4115_v56 = vpop.eup %4114  ;;  %v3375_v4 = vadd.f32 1.0, %v4113_v52 }
 0x394   :  { %4124 = vpow2.f32 %v3763_v27  ;;  %v3376_v16 = vadd.f32 1.0, %v4115_v56 }
 0x395   :  { %4126 = vpow2.f32 %v3764_v14 }
 0x396   :  { %v3286_v55 = vpop.xlane.xlu0 %3285  ;;  %4128 = vpow2.f32 %v3765_v12  ;;  %v3489_v12 = vadd.s32 4294967232, %v4866_v51 }
 0x397   :  { %v3318_v49 = vadd.f32 %v4852_v19, %v3286_v55  ;;  %4130 = vrcp.f32 %v3373_v60 }
 0x398   :  { %v3492_v22 = vsub.s32 %v3489_v12, %v4431_v36 }
 0x399   :  { %v3767_v17 = vmul.f32 -1.442695, %v3318_v49  ;;  %v3482_v49 = vadd.s32 4294967240, %v4866_v51 }
 0x39a   :  { %v3289_v3 = vpop.xlane.xlu0 %3288  ;;  %v4117_v15 = vpop.eup %4116 }
 0x39b   :  { %v3319_v10 = vadd.f32 %v4852_v19, %v3289_v3  ;;  %4132 = vpow2.f32 %v3767_v17  ;;  %v4119_v43 = vpop.eup %4118  ;;  %v3439_v26 = vrot.slane %v4117_v15, %v3438_v38  ;;  %v3496_v17 = vadd.s32 4294967224, %v4866_v51 }
 0x39c   :  { %v4121_v32 = vpop.eup %4120  ;;  %v3444_v44 = vrot.slane %v4119_v43, %v3443_v54  ;;  %v3485_v52 = vsub.s32 %v3482_v49, %v4431_v36  ;;  %v3510_v38 = vadd.s32 4294967208, %v4866_v51 }
 0x39d   :  { %v3768_v57 = vmul.f32 -1.442695, %v3319_v10  ;;  %v4123_v7 = vpop.eup %4122  ;;  %v3377_v8 = vadd.f32 1.0, %v4121_v32  ;;  %v3499_v15 = vsub.s32 %v3496_v17, %v4431_v36  ;;  %v3524_v32 = vadd.s32 4294967192, %v4866_v51 }
 0x39e   :  { %v3292_v37 = vpop.xlane.xlu0 %3291  ;;  %v4125_v31 = vpop.eup %4124  ;;  %v3451_v47 = vrot.slane %v4123_v7, %v3450_v18  ;;  %v3446_v28 = vsel %vm3445_vm0, %v3444_v44, %v3439_v26  ;;  %v3513_v26 = vsub.s32 %v3510_v38, %v4431_v36  ;;  %v3538_v44 = vadd.s32 4294967176, %v4866_v51 }
 0x39f   :  { %v3320_v62 = vadd.f32 %v4852_v19, %v3292_v37  ;;  %4134 = vpow2.f32 %v3768_v57  ;;  %v4127_v45 = vpop.eup %4126  ;;  %v3378_v55 = vadd.f32 1.0, %v4125_v31 }
 0x3a0   :  { %4136 = vrcp.f32 %v3374_v21  ;;  %v4129_v30 = vpop.eup %4128  ;;  %v3379_v34 = vadd.f32 1.0, %v4127_v45  ;;  %v3453_v5 = vsel %vm3452_vm1, %v3451_v47, %v3446_v28  ;;  %v3527_v47 = vsub.s32 %v3524_v32, %v4431_v36 }
 0x3a1   :  { %v3769_v63 = vmul.f32 -1.442695, %v3320_v62  ;;  %v4131_v0 = vpop.eup %4130  ;;  %v3380_v41 = vadd.f32 1.0, %v4129_v30  ;;  %v3534_v28 = vsub.s32 %v3531_v42, %v4431_v36 }
 0x3a2   :  { %v3295_v53 = vpop.xlane.xlu0 %3294  ;;  %v3458_v2 = vrot.slane %v4131_v0, %v3457_v58 }
 0x3a3   :  { %v3321_v35 = vadd.f32 %v4852_v19, %v3295_v53  ;;  %4138 = vpow2.f32 %v3769_v63 }
 0x3a4   :  { %v3460_v40 = vsel %vm3459_vm2, %v3458_v2, %v3453_v5 }
 0x3a5   :  { %v3770_v23 = vmul.f32 -1.442695, %v3321_v35  ;;  %v4133_v3 = vpop.eup %4132  ;;  %v3503_v35 = vadd.s32 4294967216, %v4866_v51 }
 0x3a6   :  { %v3382_v37 = vadd.f32 1.0, %v4133_v3 }
 0x3a7   :  { %4140 = vpow2.f32 %v3770_v23  ;;  %v3506_v43 = vsub.s32 %v3503_v35, %v4431_v36 }
 0x3a8   :  { %4142 = vrcp.f32 %v3375_v4  ;;  %v3517_v4 = vadd.s32 4294967200, %v4866_v51 }
 0x3a9   :  { %v4135_v13 = vpop.eup %4134 }
 0x3aa   :  { %v4137_v24 = vpop.eup %4136  ;;  %v3383_v61 = vadd.f32 1.0, %v4135_v13  ;;  %v3520_v45 = vsub.s32 %v3517_v4, %v4431_v36 }
 0x3ad   :  { %v3283_v59 = vpop.xlane.xlu1 %3282  ;;  %v4139_v48 = vpop.eup %4138 }
 0x3ae   :  { %v3317_v25 = vadd.f32 %v4852_v19, %v3283_v59  ;;  %v3461_v19 = vadd.s32 4294967264, %v4866_v51  ;;  %v3384_v10 = vadd.f32 1.0, %v4139_v48  ;;  %v3541_v51 = vsub.s32 %v3538_v44, %v4431_v36 }
 0x3b0   :  { %v3766_v29 = vmul.f32 -1.442695, %v3317_v25  ;;  %v3464_v20 = vsub.s32 %v3461_v19, %v4431_v36 }
 0x3b1   :  { %v4141_v9 = vpop.eup %4140 }
 0x3b2   :  { %4144 = vpow2.f32 %v3766_v29  ;;  %v4143_v50 = vpop.eup %4142  ;;  %v3465_v27 = vrot.slane %v4137_v24, %v3464_v20  ;;  %v3385_v46 = vadd.f32 1.0, %v4141_v9 }
 0x3b3   :  { %4146 = vrcp.f32 %v3376_v16  ;;  %v3472_v11 = vrot.slane %v4143_v50, %v3471_v6 }
 0x3b4   :  { %4148 = vrcp.f32 %v3377_v8  ;;  %v3467_v53 = vsel %vm3466_vm3, %v3465_v27, %v3460_v40 }
 0x3b5   :  { %4150 = vrcp.f32 %v3378_v55  ;;  %v3474_v57 = vsel %vm3473_vm4, %v3472_v11, %v3467_v53 }
 0x3b6   :  { %4152 = vrcp.f32 %v3379_v34 }
 0x3b7   :  { %4154 = vrcp.f32 %v3380_v41 }
 0x3b8   :  { %4156 = vrcp.f32 %v3382_v37 }
 0x3b9   :  { %4158 = vrcp.f32 %v3383_v61 }
 0x3bc   :  { %v4145_v14 = vpop.eup %4144 }
 0x3bd   :  { %v3381_v60 = vadd.f32 1.0, %v4145_v14  ;;  %v4147_v62 = vpop.eup %4146 }
 0x3be   :  { %v4149_v21 = vpop.eup %4148  ;;  %v3479_v56 = vrot.slane %v4147_v62, %v3478_v1 }
 0x3bf   :  { %4160 = vrcp.f32 %v3381_v60  ;;  %v4151_v63 = vpop.eup %4150  ;;  %v3486_v25 = vrot.slane %v4149_v21, %v3485_v52 }
 0x3c0   :  { %4162 = vrcp.f32 %v3384_v10  ;;  %v4153_v54 = vpop.eup %4152  ;;  %v3481_v23 = vsel %vm3480_vm5, %v3479_v56, %v3474_v57  ;;  %v3493_v18 = vrot.slane %v4151_v63, %v3492_v22 }
 0x3c1   :  { %4164 = vrcp.f32 %v3385_v46  ;;  %v4155_v59 = vpop.eup %4154  ;;  %v3488_v16 = vsel %vm3487_vm6, %v3486_v25, %v3481_v23  ;;  %v3500_v7 = vrot.slane %v4153_v54, %v3499_v15 }
 0x3c2   :  { %v4157_v29 = vpop.eup %4156  ;;  %v3507_v31 = vrot.slane %v4155_v59, %v3506_v43  ;;  %v3495_v8 = vsel %vm3494_vm7, %v3493_v18, %v3488_v16 }
 0x3c3   :  { %v4159_v30 = vpop.eup %4158  ;;  %v3502_v0 = vsel %vm3501_vm8, %v3500_v7, %v3495_v8  ;;  %v3521_v3 = vrot.slane %v4157_v29, %v3520_v45 }
 0x3c4   :  { %v3509_v34 = vsel %vm3508_vm9, %v3507_v31, %v3502_v0  ;;  %v3528_v41 = vrot.slane %v4159_v30, %v3527_v47 }
 0x3c9   :  { %v4161_v19 = vpop.eup %4160 }
 0x3ca   :  { %v4163_v58 = vpop.eup %4162  ;;  %v3514_v55 = vrot.slane %v4161_v19, %v3513_v26 }
 0x3cb   :  { %v4165_v33 = vpop.eup %4164  ;;  %v3535_v5 = vrot.slane %v4163_v58, %v3534_v28 }
 0x3cc   :  { %v3516_v39 = vsel %vm3515_vm10, %v3514_v55, %v3509_v34  ;;  %v3542_v24 = vrot.slane %v4165_v33, %v3541_v51 }
 0x3cd   :  { %v3523_v13 = vsel %vm3522_vm11, %v3521_v3, %v3516_v39 }
 0x3ce   :  { %v3530_v20 = vsel %vm3529_vm12, %v3528_v41, %v3523_v13 }
 0x3cf   :  { %v3537_v2 = vsel %vm3536_vm13, %v3535_v5, %v3530_v20 }
 0x3d0   :  { %v3544_v48 = vsel %vm3543_vm14, %v3542_v24, %v3537_v2 }
 0x3d1   :  { %3546 = vst [vmem:[#allocation10] sm:$0x1] %v3544_v48 }
 0x3d2   :  { %4243 = shalt.err (!%p4240_p0)
}
 0x3d3   :  { %s4244_s24 = scalar_lea.hbm %s4924_s7, 16 }
 0x3d4   :  { %p4245_p1 = scmp.ne.s32.totalorder %s4924_s7, %s4244_s24  ;;  %p4248_p2 = scmp.lt.u32.totalorder %s4244_s24, %s4924_s7 }
 0x3d6   :  { %p4250_p3 = pnand %p4248_p2, %p4245_p1 }
 0x3d8   :  { %4253 = shalt.err (!%p4250_p3)
}
 0x3d9   :  { %3556 = dma.vmem_to_hbm [thread:$0]  %s3554_s19, 16, %s4924_s7, [#allocation6]  }
 0x3da   :  { %4258 = dma.done.wait [#allocation6], 16  }
 0x3db   :  { %4259 = vsyncadd [#allocation6], 4294967280 }
 0x3dc   :  { %3560 = vsyncpa [#allocation5], 1 }
 0x3dd   :  { %3561 = vsyncpa [#allocation8], 1 }
 0x3de   :  { %3562 = vsyncpa [#allocation6], 1 }

// kernel: tpu_custom_call.1
= control target key start
LH: loop header
LB: loop body
LE: loop exit
PB: predicated region body
PF: predicated region fallthrough
CT: control target
= control target key end

     0   :  { %s4917_s0 = inlined_call_operand.hbm [shape: f32[128,128], index: 0, kind: input, shape index: {}]   ;;  %s4918_s1 = inlined_call_operand.hbm [shape: bf16[128,1024], index: 1, kind: input, shape index: {}]   ;;  %s4919_s2 = inlined_call_operand.vmem [shape: f32[1,1024], index: 2, kind: input, shape index: {}]   ;;  %s4920_s3 = inlined_call_operand.hbm [shape: bf16[1024,256], index: 3, kind: input, shape index: {}]   ;;  %s4921_s4 = inlined_call_operand.vmem [shape: f32[1,256], index: 4, kind: input, shape index: {}]   ;;  %s4922_s5 = inlined_call_operand.vmem [shape: f32[1,1,256], index: 5, kind: input, shape index: {}]   ;;  %s4923_s6 = inlined_call_operand.<no memory space> [shape: f32[1,1], index: 6, kind: input, shape index: {}]   ;;  %s4924_s7 = inlined_call_operand.hbm [shape: f32[1,1,128], index: 7, kind: output, shape index: {}]  }
   0x1   :  { %v12_v0 = vstv %s4923_s6 }
   0x2   :  { %13 = vst [vmem:[#allocation3] sm:$0x1] %v12_v0 }
   0x3   :  { %14 = vsyncpa [#allocation5], 0 }
   0x4   :  { %15 = vsyncpa [#allocation8], 0 }
   0x5   :  { %16 = vsyncpa [#allocation6], 0  ;;  %s4260_s26 = smov [#allocation7]   ;;  %s4166_s30 = scalar_lea.hbm %s4918_s1, 8192 }
   0x6   :  { %s34_s27 = sshll.u32 %s4260_s26, 4  ;;  %p4167_p0 = scmp.ne.s32.totalorder %s4918_s1, %s4166_s30  ;;  %s35_s27 = int_to_ptr.vmem [resolvable:$true] %s34_s27 }
   0x7   :  { %p4170_p1 = scmp.lt.u32.totalorder %s4166_s30, %s4918_s1 }
   0x9   :  { %p4172_p2 = pnand %p4170_p1, %p4167_p0 }
   0xb   :  { %4175 = shalt.err (!%p4172_p2)
}
   0xc   :  { %s4176_s6 = scalar_lea.vmem %s35_s27, 8192  ;;  %p4181_p4 = scmp.lt.s32.totalorder %s35_s27, %s35_s27 }
   0xd   :  { %p4177_p3 = scmp.ne.s32.totalorder %s35_s27, %s4176_s6  ;;  %p4182_p5 = scmp.lt.s32.totalorder %s4176_s6, %s4176_s6 }
   0xf   :  { %p4183_p6 = por %p4182_p5, %p4181_p4 }
  0x11   :  { %p4184_p7 = pnand %p4183_p6, %p4177_p3 }
  0x13   :  { %4187 = shalt.err (!%p4184_p7)
}
  0x14   :  { %s4261_s12 = smov 512   ;;  %s4262_s13 = smov 32  }
  0x15   :  { %40 = dma.hbm_to_vmem [thread:$0]  %s4918_s1, 8192, %s35_s27, [#allocation8], %s4261_s12, %s4261_s12, %s4262_s13  }
  0x16   :  { %s4263_s16 = smov [#allocation4]   ;;  %s4188_s20 = scalar_lea.hbm %s4917_s0, 2048 }
  0x17   :  { %s22_s17 = sshll.u32 %s4263_s16, 4  ;;  %p4189_p8 = scmp.ne.s32.totalorder %s4917_s0, %s4188_s20  ;;  %s23_s17 = int_to_ptr.vmem [resolvable:$true] %s22_s17 }
  0x18   :  { %p4192_p9 = scmp.lt.u32.totalorder %s4188_s20, %s4917_s0 }
  0x1a   :  { %p4194_p10 = pnand %p4192_p9, %p4189_p8 }
  0x1c   :  { %4197 = shalt.err (!%p4194_p10)
}
  0x1d   :  { %s4198_s25 = scalar_lea.vmem %s23_s17, 2048  ;;  %p4203_p12 = scmp.lt.s32.totalorder %s23_s17, %s23_s17 }
  0x1e   :  { %p4199_p11 = scmp.ne.s32.totalorder %s23_s17, %s4198_s25  ;;  %p4204_p13 = scmp.lt.s32.totalorder %s4198_s25, %s4198_s25 }
  0x20   :  { %p4205_p0 = por %p4204_p13, %p4203_p12 }
  0x22   :  { %p4206_p1 = pnand %p4205_p0, %p4199_p11 }
  0x24   :  { %4209 = shalt.err (!%p4206_p1)
}
  0x25   :  { %s4264_s1 = smov 128   ;;  %s4265_s26 = smov 8  }
  0x26   :  { %28 = dma.hbm_to_vmem [thread:$0]  %s4917_s0, 2048, %s23_s17, [#allocation5], %s4264_s1, %s4264_s1, %s4265_s26  }
  0x27   :  { %s4266_s29 = smov [#allocation9]   ;;  %s4210_s10 = scalar_lea.hbm %s4920_s3, 16384 }
  0x28   :  { %s48_s30 = sshll.u32 %s4266_s29, 4  ;;  %p4211_p2 = scmp.ne.s32.totalorder %s4920_s3, %s4210_s10  ;;  %s49_s30 = int_to_ptr.vmem [resolvable:$true] %s48_s30 }
  0x29   :  { %p4214_p3 = scmp.lt.u32.totalorder %s4210_s10, %s4920_s3 }
  0x2b   :  { %p4216_p4 = pnand %p4214_p3, %p4211_p2 }
  0x2d   :  { %4219 = shalt.err (!%p4216_p4)
}
  0x2e   :  { %s4220_s14 = scalar_lea.vmem %s49_s30, 16384  ;;  %p4225_p6 = scmp.lt.s32.totalorder %s49_s30, %s49_s30 }
  0x2f   :  { %p4221_p5 = scmp.ne.s32.totalorder %s49_s30, %s4220_s14  ;;  %p4226_p7 = scmp.lt.s32.totalorder %s4220_s14, %s4220_s14 }
  0x31   :  { %p4227_p8 = por %p4226_p7, %p4225_p6 }
  0x33   :  { %p4228_p9 = pnand %p4227_p8, %p4221_p5 }
  0x35   :  { %4231 = shalt.err (!%p4228_p9)
}
  0x36   :  { %54 = dma.hbm_to_vmem [thread:$0]  %s4920_s3, 16384, %s49_s30, [#allocation8], %s4264_s1, %s4264_s1, %s4265_s26  }
  0x37   :  { %4254 = dma.done.wait [#allocation5], 2048  }
  0x38   :  { %4255 = vsyncadd [#allocation5], 4294965248 }
  0x39   :  { %4256 = dma.done.wait [#allocation8], 24576  }
  0x3a   :  { %4257 = vsyncadd [#allocation8], 4294942720  ;;  %v4267_v1 = vmov 0   ;;  %v355_v2 = vld [vmem:[#allocation7] sm:$0xff]  ;;  %v357_v24 = vld [vmem:[#allocation7 + $0x10] sm:$0xff]  ;;  %vm3445_vm0 = vcmask 130112  }
  0x3b   :  { %771 = vmatprep.mubr.bf16.mxu1 %v4267_v1  ;;  %997 = vmatprep.mubr.bf16.mxu0 %v4267_v1  ;;  %v359_v3 = vld [vmem:[#allocation7 + $0x20] sm:$0xff]  ;;  %v361_v25 = vld [vmem:[#allocation7 + $0x30] sm:$0xff]  ;;  %v356_v45 = vld [vmem:[#allocation7 + $0x8] sm:$0xff]  ;;  %vm3452_vm1 = vcmask 195712   ;;  %vm3459_vm2 = vcmask 261312   ;;  %vm3466_vm3 = vcmask 326912  }
  0x3c   :  { %3908 = vset.pattern.permute.xlu1 %v4267_v1  ;;  %3909 = vset.pattern.permute.xlu0 %v4267_v1  ;;  %v363_v4 = vld [vmem:[#allocation7 + $0x40] sm:$0xff]  ;;  %v3564_v5 = vcombine.high %v355_v2, %v359_v3  ;;  %v3563_v6 = vcombine.low %v355_v2, %v359_v3  ;;  %v365_v26 = vld [vmem:[#allocation7 + $0x50] sm:$0xff]  ;;  %v3568_v29 = vcombine.high %v357_v24, %v361_v25  ;;  %v360_v46 = vld [vmem:[#allocation7 + $0x28] sm:$0xff]  ;;  %vm3473_vm4 = vcmask 392512  }
  0x3d   :  { %v367_v7 = vld [vmem:[#allocation7 + $0x60] sm:$0xff]  ;;  %v3567_v30 = vcombine.low %v357_v24, %v361_v25  ;;  %v369_v31 = vld [vmem:[#allocation7 + $0x70] sm:$0xff]  ;;  %v332_v54 = vld [vmem:[#allocation4 + $0x8] sm:$0xff]  ;;  %v3566_v56 = vcombine.high %v356_v45, %v360_v46  ;;  %v3565_v63 = vcombine.low %v356_v45, %v360_v46  ;;  %vm3480_vm5 = vcmask 458112  }
  0x3e   :  { %v3572_v8 = vcombine.high %v363_v4, %v367_v7  ;;  %v371_v9 = vld [vmem:[#allocation7 + $0x80] sm:$0xff]  ;;  %739 = vmatprep.subr.bf16.mxu1 %v3564_v5  ;;  %v3571_v11 = vcombine.low %v363_v4, %v367_v7  ;;  %v3576_v33 = vcombine.high %v365_v26, %v369_v31  ;;  %v373_v34 = vld [vmem:[#allocation7 + $0x90] sm:$0xff]  ;;  %965 = vmatprep.subr.bf16.mxu0 %v3568_v29  ;;  %v364_v58 = vld [vmem:[#allocation7 + $0x48] sm:$0xff]  ;;  %vm3487_vm6 = vcmask 523712  }
  0x3f   :  { %v375_v10 = vld [vmem:[#allocation7 + $0xa0] sm:$0xff]  ;;  %740 = vmatpush1.bf16.msra.mxu1 %v3563_v6  ;;  %v377_v35 = vld [vmem:[#allocation7 + $0xb0] sm:$0xff]  ;;  %966 = vmatpush1.bf16.msra.mxu0 %v3567_v30  ;;  %v3575_v39 = vcombine.low %v365_v26, %v369_v31  ;;  %v368_v59 = vld [vmem:[#allocation7 + $0x68] sm:$0xff]  ;;  %vm3494_vm7 = vcmask 589312   ;;  %vm3501_vm8 = vcmask 654912   ;;  %vm3508_vm9 = vcmask 720512  }
  0x40   :  { %741 = vmatprep.subr.bf16.mxu1 %v3572_v8  ;;  %v3580_v12 = vcombine.high %v371_v9, %v375_v10  ;;  %v379_v13 = vld [vmem:[#allocation7 + $0xc0] sm:$0xff]  ;;  %v3579_v15 = vcombine.low %v371_v9, %v375_v10  ;;  %v381_v40 = vld [vmem:[#allocation7 + $0xd0] sm:$0xff]  ;;  %967 = vmatprep.subr.bf16.mxu0 %v3576_v33  ;;  %v3584_v43 = vcombine.high %v373_v34, %v377_v35  ;;  %v372_v0 = vld [vmem:[#allocation7 + $0x88] sm:$0xff]  ;;  %vm3515_vm10 = vcmask 786112  }
  0x41   :  { %v383_v14 = vld [vmem:[#allocation7 + $0xe0] sm:$0xff]  ;;  %v385_v41 = vld [vmem:[#allocation7 + $0xf0] sm:$0xff]  ;;  %v3583_v47 = vcombine.low %v373_v34, %v377_v35  ;;  %v376_v2 = vld [vmem:[#allocation7 + $0xa8] sm:$0xff]  ;;  %v3574_v3 = vcombine.high %v364_v58, %v368_v59  ;;  %v3573_v10 = vcombine.low %v364_v58, %v368_v59  ;;  %vm3522_vm11 = vcmask 851712  }
  0x42   :  { %v3588_v16 = vcombine.high %v379_v13, %v383_v14  ;;  %v387_v17 = vld [vmem:[#allocation7 + $0x100] sm:$0xff]  ;;  %v3587_v19 = vcombine.low %v379_v13, %v383_v14  ;;  %v3592_v49 = vcombine.high %v381_v40, %v385_v41  ;;  %v389_v50 = vld [vmem:[#allocation7 + $0x110] sm:$0xff]  ;;  %v3591_v55 = vcombine.low %v381_v40, %v385_v41  ;;  %v334_v6 = vld [vmem:[#allocation4 + $0x18] sm:$0xff] }
  0x43   :  { %742 = vmatpush1.bf16.msra.mxu1 %v3571_v11  ;;  %v391_v18 = vld [vmem:[#allocation7 + $0x120] sm:$0xff]  ;;  %968 = vmatpush1.bf16.msra.mxu0 %v3575_v39  ;;  %v393_v51 = vld [vmem:[#allocation7 + $0x130] sm:$0xff]  ;;  %v380_v11 = vld [vmem:[#allocation7 + $0xc8] sm:$0xff]  ;;  %v3582_v13 = vcombine.high %v372_v0, %v376_v2  ;;  %vm3529_vm12 = vcmask 917312   ;;  %vm3536_vm13 = vcmask 982912   ;;  %vm3543_vm14 = vcmask 1048512  }
  0x44   :  { %743 = vmatprep.subr.bf16.mxu1 %v3580_v12  ;;  %v3596_v20 = vcombine.high %v387_v17, %v391_v18  ;;  %v395_v21 = vld [vmem:[#allocation7 + $0x140] sm:$0xff]  ;;  %v3595_v23 = vcombine.low %v387_v17, %v391_v18  ;;  %969 = vmatprep.subr.bf16.mxu0 %v3584_v43  ;;  %v3600_v57 = vcombine.high %v389_v50, %v393_v51  ;;  %v397_v61 = vld [vmem:[#allocation7 + $0x150] sm:$0xff]  ;;  %v384_v12 = vld [vmem:[#allocation7 + $0xe8] sm:$0xff] }
  0x45   :  { %v399_v22 = vld [vmem:[#allocation7 + $0x160] sm:$0xff]  ;;  %v401_v62 = vld [vmem:[#allocation7 + $0x170] sm:$0xff]  ;;  %v3599_v4 = vcombine.low %v389_v50, %v393_v51  ;;  %v336_v26 = vld [vmem:[#allocation4 + $0x28] sm:$0xff] }
  0x46   :  { %v3604_v27 = vcombine.high %v395_v21, %v399_v22  ;;  %v403_v28 = vld [vmem:[#allocation7 + $0x180] sm:$0xff]  ;;  %v3603_v36 = vcombine.low %v395_v21, %v399_v22  ;;  %v333_v5 = vld [vmem:[#allocation4 + $0x10] sm:$0xff]  ;;  %v3608_v7 = vcombine.high %v397_v61, %v401_v62  ;;  %v3607_v14 = vcombine.low %v397_v61, %v401_v62  ;;  %v392_v21 = vld [vmem:[#allocation7 + $0x128] sm:$0xff] }
  0x47   :  { %744 = vmatpush1.bf16.msra.mxu1 %v3579_v15  ;;  %v407_v32 = vld [vmem:[#allocation7 + $0x1a0] sm:$0xff]  ;;  %970 = vmatpush1.bf16.msra.mxu0 %v3583_v47  ;;  %v405_v8 = vld [vmem:[#allocation7 + $0x190] sm:$0xff]  ;;  %v4356_v18 = vpack.c.bf16 %v334_v6, %v333_v5  ;;  %v3590_v22 = vcombine.high %v380_v11, %v384_v12  ;;  %v400_v29 = vld [vmem:[#allocation7 + $0x168] sm:$0xff] }
  0x48   :  { %745 = vmatprep.subr.bf16.mxu1 %v3588_v16  ;;  %v411_v37 = vld [vmem:[#allocation7 + $0x1c0] sm:$0xff]  ;;  %v3612_v42 = vcombine.high %v403_v28, %v407_v32  ;;  %v3611_v44 = vcombine.low %v403_v28, %v407_v32  ;;  %971 = vmatprep.subr.bf16.mxu0 %v3592_v49  ;;  %v409_v9 = vld [vmem:[#allocation7 + $0x1b0] sm:$0xff]  ;;  %v396_v28 = vld [vmem:[#allocation7 + $0x148] sm:$0xff] }
  0x49   :  { %v415_v38 = vld [vmem:[#allocation7 + $0x1e0] sm:$0xff]  ;;  %v413_v15 = vld [vmem:[#allocation7 + $0x1d0] sm:$0xff]  ;;  %v3616_v17 = vcombine.high %v405_v8, %v409_v9  ;;  %v404_v34 = vld [vmem:[#allocation7 + $0x188] sm:$0xff]  ;;  %v3605_v39 = vcombine.low %v396_v28, %v400_v29 }
  0x4a   :  { %v3620_v48 = vcombine.high %v411_v37, %v415_v38  ;;  %v3619_v52 = vcombine.low %v411_v37, %v415_v38  ;;  %v331_v53 = vld [vmem:[#allocation4] sm:$0xff]  ;;  %v417_v16 = vld [vmem:[#allocation7 + $0x1f0] sm:$0xff]  ;;  %v408_v35 = vld [vmem:[#allocation7 + $0x1a8] sm:$0xff] }
  0x4b   :  { %746 = vmatpush1.bf16.msra.mxu1 %v3587_v19  ;;  %v4352_v60 = vpack.c.bf16 %v332_v54, %v331_v53  ;;  %972 = vmatpush1.bf16.msra.mxu0 %v3591_v55  ;;  %v3581_v19 = vcombine.low %v372_v0, %v376_v2  ;;  %v3624_v24 = vcombine.high %v413_v15, %v417_v16  ;;  %v335_v25 = vld [vmem:[#allocation4 + $0x20] sm:$0xff]  ;;  %v337_v37 = vld [vmem:[#allocation4 + $0x30] sm:$0xff]  ;;  %v338_v38 = vld [vmem:[#allocation4 + $0x38] sm:$0xff] }
  0x4c   :  { %747 = vmatprep.subr.bf16.mxu1 %v3596_v20  ;;  %973 = vmatprep.subr.bf16.mxu0 %v3600_v57  ;;  %v388_v20 = vld [vmem:[#allocation7 + $0x108] sm:$0xff]  ;;  %v3623_v31 = vcombine.low %v413_v15, %v417_v16  ;;  %v4360_v32 = vpack.c.bf16 %v336_v26, %v335_v25  ;;  %v4366_v43 = vpack.c.bf16 %v338_v38, %v337_v37  ;;  %v358_v45 = vld [vmem:[#allocation7 + $0x18] sm:$0xff]  ;;  %v341_v53 = vld [vmem:[#allocation4 + $0x50] sm:$0xff] }
  0x4d   :  { %v3598_v30 = vcombine.high %v388_v20, %v392_v21  ;;  %v3597_v33 = vcombine.low %v388_v20, %v392_v21  ;;  %v412_v40 = vld [vmem:[#allocation7 + $0x1c8] sm:$0xff]  ;;  %v362_v46 = vld [vmem:[#allocation7 + $0x38] sm:$0xff]  ;;  %v345_v59 = vld [vmem:[#allocation4 + $0x70] sm:$0xff] }
  0x4e   :  { %v416_v41 = vld [vmem:[#allocation7 + $0x1e8] sm:$0xff]  ;;  %v3570_v51 = vcombine.high %v358_v45, %v362_v46  ;;  %v342_v54 = vld [vmem:[#allocation4 + $0x58] sm:$0xff]  ;;  %v3569_v2 = vcombine.low %v358_v45, %v362_v46 }
  0x4f   :  { %748 = vmatpush1.bf16.msra.mxu1 %v3595_v23  ;;  %974 = vmatpush1.bf16.msra.mxu0 %v3599_v4  ;;  %v3615_v23 = vcombine.low %v405_v8, %v409_v9  ;;  %v3622_v47 = vcombine.high %v412_v40, %v416_v41  ;;  %v340_v49 = vld [vmem:[#allocation4 + $0x48] sm:$0xff]  ;;  %v3621_v50 = vcombine.low %v412_v40, %v416_v41  ;;  %v346_v61 = vld [vmem:[#allocation4 + $0x78] sm:$0xff] }
  0x50   :  { %749 = vmatprep.subr.bf16.mxu1 %v3604_v27  ;;  %975 = vmatprep.subr.bf16.mxu0 %v3608_v7  ;;  %v3589_v27 = vcombine.low %v380_v11, %v384_v12  ;;  %v4378_v55 = vpack.c.bf16 %v342_v54, %v341_v53  ;;  %v344_v57 = vld [vmem:[#allocation4 + $0x68] sm:$0xff]  ;;  %v4390_v62 = vpack.c.bf16 %v346_v61, %v345_v59  ;;  %v370_v0 = vld [vmem:[#allocation7 + $0x78] sm:$0xff] }
  0x51   :  { %v374_v4 = vld [vmem:[#allocation7 + $0x98] sm:$0xff]  ;;  %v3964_v37 = vld [vmem:[#allocation9 + $0x120] ss:$8 sps:$4 sm:$0xff]   ;;  %v3972_v40 = vld [vmem:[#allocation9 + $0x144] ss:$8 sps:$4 sm:$0xff]  }
  0x52   :  { %v378_v5 = vld [vmem:[#allocation7 + $0xb8] sm:$0xff]  ;;  %v3970_v41 = vld [vmem:[#allocation9 + $0x140] ss:$8 sps:$4 sm:$0xff]   ;;  %v3978_v45 = vld [vmem:[#allocation9 + $0x164] ss:$8 sps:$4 sm:$0xff]  }
  0x53   :  { %750 = vmatpush1.bf16.msra.mxu1 %v3603_v36  ;;  %976 = vmatpush1.bf16.msra.mxu0 %v3607_v14  ;;  %v3606_v36 = vcombine.high %v396_v28, %v400_v29  ;;  %v3586_v7 = vcombine.high %v374_v4, %v378_v5  ;;  %v382_v8 = vld [vmem:[#allocation7 + $0xd8] sm:$0xff]  ;;  %v3976_v46 = vld [vmem:[#allocation9 + $0x160] ss:$8 sps:$4 sm:$0xff]   ;;  %v3918_v59 = vld [vmem:[#allocation9 + $0x24] ss:$8 sps:$4 sm:$0xff]  }
  0x54   :  { %751 = vmatprep.subr.bf16.mxu1 %v3612_v42  ;;  %977 = vmatprep.subr.bf16.mxu0 %v3616_v17  ;;  %v3614_v42 = vcombine.high %v404_v34, %v408_v35  ;;  %v386_v9 = vld [vmem:[#allocation7 + $0xf8] sm:$0xff]  ;;  %v3990_v61 = vld [vmem:[#allocation9 + $0x1a4] ss:$8 sps:$4 sm:$0xff]  }
  0x55   :  { %v3594_v11 = vcombine.high %v382_v8, %v386_v9  ;;  %v390_v12 = vld [vmem:[#allocation7 + $0x118] sm:$0xff]  ;;  %v3593_v14 = vcombine.low %v382_v8, %v386_v9  ;;  %v3994_v8 = vld [vmem:[#allocation9 + $0x1c0] ss:$8 sps:$4 sm:$0xff]  }
  0x56   :  { %v398_v16 = vld [vmem:[#allocation7 + $0x158] sm:$0xff] }
  0x57   :  { %752 = vmatpush1.bf16.msra.mxu1 %v3611_v44  ;;  %978 = vmatpush1.bf16.msra.mxu0 %v3615_v23  ;;  %v3613_v44 = vcombine.low %v404_v34, %v408_v35  ;;  %v402_v17 = vld [vmem:[#allocation7 + $0x178] sm:$0xff] }
  0x58   :  { %753 = vmatprep.subr.bf16.mxu1 %v3620_v48  ;;  %979 = vmatprep.subr.bf16.mxu0 %v3624_v24  ;;  %v339_v48 = vld [vmem:[#allocation4 + $0x40] sm:$0xff]  ;;  %v3610_v20 = vcombine.high %v398_v16, %v402_v17  ;;  %v406_v21 = vld [vmem:[#allocation7 + $0x198] sm:$0xff]  ;;  %v3609_v23 = vcombine.low %v398_v16, %v402_v17 }
  0x59   :  { %v414_v25 = vld [vmem:[#allocation7 + $0x1d8] sm:$0xff] }
  0x5a   :  { %v418_v26 = vld [vmem:[#allocation7 + $0x1f8] sm:$0xff] }
  0x5b   :  { %754 = vmatpush1.bf16.msra.mxu1 %v3619_v52  ;;  %980 = vmatpush1.bf16.msra.mxu0 %v3623_v31  ;;  %v4372_v52 = vpack.c.bf16 %v340_v49, %v339_v48  ;;  %v3626_v28 = vcombine.high %v414_v25, %v418_v26  ;;  %v3625_v29 = vcombine.low %v414_v25, %v418_v26  ;;  %v3960_v31 = vld [vmem:[#allocation9 + $0x104] ss:$8 sps:$4 sm:$0xff]   ;;  %v3963_v34 = vld [vmem:[#allocation9 + $0x114] ss:$8 sps:$4 sm:$0xff]   ;;  %v3961_v35 = vld [vmem:[#allocation9 + $0x110] ss:$8 sps:$4 sm:$0xff]  }
  0x5c   :  { %852 = vmatprep.subr.bf16.mxu1 %v3566_v56  ;;  %v343_v56 = vld [vmem:[#allocation4 + $0x60] sm:$0xff]  ;;  %2833 = vmatprep.subr.bf16.mxu0 %v3960_v31  ;;  %v3969_v38 = vld [vmem:[#allocation9 + $0x134] ss:$8 sps:$4 sm:$0xff]   ;;  %v3979_v48 = vld [vmem:[#allocation9 + $0x170] ss:$8 sps:$4 sm:$0xff]  }
  0x5d   :  { %v4384_v58 = vpack.c.bf16 %v344_v57, %v343_v56  ;;  %v3984_v49 = vld [vmem:[#allocation9 + $0x184] ss:$8 sps:$4 sm:$0xff]   ;;  %v3915_v53 = vld [vmem:[#allocation9 + $0x14] ss:$8 sps:$4 sm:$0xff]   ;;  %v3913_v56 = vld [vmem:[#allocation9 + $0x10] ss:$8 sps:$4 sm:$0xff]  }
  0x5e   :  { %772 = vmatmul.mubr.bf16.vlgmr.msra.gmra.mrb[0].mxu1 %v4352_v60  ;;  %998 = vmatmul.mubr.bf16.vlgmr.msra.gmra.mrb[0].mxu0 %v4352_v60  ;;  %v3987_v54 = vld [vmem:[#allocation9 + $0x194] ss:$8 sps:$4 sm:$0xff]   ;;  %v3985_v57 = vld [vmem:[#allocation9 + $0x190] ss:$8 sps:$4 sm:$0xff]   ;;  %v3940_v25 = vld [vmem:[#allocation9 + $0xa0] ss:$8 sps:$4 sm:$0xff]  }
  0x5f   :  { %853 = vmatpush1.bf16.msra.mxu1 %v3565_v63  ;;  %781 = vmatprep.mubr.bf16.mxu1 %v4267_v1  ;;  %v366_v63 = vld [vmem:[#allocation7 + $0x58] sm:$0xff]  ;;  %v3954_v31 = vld [vmem:[#allocation9 + $0xe4] ss:$8 sps:$4 sm:$0xff]  }
  0x60   :  { %854 = vmatprep.subr.bf16.mxu1 %v3574_v3  ;;  %1007 = vmatprep.mubr.bf16.mxu0 %v4267_v1  ;;  %v3578_v3 = vcombine.high %v366_v63, %v370_v0  ;;  %v3577_v6 = vcombine.low %v366_v63, %v370_v0  ;;  %v3916_v63 = vld [vmem:[#allocation9 + $0x20] ss:$8 sps:$4 sm:$0xff]   ;;  %v3927_v9 = vld [vmem:[#allocation9 + $0x54] ss:$8 sps:$4 sm:$0xff]   ;;  %v3931_v17 = vld [vmem:[#allocation9 + $0x70] ss:$8 sps:$4 sm:$0xff]  }
  0x61   :  { %v3988_v0 = vld [vmem:[#allocation9 + $0x1a0] ss:$8 sps:$4 sm:$0xff]   ;;  %v3933_v16 = vld [vmem:[#allocation9 + $0x74] ss:$8 sps:$4 sm:$0xff]  }
  0x62   :  { %v3945_v26 = vld [vmem:[#allocation9 + $0xb4] ss:$8 sps:$4 sm:$0xff]  }
  0x63   :  { %855 = vmatpush1.bf16.msra.mxu1 %v3573_v10  ;;  %v3585_v10 = vcombine.low %v374_v4, %v378_v5  ;;  %v3991_v4 = vld [vmem:[#allocation9 + $0x1b0] ss:$8 sps:$4 sm:$0xff]   ;;  %v3924_v5 = vld [vmem:[#allocation9 + $0x44] ss:$8 sps:$4 sm:$0xff]  }
  0x64   :  { %856 = vmatprep.subr.bf16.mxu1 %v3582_v13  ;;  %v394_v13 = vld [vmem:[#allocation7 + $0x138] sm:$0xff] }
  0x65   :  { %v3602_v15 = vcombine.high %v390_v12, %v394_v13 }
  0x66   :  { %782 = vmatmul.mubr.bf16.gmra.mrb[4].mxu1 %v4356_v18  ;;  %1008 = vmatmul.mubr.bf16.gmra.mrb[4].mxu0 %v4356_v18 }
  0x67   :  { %791 = vmatprep.mubr.bf16.mxu1 %v4267_v1  ;;  %857 = vmatpush1.bf16.msra.mxu1 %v3581_v19  ;;  %v3601_v19 = vcombine.low %v390_v12, %v394_v13  ;;  %v3930_v12 = vld [vmem:[#allocation9 + $0x64] ss:$8 sps:$4 sm:$0xff]  }
  0x68   :  { %858 = vmatprep.subr.bf16.mxu1 %v3590_v22  ;;  %1017 = vmatprep.mubr.bf16.mxu0 %v4267_v1  ;;  %v410_v22 = vld [vmem:[#allocation7 + $0x1b8] sm:$0xff]  ;;  %v4002_v13 = vld [vmem:[#allocation9 + $0x1e4] ss:$8 sps:$4 sm:$0xff]  }
  0x69   :  { %v3618_v24 = vcombine.high %v406_v21, %v410_v22 }
  0x6b   :  { %859 = vmatpush1.bf16.msra.mxu1 %v3589_v27  ;;  %v3617_v27 = vcombine.low %v406_v21, %v410_v22  ;;  %v4008_v21 = vld [vmem:[#allocation9 + $0x204] ss:$8 sps:$4 sm:$0xff]   ;;  %v3934_v22 = vld [vmem:[#allocation9 + $0x80] ss:$8 sps:$4 sm:$0xff]  }
  0x6c   :  { %860 = vmatprep.subr.bf16.mxu1 %v3598_v30  ;;  %v3912_v30 = vld [vmem:[#allocation9 + $0x4] ss:$8 sps:$4 sm:$0xff]  }
  0x6e   :  { %792 = vmatmul.mubr.bf16.gmra.mrb[8].mxu1 %v4360_v32  ;;  %1018 = vmatmul.mubr.bf16.gmra.mrb[8].mxu0 %v4360_v32 }
  0x6f   :  { %801 = vmatprep.mubr.bf16.mxu1 %v4267_v1  ;;  %861 = vmatpush1.bf16.msra.mxu1 %v3597_v33  ;;  %v3958_v33 = vld [vmem:[#allocation9 + $0x100] ss:$8 sps:$4 sm:$0xff]  }
  0x70   :  { %862 = vmatprep.subr.bf16.mxu1 %v3606_v36  ;;  %1027 = vmatprep.mubr.bf16.mxu0 %v4267_v1  ;;  %v3966_v36 = vld [vmem:[#allocation9 + $0x124] ss:$8 sps:$4 sm:$0xff]  }
  0x71   :  { %2834 = vmatpush1.bf16.msra.mxu0 %v3958_v33  ;;  %v3957_v33 = vld [vmem:[#allocation9 + $0xf4] ss:$8 sps:$4 sm:$0xff]  }
  0x72   :  { %2835 = vmatprep.subr.bf16.mxu0 %v3963_v34  ;;  %v3955_v34 = vld [vmem:[#allocation9 + $0xf0] ss:$8 sps:$4 sm:$0xff]  }
  0x73   :  { %863 = vmatpush1.bf16.msra.mxu1 %v3605_v39  ;;  %v3967_v39 = vld [vmem:[#allocation9 + $0x130] ss:$8 sps:$4 sm:$0xff]  }
  0x74   :  { %864 = vmatprep.subr.bf16.mxu1 %v3614_v42  ;;  %v3975_v42 = vld [vmem:[#allocation9 + $0x154] ss:$8 sps:$4 sm:$0xff]  }
  0x75   :  { %2836 = vmatpush1.bf16.msra.mxu0 %v3961_v35  ;;  %v1580_v35 = vlaneseq }
  0x76   :  { %802 = vmatmul.mubr.bf16.gmra.mrb[12].mxu1 %v4366_v43  ;;  %1028 = vmatmul.mubr.bf16.gmra.mrb[12].mxu0 %v4366_v43 }
  0x77   :  { %811 = vmatprep.mubr.bf16.mxu1 %v4267_v1  ;;  %865 = vmatpush1.bf16.msra.mxu1 %v3613_v44  ;;  %v3973_v44 = vld [vmem:[#allocation9 + $0x150] ss:$8 sps:$4 sm:$0xff]  }
  0x78   :  { %866 = vmatprep.subr.bf16.mxu1 %v3622_v47  ;;  %1037 = vmatprep.mubr.bf16.mxu0 %v4267_v1  ;;  %v3981_v47 = vld [vmem:[#allocation9 + $0x174] ss:$8 sps:$4 sm:$0xff]  }
  0x79   :  { %2837 = vmatprep.subr.bf16.mxu0 %v3966_v36  ;;  %v4431_v36 = vshrl.u32 %v1580_v35, 7 }
  0x7a   :  { %2838 = vmatpush1.bf16.msra.mxu0 %v3964_v37 }
  0x7b   :  { %867 = vmatpush1.bf16.msra.mxu1 %v3621_v50  ;;  %2839 = vmatprep.subr.bf16.mxu0 %v3969_v38  ;;  %v3910_v50 = vld [vmem:[#allocation9] ss:$8 sps:$4 sm:$0xff]   ;;  %v4442_v37 = vsub.s32 1, %v4431_v36 }
  0x7c   :  { %1078 = vmatprep.subr.bf16.mxu1 %v3570_v51  ;;  %v3982_v51 = vld [vmem:[#allocation9 + $0x180] ss:$8 sps:$4 sm:$0xff]  }
  0x7e   :  { %812 = vmatmul.mubr.bf16.gmra.mrb[16].mxu1 %v4372_v52  ;;  %1038 = vmatmul.mubr.bf16.gmra.mrb[16].mxu0 %v4372_v52 }
  0x7f   :  { %821 = vmatprep.mubr.bf16.mxu1 %v4267_v1  ;;  %1047 = vmatprep.mubr.bf16.mxu0 %v4267_v1 }
  0x80   :  { %2840 = vmatpush1.bf16.msra.mxu0 %v3967_v39 }
  0x81   :  { %2841 = vmatprep.subr.bf16.mxu0 %v3972_v40 }
  0x84   :  { %2842 = vmatpush1.bf16.msra.mxu0 %v3970_v41 }
  0x85   :  { %2843 = vmatprep.subr.bf16.mxu0 %v3975_v42 }
  0x86   :  { %822 = vmatmul.mubr.bf16.gmra.mrb[20].mxu1 %v4378_v55  ;;  %1048 = vmatmul.mubr.bf16.gmra.mrb[20].mxu0 %v4378_v55 }
  0x87   :  { %831 = vmatprep.mubr.bf16.mxu1 %v4267_v1  ;;  %1057 = vmatprep.mubr.bf16.mxu0 %v4267_v1 }
  0x88   :  { %2844 = vmatpush1.bf16.msra.mxu0 %v3973_v44 }
  0x89   :  { %2845 = vmatprep.subr.bf16.mxu0 %v3978_v45 }
  0x8c   :  { %2846 = vmatpush1.bf16.msra.mxu0 %v3976_v46 }
  0x8d   :  { %2847 = vmatprep.subr.bf16.mxu0 %v3981_v47 }
  0x8e   :  { %832 = vmatmul.mubr.bf16.gmra.mrb[24].mxu1 %v4384_v58  ;;  %1058 = vmatmul.mubr.bf16.gmra.mrb[24].mxu0 %v4384_v58 }
  0x8f   :  { %841 = vmatprep.mubr.bf16.mxu1 %v4267_v1  ;;  %1067 = vmatprep.mubr.bf16.mxu0 %v4267_v1 }
  0x90   :  { %2848 = vmatpush1.bf16.msra.mxu0 %v3979_v48 }
  0x91   :  { %2849 = vmatprep.subr.bf16.mxu0 %v3984_v49 }
  0x94   :  { %2850 = vmatpush1.bf16.msra.mxu0 %v3982_v51 }
  0x95   :  { %2851 = vmatprep.subr.bf16.mxu0 %v3987_v54 }
  0x96   :  { %842 = vmatmul.mubr.bf16.gmra.mrb[28].mxu1 %v4390_v62  ;;  %1068 = vmatmul.mubr.bf16.gmra.mrb[28].mxu0 %v4390_v62 }
  0x97   :  { %884 = vmatprep.mubr.bf16.mxu1 %v4267_v1 }
  0x98   :  { %2852 = vmatpush1.bf16.msra.mxu0 %v3985_v57 }
  0x99   :  { %2853 = vmatprep.subr.bf16.mxu0 %v3990_v61 }
  0x9c   :  { %2854 = vmatpush1.bf16.msra.mxu0 %v3988_v0 }
  0x9e   :  { %885 = vmatmul.mubr.bf16.vlgmr.msra.gmra.mrb[32].mxu1 %v4352_v60 }
  0x9f   :  { %894 = vmatprep.mubr.bf16.mxu1 %v4267_v1  ;;  %1079 = vmatpush1.bf16.msra.mxu1 %v3569_v2  ;;  %v3921_v2 = vld [vmem:[#allocation9 + $0x34] ss:$8 sps:$4 sm:$0xff]  }
  0xa0   :  { %1080 = vmatprep.subr.bf16.mxu1 %v3578_v3  ;;  %v3919_v3 = vld [vmem:[#allocation9 + $0x30] ss:$8 sps:$4 sm:$0xff]  }
  0xa3   :  { %1081 = vmatpush1.bf16.msra.mxu1 %v3577_v6  ;;  %v3996_v6 = vld [vmem:[#allocation9 + $0x1c4] ss:$8 sps:$4 sm:$0xff]  }
  0xa4   :  { %1082 = vmatprep.subr.bf16.mxu1 %v3586_v7  ;;  %v3922_v7 = vld [vmem:[#allocation9 + $0x40] ss:$8 sps:$4 sm:$0xff]  }
  0xa6   :  { %895 = vmatmul.mubr.bf16.gmra.mrb[36].mxu1 %v4356_v18 }
  0xa7   :  { %904 = vmatprep.mubr.bf16.mxu1 %v4267_v1  ;;  %1083 = vmatpush1.bf16.msra.mxu1 %v3585_v10  ;;  %v3925_v10 = vld [vmem:[#allocation9 + $0x50] ss:$8 sps:$4 sm:$0xff]  }
  0xa8   :  { %1084 = vmatprep.subr.bf16.mxu1 %v3594_v11  ;;  %v3997_v11 = vld [vmem:[#allocation9 + $0x1d0] ss:$8 sps:$4 sm:$0xff]  }
  0xab   :  { %1085 = vmatpush1.bf16.msra.mxu1 %v3593_v14  ;;  %v3928_v14 = vld [vmem:[#allocation9 + $0x60] ss:$8 sps:$4 sm:$0xff]  }
  0xac   :  { %1086 = vmatprep.subr.bf16.mxu1 %v3602_v15  ;;  %v4000_v15 = vld [vmem:[#allocation9 + $0x1e0] ss:$8 sps:$4 sm:$0xff]  }
  0xae   :  { %905 = vmatmul.mubr.bf16.gmra.mrb[40].mxu1 %v4360_v32 }
  0xaf   :  { %914 = vmatprep.mubr.bf16.mxu1 %v4267_v1  ;;  %1087 = vmatpush1.bf16.msra.mxu1 %v3601_v19  ;;  %v4003_v19 = vld [vmem:[#allocation9 + $0x1f0] ss:$8 sps:$4 sm:$0xff]  }
  0xb0   :  { %1088 = vmatprep.subr.bf16.mxu1 %v3610_v20  ;;  %v3936_v20 = vld [vmem:[#allocation9 + $0x84] ss:$8 sps:$4 sm:$0xff]  }
  0xb3   :  { %1089 = vmatpush1.bf16.msra.mxu1 %v3609_v23  ;;  %v3939_v23 = vld [vmem:[#allocation9 + $0x94] ss:$8 sps:$4 sm:$0xff]  }
  0xb4   :  { %1090 = vmatprep.subr.bf16.mxu1 %v3618_v24  ;;  %v3942_v24 = vld [vmem:[#allocation9 + $0xa4] ss:$8 sps:$4 sm:$0xff]  }
  0xb6   :  { %915 = vmatmul.mubr.bf16.gmra.mrb[44].mxu1 %v4366_v43 }
  0xb7   :  { %924 = vmatprep.mubr.bf16.mxu1 %v4267_v1  ;;  %1091 = vmatpush1.bf16.msra.mxu1 %v3617_v27  ;;  %v3943_v27 = vld [vmem:[#allocation9 + $0xb0] ss:$8 sps:$4 sm:$0xff]  }
  0xb8   :  { %1092 = vmatprep.subr.bf16.mxu1 %v3626_v28  ;;  %v3948_v28 = vld [vmem:[#allocation9 + $0xc4] ss:$8 sps:$4 sm:$0xff]  }
  0xbb   :  { %1093 = vmatpush1.bf16.msra.mxu1 %v3625_v29  ;;  %v3951_v29 = vld [vmem:[#allocation9 + $0xd4] ss:$8 sps:$4 sm:$0xff]  }
  0xbc   :  { %2720 = vmatprep.subr.bf16.mxu1 %v3912_v30  ;;  %v3949_v30 = vld [vmem:[#allocation9 + $0xd0] ss:$8 sps:$4 sm:$0xff]  }
  0xbe   :  { %925 = vmatmul.mubr.bf16.gmra.mrb[48].mxu1 %v4372_v52 }
  0xbf   :  { %934 = vmatprep.mubr.bf16.mxu1 %v4267_v1 }
  0xc6   :  { %935 = vmatmul.mubr.bf16.gmra.mrb[52].mxu1 %v4378_v55 }
  0xc7   :  { %944 = vmatprep.mubr.bf16.mxu1 %v4267_v1 }
  0xce   :  { %945 = vmatmul.mubr.bf16.gmra.mrb[56].mxu1 %v4384_v58 }
  0xcf   :  { %954 = vmatprep.mubr.bf16.mxu1 %v4267_v1 }
  0xd6   :  { %955 = vmatmul.mubr.bf16.gmra.mrb[60].mxu1 %v4390_v62 }
  0xd7   :  { %1110 = vmatprep.mubr.bf16.mxu1 %v4267_v1 }
  0xde   :  { %1111 = vmatmul.mubr.bf16.vlgmr.msra.gmra.mrb[64].mxu1 %v4352_v60  ;;  %v3993_v60 = vld [vmem:[#allocation9 + $0x1b4] ss:$8 sps:$4 sm:$0xff]  }
  0xdf   :  { %2721 = vmatpush1.bf16.msra.mxu1 %v3910_v50  ;;  %1120 = vmatprep.mubr.bf16.mxu1 %v4267_v1 }
  0xe0   :  { %2722 = vmatprep.subr.bf16.mxu1 %v3915_v53  ;;  %2855 = vmatprep.subr.bf16.mxu0 %v3993_v60  ;;  %v1598_v60 = vsub.s32 4, %v4431_v36 }
  0xe1   :  { %2856 = vmatpush1.bf16.msra.mxu0 %v3991_v4  ;;  %v1602_v4 = vsub.s32 5, %v4431_v36 }
  0xe2   :  { %2857 = vmatprep.subr.bf16.mxu0 %v3996_v6 }
  0xe3   :  { %2723 = vmatpush1.bf16.msra.mxu1 %v3913_v56 }
  0xe4   :  { %2724 = vmatprep.subr.bf16.mxu1 %v3918_v59 }
  0xe5   :  { %2858 = vmatpush1.bf16.msra.mxu0 %v3994_v8 }
  0xe6   :  { %1121 = vmatmul.mubr.bf16.gmra.mrb[68].mxu1 %v4356_v18  ;;  %v3999_v18 = vld [vmem:[#allocation9 + $0x1d4] ss:$8 sps:$4 sm:$0xff]  }
  0xe7   :  { %2725 = vmatpush1.bf16.msra.mxu1 %v3916_v63  ;;  %1130 = vmatprep.mubr.bf16.mxu1 %v4267_v1 }
  0xe8   :  { %2726 = vmatprep.subr.bf16.mxu1 %v3921_v2  ;;  %2859 = vmatprep.subr.bf16.mxu0 %v3999_v18 }
  0xe9   :  { %2860 = vmatpush1.bf16.msra.mxu0 %v3997_v11 }
  0xea   :  { %2861 = vmatprep.subr.bf16.mxu0 %v4002_v13 }
  0xeb   :  { %2727 = vmatpush1.bf16.msra.mxu1 %v3919_v3 }
  0xec   :  { %2728 = vmatprep.subr.bf16.mxu1 %v3924_v5 }
  0xed   :  { %2862 = vmatpush1.bf16.msra.mxu0 %v4000_v15 }
  0xee   :  { %1131 = vmatmul.mubr.bf16.gmra.mrb[72].mxu1 %v4360_v32  ;;  %v4005_v32 = vld [vmem:[#allocation9 + $0x1f4] ss:$8 sps:$4 sm:$0xff]  }
  0xef   :  { %2729 = vmatpush1.bf16.msra.mxu1 %v3922_v7  ;;  %1140 = vmatprep.mubr.bf16.mxu1 %v4267_v1 }
  0xf0   :  { %2730 = vmatprep.subr.bf16.mxu1 %v3927_v9  ;;  %2863 = vmatprep.subr.bf16.mxu0 %v4005_v32 }
  0xf1   :  { %2864 = vmatpush1.bf16.msra.mxu0 %v4003_v19 }
  0xf2   :  { %2946 = vmatprep.subr.bf16.mxu0 %v4008_v21 }
  0xf3   :  { %2731 = vmatpush1.bf16.msra.mxu1 %v3925_v10 }
  0xf4   :  { %2732 = vmatprep.subr.bf16.mxu1 %v3930_v12 }
  0xf6   :  { %1141 = vmatmul.mubr.bf16.gmra.mrb[76].mxu1 %v4366_v43  ;;  %v3937_v43 = vld [vmem:[#allocation9 + $0x90] ss:$8 sps:$4 sm:$0xff]  }
  0xf7   :  { %2733 = vmatpush1.bf16.msra.mxu1 %v3928_v14  ;;  %1150 = vmatprep.mubr.bf16.mxu1 %v4267_v1 }
  0xf8   :  { %2734 = vmatprep.subr.bf16.mxu1 %v3933_v16 }
  0xfb   :  { %2735 = vmatpush1.bf16.msra.mxu1 %v3931_v17 }
  0xfc   :  { %2736 = vmatprep.subr.bf16.mxu1 %v3936_v20 }
  0xfe   :  { %1151 = vmatmul.mubr.bf16.gmra.mrb[80].mxu1 %v4372_v52  ;;  %v3946_v52 = vld [vmem:[#allocation9 + $0xc0] ss:$8 sps:$4 sm:$0xff]  }
  0xff   :  { %2737 = vmatpush1.bf16.msra.mxu1 %v3934_v22  ;;  %1160 = vmatprep.mubr.bf16.mxu1 %v4267_v1 }
 0x100   :  { %2738 = vmatprep.subr.bf16.mxu1 %v3939_v23 }
 0x103   :  { %2739 = vmatpush1.bf16.msra.mxu1 %v3937_v43 }
 0x104   :  { %2740 = vmatprep.subr.bf16.mxu1 %v3942_v24 }
 0x106   :  { %1161 = vmatmul.mubr.bf16.gmra.mrb[84].mxu1 %v4378_v55  ;;  %v3952_v55 = vld [vmem:[#allocation9 + $0xe0] ss:$8 sps:$4 sm:$0xff]  }
 0x107   :  { %2741 = vmatpush1.bf16.msra.mxu1 %v3940_v25  ;;  %1170 = vmatprep.mubr.bf16.mxu1 %v4267_v1 }
 0x108   :  { %2742 = vmatprep.subr.bf16.mxu1 %v3945_v26 }
 0x10b   :  { %2743 = vmatpush1.bf16.msra.mxu1 %v3943_v27 }
 0x10c   :  { %2744 = vmatprep.subr.bf16.mxu1 %v3948_v28 }
 0x10e   :  { %1171 = vmatmul.mubr.bf16.gmra.mrb[88].mxu1 %v4384_v58  ;;  %v4434_v58 = vsub.s32 0, %v4431_v36 }
 0x10f   :  { %2745 = vmatpush1.bf16.msra.mxu1 %v3946_v52  ;;  %1180 = vmatprep.mubr.bf16.mxu1 %v4267_v1  ;;  %v4439_v1 = vld [vmem:[%s4919_s2] sm:$0xff] }
 0x110   :  { %2746 = vmatprep.subr.bf16.mxu1 %v3951_v29  ;;  %v4450_v38 = vrot.slane %v4439_v1, %v4442_v37  ;;  %v4463_v18 = vrot.slane %v4439_v1, %v1598_v60  ;;  %v4466_v12 = vrot.slane %v4439_v1, %v1602_v4 }
 0x113   :  { %2747 = vmatpush1.bf16.msra.mxu1 %v3949_v30 }
 0x114   :  { %2748 = vmatprep.subr.bf16.mxu1 %v3954_v31 }
 0x116   :  { %1181 = vmatmul.mubr.bf16.gmra.mrb[92].mxu1 %v4390_v62  ;;  %v4446_v62 = vrot.slane %v4439_v1, %v4434_v58 }
 0x117   :  { %2749 = vmatpush1.bf16.msra.mxu1 %v3952_v55 }
 0x118   :  { %2750 = vmatprep.subr.bf16.mxu1 %v3957_v33 }
 0x11b   :  { %2751 = vmatpush1.bf16.msra.mxu1 %v3955_v34 }
 0x131   :  { %v773_v39 = vpop.f32.mrb[0].mxu1  ;;  %v999_v32 = vpop.f32.mrb[0].mxu0 }
 0x132   :  { %v1620_v40 = vadd.f32 %v4446_v62, %v773_v39  ;;  %v775_v41 = vpop.f32.mrb[1].mxu1  ;;  %v1624_v20 = vadd.f32 %v4463_v18, %v999_v32  ;;  %v1001_v21 = vpop.f32.mrb[1].mxu0 }
 0x133   :  { %v1621_v42 = vadd.f32 %v4450_v38, %v775_v41  ;;  %v777_v44 = vpop.f32.mrb[2].mxu1  ;;  %v1625_v23 = vadd.f32 %v4466_v12, %v1001_v21  ;;  %v1003_v43 = vpop.f32.mrb[2].mxu0 }
 0x134   :  { %v1628_v45 = vadd.f32 %v4446_v62, %v777_v44  ;;  %v779_v46 = vpop.f32.mrb[3].mxu1  ;;  %v1748_v48 = vmax.f32 %v1620_v40, 0.0  ;;  %v1752_v26 = vmax.f32 %v1624_v20, 0.0  ;;  %v1632_v27 = vadd.f32 %v4463_v18, %v1003_v43  ;;  %v1005_v28 = vpop.f32.mrb[3].mxu0 }
 0x135   :  { %v1629_v47 = vadd.f32 %v4450_v38, %v779_v46  ;;  %v1749_v50 = vmax.f32 %v1621_v42, 0.0  ;;  %v1753_v30 = vmax.f32 %v1625_v23, 0.0  ;;  %v1633_v31 = vadd.f32 %v4466_v12, %v1005_v28 }
 0x136   :  { %v1756_v49 = vmax.f32 %v1628_v45, 0.0  ;;  %v1760_v33 = vmax.f32 %v1632_v27, 0.0 }
 0x137   :  { %v1757_v51 = vmax.f32 %v1629_v47, 0.0  ;;  %v1761_v40 = vmax.f32 %v1633_v31, 0.0 }
 0x138   :  { %v1876_v53 = vpack.c.bf16 %v1756_v49, %v1748_v48  ;;  %v4477_v44 = vpack.c.bf16 %v1760_v33, %v1752_v26 }
 0x139   :  { %v1877_v54 = vpack.c.bf16 %v1757_v51, %v1749_v50  ;;  %v783_v56 = vpop.f32.mrb[4].mxu1  ;;  %v4480_v47 = vpack.c.bf16 %v1761_v40, %v1753_v30  ;;  %v1009_v48 = vpop.f32.mrb[4].mxu0 }
 0x13a   :  { %v1636_v57 = vadd.f32 %v4446_v62, %v783_v56  ;;  %v785_v59 = vpop.f32.mrb[5].mxu1  ;;  %v1640_v51 = vadd.f32 %v4463_v18, %v1009_v48 }
 0x13b   :  { %v1637_v61 = vadd.f32 %v4450_v38, %v785_v59  ;;  %v787_v63 = vpop.f32.mrb[6].mxu1  ;;  %2752 = vmatprep.mubr.bf16.mxu1 %v1877_v54 }
 0x13c   :  { %v1644_v0 = vadd.f32 %v4446_v62, %v787_v63  ;;  %v789_v2 = vpop.f32.mrb[7].mxu1  ;;  %2753 = vmatmul.mubr.bf16.vlgmr.msra.gmra.mrb[96].mxu1 %v1876_v53  ;;  %v1764_v5 = vmax.f32 %v1636_v57, 0.0  ;;  %v1011_v53 = vpop.f32.mrb[5].mxu0  ;;  %v1768_v63 = vmax.f32 %v1640_v51, 0.0 }
 0x13d   :  { %v1645_v3 = vadd.f32 %v4450_v38, %v789_v2  ;;  %v1765_v7 = vmax.f32 %v1637_v61, 0.0  ;;  %v1641_v56 = vadd.f32 %v4466_v12, %v1011_v53  ;;  %v1013_v57 = vpop.f32.mrb[6].mxu0 }
 0x13e   :  { %v1772_v6 = vmax.f32 %v1644_v0, 0.0  ;;  %v1648_v0 = vadd.f32 %v4463_v18, %v1013_v57  ;;  %v1015_v2 = vpop.f32.mrb[7].mxu0 }
 0x13f   :  { %v1773_v8 = vmax.f32 %v1645_v3, 0.0  ;;  %v1769_v4 = vmax.f32 %v1641_v56, 0.0 }
 0x140   :  { %v1884_v9 = vpack.c.bf16 %v1772_v6, %v1764_v5  ;;  %v1649_v5 = vadd.f32 %v4466_v12, %v1015_v2 }
 0x141   :  { %v1885_v10 = vpack.c.bf16 %v1773_v8, %v1765_v7  ;;  %v793_v11 = vpop.f32.mrb[8].mxu1  ;;  %v1776_v7 = vmax.f32 %v1648_v0, 0.0 }
 0x142   :  { %v1652_v13 = vadd.f32 %v4446_v62, %v793_v11  ;;  %v795_v14 = vpop.f32.mrb[9].mxu1 }
 0x143   :  { %v1653_v15 = vadd.f32 %v4450_v38, %v795_v14  ;;  %v797_v16 = vpop.f32.mrb[10].mxu1  ;;  %2762 = vmatprep.mubr.bf16.mxu1 %v1885_v10  ;;  %v1777_v10 = vmax.f32 %v1649_v5, 0.0  ;;  %v4489_v14 = vpack.c.bf16 %v1776_v7, %v1768_v63 }
 0x144   :  { %v1660_v17 = vadd.f32 %v4446_v62, %v797_v16  ;;  %v799_v19 = vpop.f32.mrb[11].mxu1  ;;  %2763 = vmatmul.mubr.bf16.gmra.mrb[100].mxu1 %v1884_v9  ;;  %v1780_v24 = vmax.f32 %v1652_v13, 0.0 }
 0x145   :  { %v1661_v22 = vadd.f32 %v4450_v38, %v799_v19  ;;  %v1781_v52 = vmax.f32 %v1653_v15, 0.0  ;;  %v4492_v32 = vpack.c.bf16 %v1777_v10, %v1769_v4 }
 0x146   :  { %v1788_v25 = vmax.f32 %v1660_v17, 0.0  ;;  %v1019_v17 = vpop.f32.mrb[8].mxu0 }
 0x147   :  { %v1789_v29 = vmax.f32 %v1661_v22, 0.0  ;;  %v1656_v21 = vadd.f32 %v4463_v18, %v1019_v17  ;;  %v1021_v22 = vpop.f32.mrb[9].mxu0 }
 0x148   :  { %v1892_v55 = vpack.c.bf16 %v1788_v25, %v1780_v24  ;;  %v1657_v43 = vadd.f32 %v4466_v12, %v1021_v22  ;;  %v1023_v24 = vpop.f32.mrb[10].mxu0 }
 0x149   :  { %v1893_v34 = vpack.c.bf16 %v1789_v29, %v1781_v52  ;;  %v803_v39 = vpop.f32.mrb[12].mxu1  ;;  %v1784_v27 = vmax.f32 %v1656_v21, 0.0  ;;  %v1664_v28 = vadd.f32 %v4463_v18, %v1023_v24  ;;  %v1025_v52 = vpop.f32.mrb[11].mxu0 }
 0x14a   :  { %v1668_v41 = vadd.f32 %v4446_v62, %v803_v39  ;;  %v805_v42 = vpop.f32.mrb[13].mxu1  ;;  %v1785_v31 = vmax.f32 %v1657_v43, 0.0  ;;  %v1029_v51 = vpop.f32.mrb[12].mxu0 }
 0x14b   :  { %v1669_v45 = vadd.f32 %v4450_v38, %v805_v42  ;;  %v807_v46 = vpop.f32.mrb[14].mxu1  ;;  %2772 = vmatprep.mubr.bf16.mxu1 %v1893_v34  ;;  %v1792_v34 = vmax.f32 %v1664_v28, 0.0  ;;  %v1672_v56 = vadd.f32 %v4463_v18, %v1029_v51  ;;  %v1031_v57 = vpop.f32.mrb[13].mxu0  ;;  %v1590_v51 = vsub.s32 2, %v4431_v36 }
 0x14c   :  { %v1676_v49 = vadd.f32 %v4446_v62, %v807_v46  ;;  %v809_v50 = vpop.f32.mrb[15].mxu1  ;;  %2773 = vmatmul.mubr.bf16.gmra.mrb[104].mxu1 %v1892_v55  ;;  %v1796_v59 = vmax.f32 %v1668_v41, 0.0  ;;  %v1665_v55 = vadd.f32 %v4466_v12, %v1025_v52  ;;  %v1033_v63 = vpop.f32.mrb[14].mxu0 }
 0x14d   :  { %v1677_v54 = vadd.f32 %v4450_v38, %v809_v50  ;;  %v1797_v60 = vmax.f32 %v1669_v45, 0.0  ;;  %v4501_v46 = vpack.c.bf16 %v1792_v34, %v1784_v27  ;;  %v1035_v4 = vpop.f32.mrb[15].mxu0 }
 0x14e   :  { %v1804_v61 = vmax.f32 %v1676_v49, 0.0  ;;  %v1793_v41 = vmax.f32 %v1665_v55, 0.0 }
 0x14f   :  { %v1805_v3 = vmax.f32 %v1677_v54, 0.0 }
 0x150   :  { %v1900_v6 = vpack.c.bf16 %v1804_v61, %v1796_v59  ;;  %v4504_v50 = vpack.c.bf16 %v1793_v41, %v1785_v31  ;;  %v1673_v61 = vadd.f32 %v4466_v12, %v1031_v57 }
 0x151   :  { %v1901_v8 = vpack.c.bf16 %v1805_v3, %v1797_v60  ;;  %v813_v9 = vpop.f32.mrb[16].mxu1  ;;  %v1800_v60 = vmax.f32 %v1672_v56, 0.0  ;;  %v1680_v3 = vadd.f32 %v4463_v18, %v1033_v63 }
 0x152   :  { %v1684_v11 = vadd.f32 %v4446_v62, %v813_v9  ;;  %v815_v13 = vpop.f32.mrb[17].mxu1  ;;  %v1801_v7 = vmax.f32 %v1673_v61, 0.0 }
 0x153   :  { %v1685_v15 = vadd.f32 %v4450_v38, %v815_v13  ;;  %v817_v16 = vpop.f32.mrb[18].mxu1  ;;  %2782 = vmatprep.mubr.bf16.mxu1 %v1901_v8  ;;  %v1681_v8 = vadd.f32 %v4466_v12, %v1035_v4  ;;  %v1808_v10 = vmax.f32 %v1680_v3, 0.0 }
 0x154   :  { %v1692_v19 = vadd.f32 %v4446_v62, %v817_v16  ;;  %v819_v20 = vpop.f32.mrb[19].mxu1  ;;  %2783 = vmatmul.mubr.bf16.gmra.mrb[108].mxu1 %v1900_v6  ;;  %v1812_v25 = vmax.f32 %v1684_v11, 0.0 }
 0x155   :  { %v1693_v23 = vadd.f32 %v4450_v38, %v819_v20  ;;  %v1813_v29 = vmax.f32 %v1685_v15, 0.0  ;;  %v1809_v15 = vmax.f32 %v1681_v8, 0.0 }
 0x156   :  { %v1820_v26 = vmax.f32 %v1692_v19, 0.0  ;;  %v4513_v19 = vpack.c.bf16 %v1808_v10, %v1800_v60 }
 0x157   :  { %v1821_v30 = vmax.f32 %v1693_v23, 0.0  ;;  %v4516_v22 = vpack.c.bf16 %v1809_v15, %v1801_v7  ;;  %v1039_v23 = vpop.f32.mrb[16].mxu0  ;;  %v4536_v7 = vrot.slane %v4439_v1, %v1590_v51 }
 0x158   :  { %v1908_v33 = vpack.c.bf16 %v1820_v26, %v1812_v25  ;;  %v1688_v25 = vadd.f32 %v4463_v18, %v1039_v23  ;;  %v1041_v26 = vpop.f32.mrb[17].mxu0 }
 0x159   :  { %v1909_v39 = vpack.c.bf16 %v1821_v30, %v1813_v29  ;;  %v823_v40 = vpop.f32.mrb[20].mxu1  ;;  %v1689_v28 = vadd.f32 %v4466_v12, %v1041_v26  ;;  %v1043_v52 = vpop.f32.mrb[18].mxu0 }
 0x15a   :  { %v1700_v42 = vadd.f32 %v4446_v62, %v823_v40  ;;  %v825_v45 = vpop.f32.mrb[21].mxu1  ;;  %v1816_v31 = vmax.f32 %v1688_v25, 0.0  ;;  %v1696_v55 = vadd.f32 %v4463_v18, %v1043_v52 }
 0x15b   :  { %v1701_v48 = vadd.f32 %v4450_v38, %v825_v45  ;;  %v827_v49 = vpop.f32.mrb[22].mxu1  ;;  %2792 = vmatprep.mubr.bf16.mxu1 %v1909_v39  ;;  %v1817_v40 = vmax.f32 %v1689_v28, 0.0 }
 0x15c   :  { %v1708_v53 = vadd.f32 %v4446_v62, %v827_v49  ;;  %v829_v54 = vpop.f32.mrb[23].mxu1  ;;  %2793 = vmatmul.mubr.bf16.gmra.mrb[112].mxu1 %v1908_v33  ;;  %v1828_v0 = vmax.f32 %v1700_v42, 0.0  ;;  %v1045_v33 = vpop.f32.mrb[19].mxu0  ;;  %v1824_v45 = vmax.f32 %v1696_v55, 0.0 }
 0x15d   :  { %v1709_v59 = vadd.f32 %v4450_v38, %v829_v54  ;;  %v1829_v5 = vmax.f32 %v1701_v48, 0.0  ;;  %v1697_v41 = vadd.f32 %v4466_v12, %v1045_v33 }
 0x15e   :  { %v1836_v2 = vmax.f32 %v1708_v53, 0.0  ;;  %v1594_v53 = vsub.s32 3, %v4431_v36 }
 0x15f   :  { %v1837_v6 = vmax.f32 %v1709_v59, 0.0  ;;  %v1825_v54 = vmax.f32 %v1697_v41, 0.0  ;;  %v4527_v59 = vpack.c.bf16 %v1824_v45, %v1816_v31 }
 0x160   :  { %v1916_v9 = vpack.c.bf16 %v1836_v2, %v1828_v0  ;;  %v1049_v2 = vpop.f32.mrb[20].mxu0  ;;  %v4539_v8 = vrot.slane %v4439_v1, %v1594_v53 }
 0x161   :  { %v1917_v11 = vpack.c.bf16 %v1837_v6, %v1829_v5  ;;  %v833_v13 = vpop.f32.mrb[24].mxu1  ;;  %v4530_v0 = vpack.c.bf16 %v1825_v54, %v1817_v40  ;;  %v1704_v4 = vadd.f32 %v4463_v18, %v1049_v2  ;;  %v1051_v5 = vpop.f32.mrb[21].mxu0 }
 0x162   :  { %v1716_v16 = vadd.f32 %v4446_v62, %v833_v13  ;;  %v835_v17 = vpop.f32.mrb[25].mxu1  ;;  %v1053_v10 = vpop.f32.mrb[22].mxu0 }
 0x163   :  { %v1717_v20 = vadd.f32 %v4450_v38, %v835_v17  ;;  %v837_v21 = vpop.f32.mrb[26].mxu1  ;;  %2802 = vmatprep.mubr.bf16.mxu1 %v1917_v11  ;;  %v1832_v15 = vmax.f32 %v1704_v4, 0.0 }
 0x164   :  { %v1724_v43 = vadd.f32 %v4446_v62, %v837_v21  ;;  %v839_v24 = vpop.f32.mrb[27].mxu1  ;;  %2803 = vmatmul.mubr.bf16.gmra.mrb[116].mxu1 %v1916_v9  ;;  %v1844_v29 = vmax.f32 %v1716_v16, 0.0  ;;  %v1705_v9 = vadd.f32 %v4466_v12, %v1051_v5  ;;  %v1055_v16 = vpop.f32.mrb[23].mxu0  ;;  %v4006_v5 = vld [vmem:[#allocation9 + $0x200] ss:$8 sps:$4 sm:$0xff]  }
 0x165   :  { %v1725_v27 = vadd.f32 %v4450_v38, %v839_v24  ;;  %v1845_v34 = vmax.f32 %v1717_v20, 0.0  ;;  %v1059_v55 = vpop.f32.mrb[24].mxu0 }
 0x166   :  { %v1852_v30 = vmax.f32 %v1724_v43, 0.0  ;;  %v1833_v21 = vmax.f32 %v1705_v9, 0.0  ;;  %v1061_v40 = vpop.f32.mrb[25].mxu0 }
 0x167   :  { %v1853_v39 = vmax.f32 %v1725_v27, 0.0  ;;  %v1063_v45 = vpop.f32.mrb[26].mxu0 }
 0x168   :  { %v1924_v42 = vpack.c.bf16 %v1852_v30, %v1844_v29  ;;  %v1728_v53 = vadd.f32 %v4463_v18, %v1063_v45  ;;  %v1065_v54 = vpop.f32.mrb[27].mxu0 }
 0x169   :  { %v1925_v48 = vpack.c.bf16 %v1853_v39, %v1845_v34  ;;  %v843_v49 = vpop.f32.mrb[28].mxu1  ;;  %v1720_v39 = vadd.f32 %v4463_v18, %v1059_v55 }
 0x16a   :  { %v1732_v56 = vadd.f32 %v4446_v62, %v843_v49  ;;  %v845_v57 = vpop.f32.mrb[29].mxu1 }
 0x16b   :  { %v1733_v61 = vadd.f32 %v4450_v38, %v845_v57  ;;  %v847_v63 = vpop.f32.mrb[30].mxu1  ;;  %2812 = vmatprep.mubr.bf16.mxu1 %v1925_v48  ;;  %v1848_v51 = vmax.f32 %v1720_v39, 0.0 }
 0x16c   :  { %v1740_v60 = vadd.f32 %v4446_v62, %v847_v63  ;;  %v849_v3 = vpop.f32.mrb[31].mxu1  ;;  %2813 = vmatmul.mubr.bf16.gmra.mrb[120].mxu1 %v1924_v42  ;;  %v1860_v11 = vmax.f32 %v1732_v56, 0.0  ;;  %v1712_v62 = vadd.f32 %v4463_v18, %v1053_v10  ;;  %v1721_v42 = vadd.f32 %v4466_v12, %v1061_v40 }
 0x16d   :  { %v1741_v6 = vadd.f32 %v4450_v38, %v849_v3  ;;  %v1861_v17 = vmax.f32 %v1733_v61, 0.0  ;;  %v1713_v38 = vadd.f32 %v4466_v12, %v1055_v16  ;;  %v1729_v63 = vadd.f32 %v4466_v12, %v1065_v54 }
 0x16e   :  { %v1868_v13 = vmax.f32 %v1740_v60, 0.0  ;;  %v1840_v43 = vmax.f32 %v1712_v62, 0.0  ;;  %v1849_v61 = vmax.f32 %v1721_v42, 0.0  ;;  %v1856_v60 = vmax.f32 %v1728_v53, 0.0 }
 0x16f   :  { %v1869_v20 = vmax.f32 %v1741_v6, 0.0  ;;  %v1841_v26 = vmax.f32 %v1713_v38, 0.0  ;;  %v1857_v6 = vmax.f32 %v1729_v63, 0.0 }
 0x170   :  { %v1932_v23 = vpack.c.bf16 %v1868_v13, %v1860_v11  ;;  %v4545_v52 = vpack.c.bf16 %v1840_v43, %v1832_v15  ;;  %v4011_v11 = vld [vmem:[#allocation9 + $0x214] ss:$8 sps:$4 sm:$0xff]   ;;  %v4557_v13 = vpack.c.bf16 %v1856_v60, %v1848_v51  ;;  %v4012_v51 = vld [vmem:[#allocation9 + $0x220] ss:$8 sps:$4 sm:$0xff]  }
 0x171   :  { %v1933_v24 = vpack.c.bf16 %v1869_v20, %v1861_v17  ;;  %v886_v25 = vpop.f32.mrb[32].mxu1  ;;  %v4548_v31 = vpack.c.bf16 %v1841_v26, %v1833_v21  ;;  %v4560_v16 = vpack.c.bf16 %v1857_v6, %v1849_v61  ;;  %v1069_v17 = vpop.f32.mrb[28].mxu0 }
 0x172   :  { %v1622_v27 = vadd.f32 %v4536_v7, %v886_v25  ;;  %v888_v28 = vpop.f32.mrb[33].mxu1  ;;  %v1736_v38 = vadd.f32 %v4463_v18, %v1069_v17 }
 0x173   :  { %v1623_v29 = vadd.f32 %v4539_v8, %v888_v28  ;;  %v890_v30 = vpop.f32.mrb[34].mxu1  ;;  %2822 = vmatprep.mubr.bf16.mxu1 %v1933_v24  ;;  %v4009_v24 = vld [vmem:[#allocation9 + $0x210] ss:$8 sps:$4 sm:$0xff]  }
 0x174   :  { %v1630_v33 = vadd.f32 %v4536_v7, %v890_v30  ;;  %v892_v34 = vpop.f32.mrb[35].mxu1  ;;  %2823 = vmatmul.mubr.bf16.gmra.mrb[124].mxu1 %v1932_v23  ;;  %v1750_v48 = vmax.f32 %v1622_v27, 0.0  ;;  %v1071_v23 = vpop.f32.mrb[29].mxu0  ;;  %v1864_v30 = vmax.f32 %v1736_v38, 0.0 }
 0x175   :  { %v1631_v41 = vadd.f32 %v4539_v8, %v892_v34  ;;  %v1751_v56 = vmax.f32 %v1623_v29, 0.0  ;;  %v1737_v25 = vadd.f32 %v4466_v12, %v1071_v23  ;;  %v1073_v26 = vpop.f32.mrb[30].mxu0  ;;  %v4014_v29 = vld [vmem:[#allocation9 + $0x224] ss:$8 sps:$4 sm:$0xff]   ;;  %v4023_v23 = vld [vmem:[#allocation9 + $0x254] ss:$8 sps:$4 sm:$0xff]  }
 0x176   :  { %v1758_v49 = vmax.f32 %v1630_v33, 0.0  ;;  %v1744_v55 = vadd.f32 %v4463_v18, %v1073_v26  ;;  %v1075_v33 = vpop.f32.mrb[31].mxu0 }
 0x177   :  { %v1759_v57 = vmax.f32 %v1631_v41, 0.0  ;;  %v1865_v40 = vmax.f32 %v1737_v25, 0.0  ;;  %v1745_v41 = vadd.f32 %v4466_v12, %v1075_v33 }
 0x178   :  { %v1878_v2 = vpack.c.bf16 %v1758_v49, %v1750_v48  ;;  %v1872_v45 = vmax.f32 %v1744_v55, 0.0  ;;  %v4026_v55 = vld [vmem:[#allocation9 + $0x264] ss:$8 sps:$4 sm:$0xff]  }
 0x179   :  { %v1879_v3 = vpack.c.bf16 %v1759_v57, %v1751_v56  ;;  %v896_v4 = vpop.f32.mrb[36].mxu1  ;;  %v1873_v53 = vmax.f32 %v1745_v41, 0.0  ;;  %v4017_v57 = vld [vmem:[#allocation9 + $0x234] ss:$8 sps:$4 sm:$0xff]  }
 0x17a   :  { %v1638_v9 = vadd.f32 %v4536_v7, %v896_v4  ;;  %v898_v10 = vpop.f32.mrb[37].mxu1  ;;  %v4569_v61 = vpack.c.bf16 %v1872_v45, %v1864_v30  ;;  %v4015_v4 = vld [vmem:[#allocation9 + $0x230] ss:$8 sps:$4 sm:$0xff]  }
 0x17b   :  { %v1639_v15 = vadd.f32 %v4539_v8, %v898_v10  ;;  %v900_v62 = vpop.f32.mrb[38].mxu1  ;;  %2865 = vmatprep.mubr.bf16.mxu0 %v1879_v3 }
 0x17c   :  { %v1646_v20 = vadd.f32 %v4536_v7, %v900_v62  ;;  %v902_v21 = vpop.f32.mrb[39].mxu1  ;;  %2866 = vmatmul.mubr.bf16.vlgmr.msra.gmra.mrb[32].mxu0 %v1878_v2  ;;  %v1766_v27 = vmax.f32 %v1638_v9, 0.0  ;;  %v4572_v2 = vpack.c.bf16 %v1873_v53, %v1865_v40  ;;  %v4020_v9 = vld [vmem:[#allocation9 + $0x244] ss:$8 sps:$4 sm:$0xff]  }
 0x17d   :  { %v1647_v43 = vadd.f32 %v4539_v8, %v902_v21  ;;  %2947 = vmatpush1.bf16.msra.mxu0 %v4006_v5  ;;  %v1767_v34 = vmax.f32 %v1639_v15, 0.0 }
 0x17e   :  { %v1774_v28 = vmax.f32 %v1646_v20, 0.0  ;;  %2948 = vmatprep.subr.bf16.mxu0 %v4011_v11  ;;  %v4018_v20 = vld [vmem:[#allocation9 + $0x240] ss:$8 sps:$4 sm:$0xff]  }
 0x17f   :  { %v1775_v39 = vmax.f32 %v1647_v43, 0.0 }
 0x180   :  { %v1886_v42 = vpack.c.bf16 %v1774_v28, %v1766_v27  ;;  %v4021_v28 = vld [vmem:[#allocation9 + $0x250] ss:$8 sps:$4 sm:$0xff]  }
 0x181   :  { %v1887_v48 = vpack.c.bf16 %v1775_v39, %v1767_v34  ;;  %v906_v49 = vpop.f32.mrb[40].mxu1  ;;  %2949 = vmatpush1.bf16.msra.mxu0 %v4009_v24 }
 0x182   :  { %v1654_v54 = vadd.f32 %v4536_v7, %v906_v49  ;;  %v908_v56 = vpop.f32.mrb[41].mxu1  ;;  %2950 = vmatprep.subr.bf16.mxu0 %v4014_v29  ;;  %v4029_v49 = vld [vmem:[#allocation9 + $0x274] ss:$8 sps:$4 sm:$0xff]  }
 0x183   :  { %v1655_v18 = vadd.f32 %v4539_v8, %v908_v56  ;;  %v910_v63 = vpop.f32.mrb[42].mxu1  ;;  %2875 = vmatprep.mubr.bf16.mxu0 %v1887_v48 }
 0x184   :  { %v1662_v12 = vadd.f32 %v4536_v7, %v910_v63  ;;  %v912_v60 = vpop.f32.mrb[43].mxu1  ;;  %2876 = vmatmul.mubr.bf16.gmra.mrb[36].mxu0 %v1886_v42  ;;  %v1782_v5 = vmax.f32 %v1654_v54, 0.0  ;;  %v4024_v42 = vld [vmem:[#allocation9 + $0x260] ss:$8 sps:$4 sm:$0xff]  }
 0x185   :  { %v1663_v3 = vadd.f32 %v4539_v8, %v912_v60  ;;  %2951 = vmatpush1.bf16.msra.mxu0 %v4012_v51  ;;  %v1783_v10 = vmax.f32 %v1655_v18, 0.0  ;;  %v4027_v18 = vld [vmem:[#allocation9 + $0x270] ss:$8 sps:$4 sm:$0xff]   ;;  %v4032_v60 = vld [vmem:[#allocation9 + $0x284] ss:$8 sps:$4 sm:$0xff]  }
 0x186   :  { %v1790_v6 = vmax.f32 %v1662_v12, 0.0  ;;  %2952 = vmatprep.subr.bf16.mxu0 %v4017_v57 }
 0x187   :  { %v1791_v11 = vmax.f32 %v1663_v3, 0.0 }
 0x188   :  { %v1894_v15 = vpack.c.bf16 %v1790_v6, %v1782_v5 }
 0x189   :  { %v1895_v62 = vpack.c.bf16 %v1791_v11, %v1783_v10  ;;  %v916_v17 = vpop.f32.mrb[44].mxu1  ;;  %2953 = vmatpush1.bf16.msra.mxu0 %v4015_v4  ;;  %v4030_v10 = vld [vmem:[#allocation9 + $0x280] ss:$8 sps:$4 sm:$0xff]  }
 0x18a   :  { %v1670_v21 = vadd.f32 %v4536_v7, %v916_v17  ;;  %v918_v38 = vpop.f32.mrb[45].mxu1  ;;  %2954 = vmatprep.subr.bf16.mxu0 %v4020_v9 }
 0x18b   :  { %v1671_v43 = vadd.f32 %v4539_v8, %v918_v38  ;;  %v920_v24 = vpop.f32.mrb[46].mxu1  ;;  %2885 = vmatprep.mubr.bf16.mxu0 %v1895_v62  ;;  %v4035_v62 = vld [vmem:[#allocation9 + $0x294] ss:$8 sps:$4 sm:$0xff]  }
 0x18c   :  { %v1678_v25 = vadd.f32 %v4536_v7, %v920_v24  ;;  %v922_v26 = vpop.f32.mrb[47].mxu1  ;;  %2886 = vmatmul.mubr.bf16.gmra.mrb[40].mxu0 %v1894_v15  ;;  %v1798_v29 = vmax.f32 %v1670_v21, 0.0 }
 0x18d   :  { %v1679_v27 = vadd.f32 %v4539_v8, %v922_v26  ;;  %2955 = vmatpush1.bf16.msra.mxu0 %v4018_v20  ;;  %v1799_v33 = vmax.f32 %v1671_v43, 0.0  ;;  %v4033_v43 = vld [vmem:[#allocation9 + $0x290] ss:$8 sps:$4 sm:$0xff]   ;;  %v4038_v26 = vld [vmem:[#allocation9 + $0x2a4] ss:$8 sps:$4 sm:$0xff]  }
 0x18e   :  { %v1806_v30 = vmax.f32 %v1678_v25, 0.0  ;;  %2956 = vmatprep.subr.bf16.mxu0 %v4023_v23 }
 0x18f   :  { %v1807_v34 = vmax.f32 %v1679_v27, 0.0 }
 0x190   :  { %v1902_v39 = vpack.c.bf16 %v1806_v30, %v1798_v29 }
 0x191   :  { %v1903_v40 = vpack.c.bf16 %v1807_v34, %v1799_v33  ;;  %v926_v41 = vpop.f32.mrb[48].mxu1  ;;  %2957 = vmatpush1.bf16.msra.mxu0 %v4021_v28  ;;  %v4036_v33 = vld [vmem:[#allocation9 + $0x2a0] ss:$8 sps:$4 sm:$0xff]  }
 0x192   :  { %v1686_v45 = vadd.f32 %v4536_v7, %v926_v41  ;;  %v928_v48 = vpop.f32.mrb[49].mxu1  ;;  %2958 = vmatprep.subr.bf16.mxu0 %v4026_v55 }
 0x193   :  { %v1687_v51 = vadd.f32 %v4539_v8, %v928_v48  ;;  %v930_v53 = vpop.f32.mrb[50].mxu1  ;;  %2895 = vmatprep.mubr.bf16.mxu0 %v1903_v40  ;;  %v4041_v40 = vld [vmem:[#allocation9 + $0x2b4] ss:$8 sps:$4 sm:$0xff]  }
 0x194   :  { %v1694_v54 = vadd.f32 %v4536_v7, %v930_v53  ;;  %v932_v56 = vpop.f32.mrb[51].mxu1  ;;  %2896 = vmatmul.mubr.bf16.gmra.mrb[44].mxu0 %v1902_v39  ;;  %v1814_v63 = vmax.f32 %v1686_v45, 0.0 }
 0x195   :  { %v1695_v57 = vadd.f32 %v4539_v8, %v932_v56  ;;  %2959 = vmatpush1.bf16.msra.mxu0 %v4024_v42  ;;  %v1815_v3 = vmax.f32 %v1687_v51, 0.0  ;;  %v4039_v51 = vld [vmem:[#allocation9 + $0x2b0] ss:$8 sps:$4 sm:$0xff]   ;;  %v4044_v56 = vld [vmem:[#allocation9 + $0x2c4] ss:$8 sps:$4 sm:$0xff]  }
 0x196   :  { %v1822_v12 = vmax.f32 %v1694_v54, 0.0  ;;  %2960 = vmatprep.subr.bf16.mxu0 %v4029_v49 }
 0x197   :  { %v1823_v4 = vmax.f32 %v1695_v57, 0.0 }
 0x198   :  { %v1910_v5 = vpack.c.bf16 %v1822_v12, %v1814_v63 }
 0x199   :  { %v1911_v6 = vpack.c.bf16 %v1823_v4, %v1815_v3  ;;  %v936_v9 = vpop.f32.mrb[52].mxu1  ;;  %2961 = vmatpush1.bf16.msra.mxu0 %v4027_v18  ;;  %v4042_v3 = vld [vmem:[#allocation9 + $0x2c0] ss:$8 sps:$4 sm:$0xff]  }
 0x19a   :  { %v1702_v11 = vadd.f32 %v4536_v7, %v936_v9  ;;  %v938_v15 = vpop.f32.mrb[53].mxu1  ;;  %2962 = vmatprep.subr.bf16.mxu0 %v4032_v60  ;;  %v1606_v9 = vsub.s32 6, %v4431_v36 }
 0x19b   :  { %v1703_v17 = vadd.f32 %v4539_v8, %v938_v15  ;;  %v940_v20 = vpop.f32.mrb[54].mxu1  ;;  %2905 = vmatprep.mubr.bf16.mxu0 %v1911_v6  ;;  %v4047_v6 = vld [vmem:[#allocation9 + $0x2d4] ss:$8 sps:$4 sm:$0xff]   ;;  %v1610_v15 = vsub.s32 7, %v4431_v36 }
 0x19c   :  { %v1710_v21 = vadd.f32 %v4536_v7, %v940_v20  ;;  %v942_v38 = vpop.f32.mrb[55].mxu1  ;;  %2906 = vmatmul.mubr.bf16.gmra.mrb[48].mxu0 %v1910_v5  ;;  %v1830_v24 = vmax.f32 %v1702_v11, 0.0 }
 0x19d   :  { %v1711_v23 = vadd.f32 %v4539_v8, %v942_v38  ;;  %2963 = vmatpush1.bf16.msra.mxu0 %v4030_v10  ;;  %v1831_v27 = vmax.f32 %v1703_v17, 0.0 }
 0x19e   :  { %v1838_v25 = vmax.f32 %v1710_v21, 0.0  ;;  %2964 = vmatprep.subr.bf16.mxu0 %v4035_v62  ;;  %v4045_v21 = vld [vmem:[#allocation9 + $0x2d0] ss:$8 sps:$4 sm:$0xff]  }
 0x19f   :  { %v1839_v28 = vmax.f32 %v1711_v23, 0.0 }
 0x1a0   :  { %v1918_v29 = vpack.c.bf16 %v1838_v25, %v1830_v24  ;;  %v4599_v24 = vrot.slane %v4439_v1, %v1606_v9  ;;  %v4057_v9 = vld [vmem:[#allocation9 + $0x310] ss:$8 sps:$4 sm:$0xff]  }
 0x1a1   :  { %v1919_v30 = vpack.c.bf16 %v1839_v28, %v1831_v27  ;;  %v946_v55 = vpop.f32.mrb[56].mxu1  ;;  %2965 = vmatpush1.bf16.msra.mxu0 %v4033_v43  ;;  %v4050_v43 = vld [vmem:[#allocation9 + $0x2e4] ss:$8 sps:$4 sm:$0xff]   ;;  %v4602_v27 = vrot.slane %v4439_v1, %v1610_v15 }
 0x1a2   :  { %v1718_v34 = vadd.f32 %v4536_v7, %v946_v55  ;;  %v948_v39 = vpop.f32.mrb[57].mxu1  ;;  %2966 = vmatprep.subr.bf16.mxu0 %v4038_v26  ;;  %v4062_v15 = vld [vmem:[#allocation9 + $0x324] ss:$8 sps:$4 sm:$0xff]  }
 0x1a3   :  { %v1719_v41 = vadd.f32 %v4539_v8, %v948_v39  ;;  %v950_v42 = vpop.f32.mrb[58].mxu1  ;;  %2915 = vmatprep.mubr.bf16.mxu0 %v1919_v30 }
 0x1a4   :  { %v1726_v45 = vadd.f32 %v4536_v7, %v950_v42  ;;  %v952_v48 = vpop.f32.mrb[59].mxu1  ;;  %2916 = vmatmul.mubr.bf16.gmra.mrb[52].mxu0 %v1918_v29  ;;  %v1846_v53 = vmax.f32 %v1718_v34, 0.0  ;;  %v4048_v29 = vld [vmem:[#allocation9 + $0x2e0] ss:$8 sps:$4 sm:$0xff]   ;;  %v4051_v42 = vld [vmem:[#allocation9 + $0x2f0] ss:$8 sps:$4 sm:$0xff]  }
 0x1a5   :  { %v1727_v49 = vadd.f32 %v4539_v8, %v952_v48  ;;  %2967 = vmatpush1.bf16.msra.mxu0 %v4036_v33  ;;  %v1847_v57 = vmax.f32 %v1719_v41, 0.0 }
 0x1a6   :  { %v1854_v54 = vmax.f32 %v1726_v45, 0.0  ;;  %2968 = vmatprep.subr.bf16.mxu0 %v4041_v40 }
 0x1a7   :  { %v1855_v18 = vmax.f32 %v1727_v49, 0.0  ;;  %v4056_v49 = vld [vmem:[#allocation9 + $0x304] ss:$8 sps:$4 sm:$0xff]  }
 0x1a8   :  { %v1926_v63 = vpack.c.bf16 %v1854_v54, %v1846_v53 }
 0x1a9   :  { %v1927_v12 = vpack.c.bf16 %v1855_v18, %v1847_v57  ;;  %v956_v60 = vpop.f32.mrb[60].mxu1  ;;  %2969 = vmatpush1.bf16.msra.mxu0 %v4039_v51 }
 0x1aa   :  { %v1734_v4 = vadd.f32 %v4536_v7, %v956_v60  ;;  %v958_v5 = vpop.f32.mrb[61].mxu1  ;;  %2970 = vmatprep.subr.bf16.mxu0 %v4044_v56  ;;  %v4054_v56 = vld [vmem:[#allocation9 + $0x300] ss:$8 sps:$4 sm:$0xff]  }
 0x1ab   :  { %v1735_v10 = vadd.f32 %v4539_v8, %v958_v5  ;;  %v960_v11 = vpop.f32.mrb[62].mxu1  ;;  %2925 = vmatprep.mubr.bf16.mxu0 %v1927_v12 }
 0x1ac   :  { %v1742_v62 = vadd.f32 %v4536_v7, %v960_v11  ;;  %v962_v17 = vpop.f32.mrb[63].mxu1  ;;  %2926 = vmatmul.mubr.bf16.gmra.mrb[56].mxu0 %v1926_v63  ;;  %v1862_v38 = vmax.f32 %v1734_v4, 0.0  ;;  %v4059_v63 = vld [vmem:[#allocation9 + $0x314] ss:$8 sps:$4 sm:$0xff]  }
 0x1ad   :  { %v1743_v20 = vadd.f32 %v4539_v8, %v962_v17  ;;  %2971 = vmatpush1.bf16.msra.mxu0 %v4042_v3  ;;  %v1863_v25 = vmax.f32 %v1735_v10, 0.0  ;;  %v4053_v8 = vld [vmem:[#allocation9 + $0x2f4] ss:$8 sps:$4 sm:$0xff]  }
 0x1ae   :  { %v1870_v23 = vmax.f32 %v1742_v62, 0.0  ;;  %2972 = vmatprep.subr.bf16.mxu0 %v4047_v6 }
 0x1af   :  { %v1871_v26 = vmax.f32 %v1743_v20, 0.0 }
 0x1b0   :  { %v1934_v28 = vpack.c.bf16 %v1870_v23, %v1862_v38  ;;  %v4065_v23 = vld [vmem:[#allocation9 + $0x334] ss:$8 sps:$4 sm:$0xff]  }
 0x1b1   :  { %v1935_v7 = vpack.c.bf16 %v1871_v26, %v1863_v25  ;;  %2973 = vmatpush1.bf16.msra.mxu0 %v4045_v21  ;;  %v1112_v30 = vpop.f32.mrb[64].mxu1  ;;  %v4060_v21 = vld [vmem:[#allocation9 + $0x320] ss:$8 sps:$4 sm:$0xff]  }
 0x1b2   :  { %2974 = vmatprep.subr.bf16.mxu0 %v4050_v43  ;;  %v1626_v55 = vadd.f32 %v4599_v24, %v1112_v30  ;;  %v1114_v33 = vpop.f32.mrb[65].mxu1  ;;  %v4063_v30 = vld [vmem:[#allocation9 + $0x330] ss:$8 sps:$4 sm:$0xff]  }
 0x1b3   :  { %2935 = vmatprep.mubr.bf16.mxu0 %v1935_v7  ;;  %v1627_v34 = vadd.f32 %v4602_v27, %v1114_v33  ;;  %v1116_v39 = vpop.f32.mrb[66].mxu1  ;;  %v4068_v33 = vld [vmem:[#allocation9 + $0x344] ss:$8 sps:$4 sm:$0xff]  }
 0x1b4   :  { %2936 = vmatmul.mubr.bf16.gmra.mrb[60].mxu0 %v1934_v28  ;;  %v1754_v40 = vmax.f32 %v1626_v55, 0.0  ;;  %v1634_v41 = vadd.f32 %v4599_v24, %v1116_v39  ;;  %v1118_v1 = vpop.f32.mrb[67].mxu1 }
 0x1b5   :  { %2975 = vmatpush1.bf16.msra.mxu0 %v4048_v29  ;;  %2978 = vmatprep.mubr.bf16.mxu0 %v4480_v47  ;;  %v1755_v45 = vmax.f32 %v1627_v34, 0.0  ;;  %v1635_v48 = vadd.f32 %v4602_v27, %v1118_v1 }
 0x1b6   :  { %2976 = vmatprep.subr.bf16.mxu0 %v4053_v8  ;;  %v1762_v51 = vmax.f32 %v1634_v41, 0.0  ;;  %v4066_v41 = vld [vmem:[#allocation9 + $0x340] ss:$8 sps:$4 sm:$0xff]  }
 0x1b7   :  { %v1763_v53 = vmax.f32 %v1635_v48, 0.0 }
 0x1b8   :  { %v4609_v54 = vpack.c.bf16 %v1762_v51, %v1754_v40 }
 0x1b9   :  { %2977 = vmatpush1.bf16.msra.mxu0 %v4051_v42  ;;  %v4611_v57 = vpack.c.bf16 %v1763_v53, %v1755_v45  ;;  %v1122_v18 = vpop.f32.mrb[68].mxu1  ;;  %v4071_v42 = vld [vmem:[#allocation9 + $0x354] ss:$8 sps:$4 sm:$0xff]  }
 0x1ba   :  { %3059 = vmatprep.subr.bf16.mxu0 %v4056_v49  ;;  %v1642_v12 = vadd.f32 %v4599_v24, %v1122_v18  ;;  %v1124_v60 = vpop.f32.mrb[69].mxu1  ;;  %v4069_v18 = vld [vmem:[#allocation9 + $0x350] ss:$8 sps:$4 sm:$0xff]  }
 0x1bb   :  { %v1643_v47 = vadd.f32 %v4602_v27, %v1124_v60  ;;  %v1126_v3 = vpop.f32.mrb[70].mxu1  ;;  %v4074_v60 = vld [vmem:[#allocation9 + $0x364] ss:$8 sps:$4 sm:$0xff]  }
 0x1bc   :  { %2979 = vmatmul.mubr.bf16.vlgmr.msra.gmra.mrb[32].mxu0 %v4477_v44  ;;  %v1770_v4 = vmax.f32 %v1642_v12, 0.0  ;;  %v1650_v5 = vadd.f32 %v4599_v24, %v1126_v3  ;;  %v1128_v6 = vpop.f32.mrb[71].mxu1 }
 0x1bd   :  { %3060 = vmatpush1.bf16.msra.mxu0 %v4054_v56  ;;  %2988 = vmatprep.mubr.bf16.mxu0 %v4492_v32  ;;  %v1771_v10 = vmax.f32 %v1643_v47, 0.0  ;;  %v1651_v11 = vadd.f32 %v4602_v27, %v1128_v6 }
 0x1be   :  { %3061 = vmatprep.subr.bf16.mxu0 %v4059_v63  ;;  %v1778_v62 = vmax.f32 %v1650_v5, 0.0  ;;  %v4072_v5 = vld [vmem:[#allocation9 + $0x360] ss:$8 sps:$4 sm:$0xff]  }
 0x1bf   :  { %v1779_v17 = vmax.f32 %v1651_v11, 0.0 }
 0x1c0   :  { %v4619_v20 = vpack.c.bf16 %v1778_v62, %v1770_v4 }
 0x1c1   :  { %3062 = vmatpush1.bf16.msra.mxu0 %v4057_v9  ;;  %v4621_v44 = vpack.c.bf16 %v1779_v17, %v1771_v10  ;;  %v1132_v38 = vpop.f32.mrb[72].mxu1  ;;  %v4077_v9 = vld [vmem:[#allocation9 + $0x374] ss:$8 sps:$4 sm:$0xff]  }
 0x1c2   :  { %3063 = vmatprep.subr.bf16.mxu0 %v4062_v15  ;;  %v1658_v43 = vadd.f32 %v4599_v24, %v1132_v38  ;;  %v1134_v25 = vpop.f32.mrb[73].mxu1  ;;  %v4075_v38 = vld [vmem:[#allocation9 + $0x370] ss:$8 sps:$4 sm:$0xff]  }
 0x1c3   :  { %v1659_v32 = vadd.f32 %v4602_v27, %v1134_v25  ;;  %v1136_v26 = vpop.f32.mrb[74].mxu1  ;;  %v4080_v25 = vld [vmem:[#allocation9 + $0x384] ss:$8 sps:$4 sm:$0xff]  }
 0x1c4   :  { %2989 = vmatmul.mubr.bf16.gmra.mrb[36].mxu0 %v4489_v14  ;;  %v1786_v28 = vmax.f32 %v1658_v43, 0.0  ;;  %v1666_v7 = vadd.f32 %v4599_v24, %v1136_v26  ;;  %v1138_v29 = vpop.f32.mrb[75].mxu1 }
 0x1c5   :  { %3064 = vmatpush1.bf16.msra.mxu0 %v4060_v21  ;;  %2998 = vmatprep.mubr.bf16.mxu0 %v4504_v50  ;;  %v1787_v8 = vmax.f32 %v1659_v32, 0.0  ;;  %v1667_v55 = vadd.f32 %v4602_v27, %v1138_v29 }
 0x1c6   :  { %3065 = vmatprep.subr.bf16.mxu0 %v4065_v23  ;;  %v1794_v34 = vmax.f32 %v1666_v7, 0.0  ;;  %v4078_v7 = vld [vmem:[#allocation9 + $0x380] ss:$8 sps:$4 sm:$0xff]  }
 0x1c7   :  { %v1795_v39 = vmax.f32 %v1667_v55, 0.0 }
 0x1c8   :  { %v4629_v40 = vpack.c.bf16 %v1794_v34, %v1786_v28 }
 0x1c9   :  { %3066 = vmatpush1.bf16.msra.mxu0 %v4063_v30  ;;  %v4631_v14 = vpack.c.bf16 %v1795_v39, %v1787_v8  ;;  %v1142_v1 = vpop.f32.mrb[76].mxu1  ;;  %v4083_v30 = vld [vmem:[#allocation9 + $0x394] ss:$8 sps:$4 sm:$0xff]  }
 0x1ca   :  { %3067 = vmatprep.subr.bf16.mxu0 %v4068_v33  ;;  %v1674_v45 = vadd.f32 %v4599_v24, %v1142_v1  ;;  %v1144_v48 = vpop.f32.mrb[77].mxu1  ;;  %v4081_v1 = vld [vmem:[#allocation9 + $0x390] ss:$8 sps:$4 sm:$0xff]  }
 0x1cb   :  { %v1675_v50 = vadd.f32 %v4602_v27, %v1144_v48  ;;  %v1146_v49 = vpop.f32.mrb[78].mxu1  ;;  %v4086_v48 = vld [vmem:[#allocation9 + $0x3a4] ss:$8 sps:$4 sm:$0xff]  }
 0x1cc   :  { %2999 = vmatmul.mubr.bf16.gmra.mrb[40].mxu0 %v4501_v46  ;;  %v1802_v51 = vmax.f32 %v1674_v45, 0.0  ;;  %v1682_v53 = vadd.f32 %v4599_v24, %v1146_v49  ;;  %v1148_v56 = vpop.f32.mrb[79].mxu1 }
 0x1cd   :  { %3068 = vmatpush1.bf16.msra.mxu0 %v4066_v41  ;;  %3008 = vmatprep.mubr.bf16.mxu0 %v4516_v22  ;;  %v1803_v63 = vmax.f32 %v1675_v50, 0.0  ;;  %v1683_v12 = vadd.f32 %v4602_v27, %v1148_v56 }
 0x1ce   :  { %3069 = vmatprep.subr.bf16.mxu0 %v4071_v42  ;;  %v1810_v47 = vmax.f32 %v1682_v53, 0.0  ;;  %v4084_v53 = vld [vmem:[#allocation9 + $0x3a0] ss:$8 sps:$4 sm:$0xff]  }
 0x1cf   :  { %v1811_v3 = vmax.f32 %v1683_v12, 0.0 }
 0x1d0   :  { %v4639_v4 = vpack.c.bf16 %v1810_v47, %v1802_v51 }
 0x1d1   :  { %3070 = vmatpush1.bf16.msra.mxu0 %v4069_v18  ;;  %v4641_v46 = vpack.c.bf16 %v1811_v3, %v1803_v63  ;;  %v1152_v6 = vpop.f32.mrb[80].mxu1  ;;  %v4089_v18 = vld [vmem:[#allocation9 + $0x3b4] ss:$8 sps:$4 sm:$0xff]  }
 0x1d2   :  { %3071 = vmatprep.subr.bf16.mxu0 %v4074_v60  ;;  %v1690_v10 = vadd.f32 %v4599_v24, %v1152_v6  ;;  %v1154_v11 = vpop.f32.mrb[81].mxu1  ;;  %v4087_v6 = vld [vmem:[#allocation9 + $0x3b0] ss:$8 sps:$4 sm:$0xff]  }
 0x1d3   :  { %v1691_v22 = vadd.f32 %v4602_v27, %v1154_v11  ;;  %v1156_v15 = vpop.f32.mrb[82].mxu1  ;;  %v4092_v11 = vld [vmem:[#allocation9 + $0x3c4] ss:$8 sps:$4 sm:$0xff]  }
 0x1d4   :  { %3009 = vmatmul.mubr.bf16.gmra.mrb[44].mxu0 %v4513_v19  ;;  %v1818_v62 = vmax.f32 %v1690_v10, 0.0  ;;  %v1698_v17 = vadd.f32 %v4599_v24, %v1156_v15  ;;  %v1158_v21 = vpop.f32.mrb[83].mxu1 }
 0x1d5   :  { %3072 = vmatpush1.bf16.msra.mxu0 %v4072_v5  ;;  %3018 = vmatprep.mubr.bf16.mxu0 %v4530_v0  ;;  %v1819_v23 = vmax.f32 %v1691_v22, 0.0  ;;  %v1699_v43 = vadd.f32 %v4602_v27, %v1158_v21 }
 0x1d6   :  { %3073 = vmatprep.subr.bf16.mxu0 %v4077_v9  ;;  %v1826_v32 = vmax.f32 %v1698_v17, 0.0  ;;  %v4090_v17 = vld [vmem:[#allocation9 + $0x3c0] ss:$8 sps:$4 sm:$0xff]  }
 0x1d7   :  { %v1827_v26 = vmax.f32 %v1699_v43, 0.0 }
 0x1d8   :  { %v4649_v28 = vpack.c.bf16 %v1826_v32, %v1818_v62 }
 0x1d9   :  { %3074 = vmatpush1.bf16.msra.mxu0 %v4075_v38  ;;  %v4651_v19 = vpack.c.bf16 %v1827_v26, %v1819_v23  ;;  %v1162_v29 = vpop.f32.mrb[84].mxu1  ;;  %v4095_v38 = vld [vmem:[#allocation9 + $0x3d4] ss:$8 sps:$4 sm:$0xff]  }
 0x1da   :  { %3075 = vmatprep.subr.bf16.mxu0 %v4080_v25  ;;  %v1706_v8 = vadd.f32 %v4599_v24, %v1162_v29  ;;  %v1164_v55 = vpop.f32.mrb[85].mxu1  ;;  %v4093_v29 = vld [vmem:[#allocation9 + $0x3d0] ss:$8 sps:$4 sm:$0xff]  }
 0x1db   :  { %v1707_v0 = vadd.f32 %v4602_v27, %v1164_v55  ;;  %v1166_v33 = vpop.f32.mrb[86].mxu1  ;;  %v4098_v55 = vld [vmem:[#allocation9 + $0x3e4] ss:$8 sps:$4 sm:$0xff]  }
 0x1dc   :  { %3019 = vmatmul.mubr.bf16.gmra.mrb[48].mxu0 %v4527_v59  ;;  %v1834_v34 = vmax.f32 %v1706_v8, 0.0  ;;  %v1714_v39 = vadd.f32 %v4599_v24, %v1166_v33  ;;  %v1168_v41 = vpop.f32.mrb[87].mxu1 }
 0x1dd   :  { %3076 = vmatpush1.bf16.msra.mxu0 %v4078_v7  ;;  %3028 = vmatprep.mubr.bf16.mxu0 %v4548_v31  ;;  %v1835_v42 = vmax.f32 %v1707_v0, 0.0  ;;  %v1715_v45 = vadd.f32 %v4602_v27, %v1168_v41 }
 0x1de   :  { %3077 = vmatprep.subr.bf16.mxu0 %v4083_v30  ;;  %v1842_v50 = vmax.f32 %v1714_v39, 0.0  ;;  %v4096_v39 = vld [vmem:[#allocation9 + $0x3e0] ss:$8 sps:$4 sm:$0xff]  }
 0x1df   :  { %v1843_v49 = vmax.f32 %v1715_v45, 0.0 }
 0x1e0   :  { %v4659_v51 = vpack.c.bf16 %v1842_v50, %v1834_v34 }
 0x1e1   :  { %3078 = vmatpush1.bf16.msra.mxu0 %v4081_v1  ;;  %v4661_v59 = vpack.c.bf16 %v1843_v49, %v1835_v42  ;;  %v1172_v56 = vpop.f32.mrb[88].mxu1 }
 0x1e2   :  { %3079 = vmatprep.subr.bf16.mxu0 %v4086_v48  ;;  %v1722_v63 = vadd.f32 %v4599_v24, %v1172_v56  ;;  %v1174_v12 = vpop.f32.mrb[89].mxu1 }
 0x1e3   :  { %v1723_v31 = vadd.f32 %v4602_v27, %v1174_v12  ;;  %v1176_v60 = vpop.f32.mrb[90].mxu1 }
 0x1e4   :  { %3029 = vmatmul.mubr.bf16.gmra.mrb[52].mxu0 %v4545_v52  ;;  %v1850_v47 = vmax.f32 %v1722_v63, 0.0  ;;  %v1730_v3 = vadd.f32 %v4599_v24, %v1176_v60  ;;  %v1178_v5 = vpop.f32.mrb[91].mxu1 }
 0x1e5   :  { %3080 = vmatpush1.bf16.msra.mxu0 %v4084_v53  ;;  %3038 = vmatprep.mubr.bf16.mxu0 %v4560_v16  ;;  %v1851_v9 = vmax.f32 %v1723_v31, 0.0  ;;  %v1731_v10 = vadd.f32 %v4602_v27, %v1178_v5 }
 0x1e6   :  { %3081 = vmatprep.subr.bf16.mxu0 %v4089_v18  ;;  %v1858_v22 = vmax.f32 %v1730_v3, 0.0 }
 0x1e7   :  { %v1859_v15 = vmax.f32 %v1731_v10, 0.0 }
 0x1e8   :  { %v4669_v62 = vpack.c.bf16 %v1858_v22, %v1850_v47 }
 0x1e9   :  { %3082 = vmatpush1.bf16.msra.mxu0 %v4087_v6  ;;  %v1931_v52 = vpack.c.bf16 %v1859_v15, %v1851_v9  ;;  %v1182_v21 = vpop.f32.mrb[92].mxu1 }
 0x1ea   :  { %3083 = vmatprep.subr.bf16.mxu0 %v4092_v11  ;;  %v1738_v23 = vadd.f32 %v4599_v24, %v1182_v21  ;;  %v1184_v43 = vpop.f32.mrb[93].mxu1 }
 0x1eb   :  { %v1739_v16 = vadd.f32 %v4602_v27, %v1184_v43  ;;  %v1186_v25 = vpop.f32.mrb[94].mxu1 }
 0x1ec   :  { %3039 = vmatmul.mubr.bf16.gmra.mrb[56].mxu0 %v4557_v13  ;;  %v1866_v32 = vmax.f32 %v1738_v23, 0.0  ;;  %v1746_v26 = vadd.f32 %v4599_v24, %v1186_v25  ;;  %v1188_v7 = vpop.f32.mrb[95].mxu1  ;;  %v4101_v13 = vld [vmem:[#allocation9 + $0x3f4] ss:$8 sps:$4 sm:$0xff]   ;;  %v4099_v24 = vld [vmem:[#allocation9 + $0x3f0] ss:$8 sps:$4 sm:$0xff]  }
 0x1ed   :  { %3084 = vmatpush1.bf16.msra.mxu0 %v4090_v17  ;;  %3048 = vmatprep.mubr.bf16.mxu0 %v4572_v2  ;;  %v1867_v30 = vmax.f32 %v1739_v16, 0.0  ;;  %v1747_v8 = vadd.f32 %v4602_v27, %v1188_v7 }
 0x1ee   :  { %3085 = vmatprep.subr.bf16.mxu0 %v4095_v38  ;;  %v1874_v0 = vmax.f32 %v1746_v26, 0.0 }
 0x1ef   :  { %v1875_v33 = vmax.f32 %v1747_v8, 0.0 }
 0x1f0   :  { %v1938_v34 = vpack.c.bf16 %v1874_v0, %v1866_v32 }
 0x1f1   :  { %3086 = vmatpush1.bf16.msra.mxu0 %v4093_v29  ;;  %v1939_v41 = vpack.c.bf16 %v1875_v33, %v1867_v30 }
 0x1f2   :  { %3087 = vmatprep.subr.bf16.mxu0 %v4098_v55 }
 0x1f4   :  { %3049 = vmatmul.mubr.bf16.gmra.mrb[60].mxu0 %v4569_v61 }
 0x1f5   :  { %3088 = vmatpush1.bf16.msra.mxu0 %v4096_v39  ;;  %3091 = vmatprep.mubr.bf16.mxu0 %v4611_v57 }
 0x1f6   :  { %3089 = vmatprep.subr.bf16.mxu0 %v4101_v13 }
 0x1f9   :  { %3090 = vmatpush1.bf16.msra.mxu0 %v4099_v24 }
 0x1fc   :  { %3092 = vmatmul.mubr.bf16.vlgmr.msra.gmra.mrb[32].mxu0 %v4609_v54 }
 0x1fd   :  { %3101 = vmatprep.mubr.bf16.mxu0 %v4621_v44 }
 0x204   :  { %3102 = vmatmul.mubr.bf16.gmra.mrb[36].mxu0 %v4619_v20 }
 0x205   :  { %3111 = vmatprep.mubr.bf16.mxu0 %v4631_v14 }
 0x20c   :  { %3112 = vmatmul.mubr.bf16.gmra.mrb[40].mxu0 %v4629_v40 }
 0x20d   :  { %3121 = vmatprep.mubr.bf16.mxu0 %v4641_v46 }
 0x20f   :  { %v2754_v2 = vpop.f32.mrb[96].mxu1 }
 0x210   :  { %v2756_v61 = vpop.f32.mrb[97].mxu1 }
 0x211   :  { %v2758_v27 = vpop.f32.mrb[98].mxu1 }
 0x212   :  { %v2760_v1 = vpop.f32.mrb[99].mxu1 }
 0x214   :  { %3122 = vmatmul.mubr.bf16.gmra.mrb[44].mxu0 %v4639_v4 }
 0x215   :  { %3131 = vmatprep.mubr.bf16.mxu0 %v4651_v19 }
 0x217   :  { %v2764_v57 = vpop.f32.mrb[100].mxu1 }
 0x218   :  { %v2766_v54 = vpop.f32.mrb[101].mxu1 }
 0x219   :  { %v4687_v42 = vpop.f32.mrb[102].mxu1 }
 0x21a   :  { %v4689_v44 = vpop.f32.mrb[103].mxu1 }
 0x21c   :  { %3132 = vmatmul.mubr.bf16.gmra.mrb[48].mxu0 %v4649_v28 }
 0x21d   :  { %3141 = vmatprep.mubr.bf16.mxu0 %v4661_v59 }
 0x21f   :  { %v4693_v20 = vpop.f32.mrb[104].mxu1 }
 0x220   :  { %v4695_v40 = vpop.f32.mrb[105].mxu1 }
 0x221   :  { %v4697_v14 = vpop.f32.mrb[106].mxu1 }
 0x222   :  { %v4699_v46 = vpop.f32.mrb[107].mxu1 }
 0x224   :  { %3142 = vmatmul.mubr.bf16.gmra.mrb[52].mxu0 %v4659_v51  ;;  %v2068_v51 = vld [vmem:[%s4921_s4] sm:$0x3] }
 0x225   :  { %3151 = vmatprep.mubr.bf16.mxu0 %v1931_v52  ;;  %v4725_v56 = vrot.slane %v2068_v51, %v4434_v58  ;;  %v4730_v63 = vrot.slane %v2068_v51, %v4442_v37 }
 0x227   :  { %v4702_v4 = vpop.f32.mrb[108].mxu1  ;;  %v2755_v17 = vadd.f32 %v2754_v2, %v4725_v56  ;;  %v2757_v52 = vadd.f32 %v2756_v61, %v4730_v63  ;;  %v2759_v38 = vadd.f32 %v2758_v27, %v4725_v56  ;;  %v2761_v25 = vadd.f32 %v2760_v1, %v4730_v63 }
 0x228   :  { %v4704_v19 = vpop.f32.mrb[109].mxu1  ;;  %v2765_v13 = vadd.f32 %v2764_v57, %v4725_v56  ;;  %v2767_v2 = vadd.f32 %v2766_v54, %v4730_v63  ;;  %v2769_v1 = vadd.f32 %v4687_v42, %v4725_v56 }
 0x229   :  { %v4706_v45 = vpop.f32.mrb[110].mxu1 }
 0x22a   :  { %v4708_v28 = vpop.f32.mrb[111].mxu1 }
 0x22c   :  { %3152 = vmatmul.mubr.bf16.gmra.mrb[56].mxu0 %v4669_v62  ;;  %v3204_v62 = vld [vmem:[%s4922_s5] sm:$0x3]  ;;  %s4268_s5 = smov [#allocation10]  }
 0x22d   :  { %3161 = vmatprep.mubr.bf16.mxu0 %v1939_v41  ;;  %v4761_v16 = vrot.slane %v3204_v62, %v4434_v58  ;;  %v4765_v7 = vrot.slane %v3204_v62, %v4442_v37  ;;  %s3553_s19 = sshll.u32 %s4268_s5, 4  ;;  %s3554_s19 = int_to_ptr.vmem [resolvable:$true] %s3553_s19 }
 0x22e   :  { %s4232_s20 = scalar_lea.vmem %s3554_s19, 16  ;;  %s4236_s21 = scalar_lea.vmem %s3554_s19, 32 }
 0x22f   :  { %v4711_v48 = vpop.f32.mrb[112].mxu1  ;;  %p4233_p10 = scmp.ne.s32.totalorder %s3554_s19, %s4232_s20  ;;  %p4237_p11 = scmp.lt.s32.totalorder %s3554_s19, %s3554_s19 }
 0x230   :  { %v4713_v50 = vpop.f32.mrb[113].mxu1  ;;  %p4238_p12 = scmp.lt.s32.totalorder %s4236_s21, %s4232_s20 }
 0x231   :  { %v4715_v49 = vpop.f32.mrb[114].mxu1 }
 0x232   :  { %v4717_v53 = vpop.f32.mrb[115].mxu1  ;;  %p4239_p13 = por %p4238_p12, %p4237_p11 }
 0x234   :  { %3162 = vmatmul.mubr.bf16.gmra.mrb[60].mxu0 %v1938_v34  ;;  %p4240_p0 = pnand %p4239_p13, %p4233_p10 }
 0x237   :  { %v4722_v59 = vpop.f32.mrb[116].mxu1 }
 0x238   :  { %v4727_v18 = vpop.f32.mrb[117].mxu1 }
 0x239   :  { %v2808_v12 = vpop.f32.mrb[118].mxu1 }
 0x23a   :  { %v4733_v31 = vadd.f32 %v2808_v12, %v4725_v56  ;;  %v2810_v60 = vpop.f32.mrb[119].mxu1 }
 0x23b   :  { %v4736_v47 = vadd.f32 %v2810_v60, %v4730_v63  ;;  %v2771_v60 = vadd.f32 %v4689_v44, %v4730_v63 }
 0x23f   :  { %v4738_v3 = vpop.f32.mrb[120].mxu1 }
 0x240   :  { %v4740_v5 = vpop.f32.mrb[121].mxu1 }
 0x241   :  { %v4742_v6 = vpop.f32.mrb[122].mxu1 }
 0x242   :  { %v4744_v9 = vpop.f32.mrb[123].mxu1 }
 0x247   :  { %v4746_v10 = vpop.f32.mrb[124].mxu1 }
 0x248   :  { %v4748_v11 = vpop.f32.mrb[125].mxu1 }
 0x249   :  { %v4750_v22 = vpop.f32.mrb[126].mxu1 }
 0x24a   :  { %v4752_v15 = vpop.f32.mrb[127].mxu1 }
 0x2cf   :  { %v3093_v21 = vpop.f32.mrb[32].mxu0 }
 0x2d0   :  { %v3772_v23 = vadd.f32 %v3093_v21, %v2755_v17  ;;  %v3095_v43 = vpop.f32.mrb[33].mxu0 }
 0x2d1   :  { %v3774_v32 = vadd.f32 %v3095_v43, %v2757_v52  ;;  %v3097_v26 = vpop.f32.mrb[34].mxu0 }
 0x2d2   :  { %v3172_v29 = vmax.f32 %v3772_v23, 0.0  ;;  %v3776_v30 = vadd.f32 %v3097_v26, %v2759_v38  ;;  %v3099_v8 = vpop.f32.mrb[35].mxu0  ;;  %v2775_v26 = vadd.f32 %v4693_v20, %v4725_v56 }
 0x2d3   :  { %v3173_v55 = vmax.f32 %v3774_v32, 0.0  ;;  %v3778_v0 = vadd.f32 %v3099_v8, %v2761_v25 }
 0x2d4   :  { %v3174_v33 = vmax.f32 %v3776_v30, 0.0  ;;  %v3216_v34 = vmul.f32 %v4761_v16, %v3172_v29  ;;  %v2777_v29 = vadd.f32 %v4695_v40, %v4730_v63 }
 0x2d5   :  { %v3175_v39 = vmax.f32 %v3778_v0, 0.0  ;;  %v3217_v41 = vmul.f32 %v4765_v7, %v3173_v55  ;;  %v2779_v0 = vadd.f32 %v4697_v14, %v4725_v56 }
 0x2d6   :  { %v3218_v24 = vmul.f32 %v4761_v16, %v3174_v33 }
 0x2d7   :  { %v3219_v37 = vmul.f32 %v4765_v7, %v3175_v39  ;;  %v3103_v61 = vpop.f32.mrb[36].mxu0  ;;  %v3248_v27 = vadd.f32 %v3217_v41, %v3216_v34  ;;  %v2781_v39 = vadd.f32 %v4699_v46, %v4730_v63 }
 0x2d8   :  { %v3780_v51 = vadd.f32 %v3103_v61, %v2765_v13  ;;  %v3105_v12 = vpop.f32.mrb[37].mxu0 }
 0x2d9   :  { %v3782_v62 = vadd.f32 %v3105_v12, %v2767_v2  ;;  %v3107_v17 = vpop.f32.mrb[38].mxu0  ;;  %3249 = vadd.xlane.f32.xlu0 %v3248_v27  ;;  %v3251_v57 = vadd.f32 %v3219_v37, %v3218_v24  ;;  %v2785_v12 = vadd.f32 %v4702_v4, %v4725_v56 }
 0x2da   :  { %v3176_v52 = vmax.f32 %v3780_v51, 0.0  ;;  %v3784_v21 = vadd.f32 %v3107_v17, %v2769_v1  ;;  %v3109_v38 = vpop.f32.mrb[39].mxu0 }
 0x2db   :  { %v3177_v54 = vmax.f32 %v3782_v62, 0.0  ;;  %v3786_v23 = vadd.f32 %v3109_v38, %v2771_v60  ;;  %v2787_v60 = vadd.f32 %v4704_v19, %v4730_v63 }
 0x2dc   :  { %v3178_v43 = vmax.f32 %v3784_v21, 0.0  ;;  %v3220_v25 = vmul.f32 %v4761_v16, %v3176_v52  ;;  %v2789_v52 = vadd.f32 %v4706_v45, %v4725_v56 }
 0x2dd   :  { %v3179_v32 = vmax.f32 %v3786_v23, 0.0  ;;  %3252 = vadd.xlane.f32.xlu0 %v3251_v57  ;;  %v3221_v42 = vmul.f32 %v4765_v7, %v3177_v54  ;;  %v2791_v54 = vadd.f32 %v4708_v28, %v4730_v63 }
 0x2de   :  { %v3222_v44 = vmul.f32 %v4761_v16, %v3178_v43 }
 0x2df   :  { %v3223_v30 = vmul.f32 %v4765_v7, %v3179_v32  ;;  %v3113_v8 = vpop.f32.mrb[40].mxu0  ;;  %v3254_v55 = vadd.f32 %v3221_v42, %v3220_v25 }
 0x2e0   :  { %v3788_v33 = vadd.f32 %v3113_v8, %v2775_v26  ;;  %v3115_v34 = vpop.f32.mrb[41].mxu0  ;;  %v2795_v8 = vadd.f32 %v4711_v48, %v4725_v56 }
 0x2e1   :  { %v3790_v41 = vadd.f32 %v3115_v34, %v2777_v29  ;;  %v3117_v13 = vpop.f32.mrb[42].mxu0  ;;  %3255 = vadd.xlane.f32.xlu1 %v3254_v55  ;;  %v3257_v20 = vadd.f32 %v3223_v30, %v3222_v44  ;;  %v2797_v55 = vadd.f32 %v4713_v50, %v4730_v63 }
 0x2e2   :  { %v3180_v24 = vmax.f32 %v3788_v33, 0.0  ;;  %v3792_v2 = vadd.f32 %v3117_v13, %v2779_v0  ;;  %v3119_v37 = vpop.f32.mrb[43].mxu0 }
 0x2e3   :  { %v3181_v40 = vmax.f32 %v3790_v41, 0.0  ;;  %v3794_v61 = vadd.f32 %v3119_v37, %v2781_v39  ;;  %v2799_v39 = vadd.f32 %v4715_v49, %v4725_v56 }
 0x2e4   :  { %v3224_v27 = vmul.f32 %v4761_v16, %v3180_v24  ;;  %v3182_v1 = vmax.f32 %v3792_v2, 0.0 }
 0x2e5   :  { %v3225_v51 = vmul.f32 %v4765_v7, %v3181_v40  ;;  %v3183_v14 = vmax.f32 %v3794_v61, 0.0  ;;  %3258 = vadd.xlane.f32.xlu1 %v3257_v20  ;;  %v2801_v20 = vadd.f32 %v4717_v53, %v4730_v63 }
 0x2e6   :  { %v3226_v46 = vmul.f32 %v4761_v16, %v3182_v1 }
 0x2e7   :  { %v3227_v62 = vmul.f32 %v4765_v7, %v3183_v14  ;;  %v3123_v17 = vpop.f32.mrb[44].mxu0  ;;  %v3260_v57 = vadd.f32 %v3225_v51, %v3224_v27 }
 0x2e8   :  { %v3796_v21 = vadd.f32 %v3123_v17, %v2785_v12  ;;  %v3125_v38 = vpop.f32.mrb[45].mxu0  ;;  %v2805_v12 = vadd.f32 %v4722_v59, %v4725_v56 }
 0x2e9   :  { %v3798_v23 = vadd.f32 %v3125_v38, %v2787_v60  ;;  %v3127_v43 = vpop.f32.mrb[46].mxu0  ;;  %3261 = vadd.xlane.f32.xlu0 %v3260_v57  ;;  %v3263_v4 = vadd.f32 %v3227_v62, %v3226_v46  ;;  %v2807_v46 = vadd.f32 %v4727_v18, %v4730_v63 }
 0x2ea   :  { %v3184_v25 = vmax.f32 %v3796_v21, 0.0  ;;  %v3800_v32 = vadd.f32 %v3127_v43, %v2789_v52  ;;  %v3129_v42 = vpop.f32.mrb[47].mxu0 }
 0x2eb   :  { %v3185_v19 = vmax.f32 %v3798_v23, 0.0  ;;  %v3802_v26 = vadd.f32 %v3129_v42, %v2791_v54  ;;  %3264 = vadd.xlane.f32.xlu1 %v3263_v4  ;;  %v3296_v54 = vld [vmem:[#allocation3] sm:$0x1] }
 0x2ec   :  { %v3228_v44 = vmul.f32 %v4761_v16, %v3184_v25  ;;  %v3186_v29 = vmax.f32 %v3800_v32, 0.0 }
 0x2ed   :  { %v3229_v45 = vmul.f32 %v4765_v7, %v3185_v19  ;;  %v3187_v30 = vmax.f32 %v3802_v26, 0.0 }
 0x2ee   :  { %v3230_v28 = vmul.f32 %v4761_v16, %v3186_v29 }
 0x2ef   :  { %v3231_v0 = vmul.f32 %v4765_v7, %v3187_v30  ;;  %v3133_v33 = vpop.f32.mrb[48].mxu0  ;;  %v3266_v34 = vadd.f32 %v3229_v45, %v3228_v44  ;;  %v2815_v44 = vadd.f32 %v4738_v3, %v4725_v56 }
 0x2f0   :  { %v3804_v41 = vadd.f32 %v3133_v33, %v2795_v8  ;;  %v3135_v13 = vpop.f32.mrb[49].mxu0  ;;  %v2819_v8 = vadd.f32 %v4742_v6, %v4725_v56 }
 0x2f1   :  { %v3806_v24 = vadd.f32 %v3135_v13, %v2797_v55  ;;  %v3137_v2 = vpop.f32.mrb[50].mxu0  ;;  %3267 = vadd.xlane.f32.xlu0 %v3266_v34  ;;  %v3269_v48 = vadd.f32 %v3231_v0, %v3230_v28  ;;  %v2821_v0 = vadd.f32 %v4744_v9, %v4730_v63 }
 0x2f2   :  { %v3188_v37 = vmax.f32 %v3804_v41, 0.0  ;;  %v3808_v40 = vadd.f32 %v3137_v2, %v2799_v39  ;;  %v3139_v61 = vpop.f32.mrb[51].mxu0 }
 0x2f3   :  { %v3189_v50 = vmax.f32 %v3806_v24, 0.0  ;;  %v3810_v27 = vadd.f32 %v3139_v61, %v2801_v20 }
 0x2f4   :  { %v3232_v1 = vmul.f32 %v4761_v16, %v3188_v37  ;;  %v3190_v51 = vmax.f32 %v3808_v40, 0.0  ;;  %v2825_v37 = vadd.f32 %v4746_v10, %v4725_v56  ;;  %v2827_v40 = vadd.f32 %v4748_v11, %v4730_v63 }
 0x2f5   :  { %v3233_v14 = vmul.f32 %v4765_v7, %v3189_v50  ;;  %v3191_v49 = vmax.f32 %v3810_v27, 0.0  ;;  %3270 = vadd.xlane.f32.xlu0 %v3269_v48 }
 0x2f6   :  { %v3234_v53 = vmul.f32 %v4761_v16, %v3190_v51 }
 0x2f7   :  { %v3235_v60 = vmul.f32 %v4765_v7, %v3191_v49  ;;  %v3143_v62 = vpop.f32.mrb[52].mxu0  ;;  %v3272_v17 = vadd.f32 %v3233_v14, %v3232_v1  ;;  %v2829_v1 = vadd.f32 %v4750_v22, %v4725_v56  ;;  %v2831_v49 = vadd.f32 %v4752_v15, %v4730_v63 }
 0x2f8   :  { %v3812_v57 = vadd.f32 %v3143_v62, %v2805_v12  ;;  %v3145_v52 = vpop.f32.mrb[53].mxu0 }
 0x2f9   :  { %v3814_v21 = vadd.f32 %v3145_v52, %v2807_v46  ;;  %v3147_v38 = vpop.f32.mrb[54].mxu0  ;;  %3273 = vadd.xlane.f32.xlu0 %v3272_v17  ;;  %v3275_v23 = vadd.f32 %v3235_v60, %v3234_v53 }
 0x2fa   :  { %v3192_v43 = vmax.f32 %v3812_v57, 0.0  ;;  %v3816_v4 = vadd.f32 %v3147_v38, %v4733_v31  ;;  %v3149_v59 = vpop.f32.mrb[55].mxu0  ;;  %v2817_v31 = vadd.f32 %v4740_v5, %v4730_v63 }
 0x2fb   :  { %v3193_v25 = vmax.f32 %v3814_v21, 0.0  ;;  %v3818_v32 = vadd.f32 %v3149_v59, %v4736_v47 }
 0x2fc   :  { %v3236_v18 = vmul.f32 %v4761_v16, %v3192_v43  ;;  %v3194_v42 = vmax.f32 %v3816_v4, 0.0  ;;  %3299 = vperm.xlu1 %3908, %v3296_v54  }
 0x2fd   :  { %v3237_v19 = vmul.f32 %v4765_v7, %v3193_v25  ;;  %v3195_v26 = vmax.f32 %v3818_v32, 0.0  ;;  %3276 = vadd.xlane.f32.xlu0 %v3275_v23 }
 0x2fe   :  { %v3238_v29 = vmul.f32 %v4761_v16, %v3194_v42 }
 0x2ff   :  { %v3239_v45 = vmul.f32 %v4765_v7, %v3195_v26  ;;  %v3153_v30 = vpop.f32.mrb[56].mxu0  ;;  %v3278_v47 = vadd.f32 %v3237_v19, %v3236_v18 }
 0x300   :  { %v3820_v28 = vadd.f32 %v3153_v30, %v2815_v44  ;;  %v3155_v55 = vpop.f32.mrb[57].mxu0 }
 0x301   :  { %v3822_v33 = vadd.f32 %v3155_v55, %v2817_v31  ;;  %v3157_v34 = vpop.f32.mrb[58].mxu0  ;;  %3279 = vadd.xlane.f32.xlu0 %v3278_v47  ;;  %v3281_v3 = vadd.f32 %v3239_v45, %v3238_v29 }
 0x302   :  { %v3196_v39 = vmax.f32 %v3820_v28, 0.0  ;;  %v3824_v41 = vadd.f32 %v3157_v34, %v2819_v8  ;;  %v3159_v13 = vpop.f32.mrb[59].mxu0 }
 0x303   :  { %v3197_v5 = vmax.f32 %v3822_v33, 0.0  ;;  %v3826_v20 = vadd.f32 %v3159_v13, %v2821_v0 }
 0x304   :  { %v3240_v24 = vmul.f32 %v4761_v16, %v3196_v39  ;;  %v3198_v2 = vmax.f32 %v3824_v41, 0.0 }
 0x305   :  { %v3241_v48 = vmul.f32 %v4765_v7, %v3197_v5  ;;  %v3199_v6 = vmax.f32 %v3826_v20, 0.0 }
 0x306   :  { %v3242_v9 = vmul.f32 %v4761_v16, %v3198_v2 }
 0x307   :  { %v3243_v61 = vmul.f32 %v4765_v7, %v3199_v6  ;;  %v3163_v50 = vpop.f32.mrb[60].mxu0  ;;  %v3284_v27 = vadd.f32 %v3241_v48, %v3240_v24 }
 0x308   :  { %v3828_v51 = vadd.f32 %v3163_v50, %v2825_v37  ;;  %v3165_v14 = vpop.f32.mrb[61].mxu0 }
 0x309   :  { %v3830_v12 = vadd.f32 %v3165_v14, %v2827_v40  ;;  %3285 = vadd.xlane.f32.xlu0 %v3284_v27  ;;  %v3167_v10 = vpop.f32.mrb[62].mxu0  ;;  %v3287_v53 = vadd.f32 %v3243_v61, %v3242_v9 }
 0x30a   :  { %v3200_v46 = vmax.f32 %v3828_v51, 0.0  ;;  %v3832_v60 = vadd.f32 %v3167_v10, %v2829_v1  ;;  %v3169_v62 = vpop.f32.mrb[63].mxu0  ;;  %v4866_v51 = vand.u32 127, %v1580_v35 }
 0x30b   :  { %v3201_v11 = vmax.f32 %v3830_v12, 0.0  ;;  %v3834_v17 = vadd.f32 %v3169_v62, %v2831_v49 }
 0x30c   :  { %v3244_v57 = vmul.f32 %v4761_v16, %v3200_v46  ;;  %v3202_v52 = vmax.f32 %v3832_v60, 0.0 }
 0x30d   :  { %v3245_v21 = vmul.f32 %v4765_v7, %v3201_v11  ;;  %v3203_v56 = vmax.f32 %v3834_v17, 0.0  ;;  %3288 = vadd.xlane.f32.xlu0 %v3287_v53  ;;  %v3440_v11 = vadd.s32 4294967288, %v4866_v51 }
 0x30e   :  { %v3246_v22 = vmul.f32 %v4761_v16, %v3202_v52 }
 0x30f   :  { %v3247_v63 = vmul.f32 %v4765_v7, %v3203_v56  ;;  %v3290_v15 = vadd.f32 %v3245_v21, %v3244_v57 }
 0x311   :  { %3291 = vadd.xlane.f32.xlu0 %v3290_v15  ;;  %v3293_v38 = vadd.f32 %v3247_v63, %v3246_v22  ;;  %v3447_v22 = vadd.s32 4294967280, %v4866_v51 }
 0x315   :  { %3294 = vadd.xlane.f32.xlu0 %v3293_v38  ;;  %v3438_v38 = vsub.s32 %v4866_v51, %v4431_v36 }
 0x320   :  { %3282 = vadd.xlane.f32.xlu1 %v3281_v3 }
 0x366   :  { %v3250_v54 = vpop.xlane.xlu0 %3249 }
 0x36a   :  { %v3253_v43 = vpop.xlane.xlu0 %3252 }
 0x36e   :  { %v3256_v23 = vpop.xlane.xlu1 %3255 }
 0x372   :  { %v3259_v4 = vpop.xlane.xlu1 %3258 }
 0x376   :  { %v3262_v59 = vpop.xlane.xlu0 %3261 }
 0x378   :  { %v3265_v25 = vpop.xlane.xlu1 %3264 }
 0x37c   :  { %v3300_v18 = vpop.permute.xlu1 %3299 }
 0x37d   :  { %v4852_v19 = vrot.slane %v3300_v18, %v4434_v58  ;;  %v3450_v18 = vsub.s32 %v3447_v22, %v4431_v36 }
 0x37e   :  { %v3268_v32 = vpop.xlane.xlu0 %3267 }
 0x37f   :  { %v3306_v7 = vadd.f32 %v4852_v19, %v3250_v54  ;;  %v3307_v26 = vadd.f32 %v4852_v19, %v3253_v43  ;;  %v3308_v29 = vadd.f32 %v4852_v19, %v3256_v23  ;;  %v3309_v47 = vadd.f32 %v4852_v19, %v3259_v4 }
 0x380   :  { %v3310_v28 = vadd.f32 %v4852_v19, %v3262_v59  ;;  %v3311_v0 = vadd.f32 %v4852_v19, %v3265_v25  ;;  %v3312_v34 = vadd.f32 %v4852_v19, %v3268_v32  ;;  %v3443_v54 = vsub.s32 %v3440_v11, %v4431_v36 }
 0x381   :  { %v3755_v31 = vmul.f32 -1.442695, %v3306_v7  ;;  %v3756_v45 = vmul.f32 -1.442695, %v3307_v26  ;;  %v3757_v30 = vmul.f32 -1.442695, %v3308_v29 }
 0x382   :  { %v3271_v42 = vpop.xlane.xlu0 %3270  ;;  %v3758_v58 = vmul.f32 -1.442695, %v3309_v47  ;;  %v3759_v33 = vmul.f32 -1.442695, %v3310_v28  ;;  %v3760_v13 = vmul.f32 -1.442695, %v3311_v0 }
 0x383   :  { %4102 = vpow2.f32 %v3755_v31  ;;  %v3761_v5 = vmul.f32 -1.442695, %v3312_v34  ;;  %v3313_v20 = vadd.f32 %v4852_v19, %v3271_v42  ;;  %v3454_v42 = vadd.s32 4294967272, %v4866_v51 }
 0x384   :  { %4104 = vpow2.f32 %v3756_v45 }
 0x385   :  { %4106 = vpow2.f32 %v3757_v30  ;;  %v3762_v40 = vmul.f32 -1.442695, %v3313_v20 }
 0x386   :  { %v3274_v16 = vpop.xlane.xlu0 %3273  ;;  %4108 = vpow2.f32 %v3758_v58  ;;  %v3457_v58 = vsub.s32 %v3454_v42, %v4431_v36  ;;  %v3531_v42 = vadd.s32 4294967184, %v4866_v51 }
 0x387   :  { %4110 = vpow2.f32 %v3759_v33  ;;  %v3314_v6 = vadd.f32 %v4852_v19, %v3274_v16  ;;  %v3468_v33 = vadd.s32 4294967256, %v4866_v51 }
 0x388   :  { %4112 = vpow2.f32 %v3760_v13 }
 0x389   :  { %4114 = vpow2.f32 %v3761_v5  ;;  %v3763_v27 = vmul.f32 -1.442695, %v3314_v6  ;;  %v3471_v6 = vsub.s32 %v3468_v33, %v4431_v36 }
 0x38a   :  { %v3277_v44 = vpop.xlane.xlu0 %3276 }
 0x38b   :  { %v3315_v9 = vadd.f32 %v4852_v19, %v3277_v44 }
 0x38d   :  { %v4103_v39 = vpop.eup %4102  ;;  %v3764_v14 = vmul.f32 -1.442695, %v3315_v9 }
 0x38e   :  { %v3280_v8 = vpop.xlane.xlu0 %3279  ;;  %v4105_v41 = vpop.eup %4104  ;;  %v3370_v24 = vadd.f32 1.0, %v4103_v39  ;;  %v3475_v39 = vadd.s32 4294967248, %v4866_v51 }
 0x38f   :  { %v4107_v2 = vpop.eup %4106  ;;  %v3371_v48 = vadd.f32 1.0, %v4105_v41  ;;  %v3316_v61 = vadd.f32 %v4852_v19, %v3280_v8 }
 0x390   :  { %v3372_v50 = vadd.f32 1.0, %v4107_v2  ;;  %4116 = vrcp.f32 %v3370_v24  ;;  %v4109_v1 = vpop.eup %4108 }
 0x391   :  { %4118 = vrcp.f32 %v3371_v48  ;;  %v3765_v12 = vmul.f32 -1.442695, %v3316_v61  ;;  %v4111_v46 = vpop.eup %4110  ;;  %v3373_v60 = vadd.f32 1.0, %v4109_v1  ;;  %v3478_v1 = vsub.s32 %v3475_v39, %v4431_v36 }
 0x392   :  { %4120 = vpow2.f32 %v3762_v40  ;;  %v4113_v52 = vpop.eup %4112  ;;  %v3374_v21 = vadd.f32 1.0, %v4111_v46 }
 0x393   :  { %4122 = vrcp.f32 %v3372_v50  ;;  %v4115_v56 = vpop.eup %4114  ;;  %v3375_v4 = vadd.f32 1.0, %v4113_v52 }
 0x394   :  { %4124 = vpow2.f32 %v3763_v27  ;;  %v3376_v16 = vadd.f32 1.0, %v4115_v56 }
 0x395   :  { %4126 = vpow2.f32 %v3764_v14 }
 0x396   :  { %v3286_v55 = vpop.xlane.xlu0 %3285  ;;  %4128 = vpow2.f32 %v3765_v12  ;;  %v3489_v12 = vadd.s32 4294967232, %v4866_v51 }
 0x397   :  { %v3318_v49 = vadd.f32 %v4852_v19, %v3286_v55  ;;  %4130 = vrcp.f32 %v3373_v60 }
 0x398   :  { %v3492_v22 = vsub.s32 %v3489_v12, %v4431_v36 }
 0x399   :  { %v3767_v17 = vmul.f32 -1.442695, %v3318_v49  ;;  %v3482_v49 = vadd.s32 4294967240, %v4866_v51 }
 0x39a   :  { %v3289_v3 = vpop.xlane.xlu0 %3288  ;;  %v4117_v15 = vpop.eup %4116 }
 0x39b   :  { %v3319_v10 = vadd.f32 %v4852_v19, %v3289_v3  ;;  %4132 = vpow2.f32 %v3767_v17  ;;  %v4119_v43 = vpop.eup %4118  ;;  %v3439_v26 = vrot.slane %v4117_v15, %v3438_v38  ;;  %v3496_v17 = vadd.s32 4294967224, %v4866_v51 }
 0x39c   :  { %v4121_v32 = vpop.eup %4120  ;;  %v3444_v44 = vrot.slane %v4119_v43, %v3443_v54  ;;  %v3485_v52 = vsub.s32 %v3482_v49, %v4431_v36  ;;  %v3510_v38 = vadd.s32 4294967208, %v4866_v51 }
 0x39d   :  { %v3768_v57 = vmul.f32 -1.442695, %v3319_v10  ;;  %v4123_v7 = vpop.eup %4122  ;;  %v3377_v8 = vadd.f32 1.0, %v4121_v32  ;;  %v3499_v15 = vsub.s32 %v3496_v17, %v4431_v36  ;;  %v3524_v32 = vadd.s32 4294967192, %v4866_v51 }
 0x39e   :  { %v3292_v37 = vpop.xlane.xlu0 %3291  ;;  %v4125_v31 = vpop.eup %4124  ;;  %v3451_v47 = vrot.slane %v4123_v7, %v3450_v18  ;;  %v3446_v28 = vsel %vm3445_vm0, %v3444_v44, %v3439_v26  ;;  %v3513_v26 = vsub.s32 %v3510_v38, %v4431_v36  ;;  %v3538_v44 = vadd.s32 4294967176, %v4866_v51 }
 0x39f   :  { %v3320_v62 = vadd.f32 %v4852_v19, %v3292_v37  ;;  %4134 = vpow2.f32 %v3768_v57  ;;  %v4127_v45 = vpop.eup %4126  ;;  %v3378_v55 = vadd.f32 1.0, %v4125_v31 }
 0x3a0   :  { %4136 = vrcp.f32 %v3374_v21  ;;  %v4129_v30 = vpop.eup %4128  ;;  %v3379_v34 = vadd.f32 1.0, %v4127_v45  ;;  %v3453_v5 = vsel %vm3452_vm1, %v3451_v47, %v3446_v28  ;;  %v3527_v47 = vsub.s32 %v3524_v32, %v4431_v36 }
 0x3a1   :  { %v3769_v63 = vmul.f32 -1.442695, %v3320_v62  ;;  %v4131_v0 = vpop.eup %4130  ;;  %v3380_v41 = vadd.f32 1.0, %v4129_v30  ;;  %v3534_v28 = vsub.s32 %v3531_v42, %v4431_v36 }
 0x3a2   :  { %v3295_v53 = vpop.xlane.xlu0 %3294  ;;  %v3458_v2 = vrot.slane %v4131_v0, %v3457_v58 }
 0x3a3   :  { %v3321_v35 = vadd.f32 %v4852_v19, %v3295_v53  ;;  %4138 = vpow2.f32 %v3769_v63 }
 0x3a4   :  { %v3460_v40 = vsel %vm3459_vm2, %v3458_v2, %v3453_v5 }
 0x3a5   :  { %v3770_v23 = vmul.f32 -1.442695, %v3321_v35  ;;  %v4133_v3 = vpop.eup %4132  ;;  %v3503_v35 = vadd.s32 4294967216, %v4866_v51 }
 0x3a6   :  { %v3382_v37 = vadd.f32 1.0, %v4133_v3 }
 0x3a7   :  { %4140 = vpow2.f32 %v3770_v23  ;;  %v3506_v43 = vsub.s32 %v3503_v35, %v4431_v36 }
 0x3a8   :  { %4142 = vrcp.f32 %v3375_v4  ;;  %v3517_v4 = vadd.s32 4294967200, %v4866_v51 }
 0x3a9   :  { %v4135_v13 = vpop.eup %4134 }
 0x3aa   :  { %v4137_v24 = vpop.eup %4136  ;;  %v3383_v61 = vadd.f32 1.0, %v4135_v13  ;;  %v3520_v45 = vsub.s32 %v3517_v4, %v4431_v36 }
 0x3ad   :  { %v3283_v59 = vpop.xlane.xlu1 %3282  ;;  %v4139_v48 = vpop.eup %4138 }
 0x3ae   :  { %v3317_v25 = vadd.f32 %v4852_v19, %v3283_v59  ;;  %v3461_v19 = vadd.s32 4294967264, %v4866_v51  ;;  %v3384_v10 = vadd.f32 1.0, %v4139_v48  ;;  %v3541_v51 = vsub.s32 %v3538_v44, %v4431_v36 }
 0x3b0   :  { %v3766_v29 = vmul.f32 -1.442695, %v3317_v25  ;;  %v3464_v20 = vsub.s32 %v3461_v19, %v4431_v36 }
 0x3b1   :  { %v4141_v9 = vpop.eup %4140 }
 0x3b2   :  { %4144 = vpow2.f32 %v3766_v29  ;;  %v4143_v50 = vpop.eup %4142  ;;  %v3465_v27 = vrot.slane %v4137_v24, %v3464_v20  ;;  %v3385_v46 = vadd.f32 1.0, %v4141_v9 }
 0x3b3   :  { %4146 = vrcp.f32 %v3376_v16  ;;  %v3472_v11 = vrot.slane %v4143_v50, %v3471_v6 }
 0x3b4   :  { %4148 = vrcp.f32 %v3377_v8  ;;  %v3467_v53 = vsel %vm3466_vm3, %v3465_v27, %v3460_v40 }
 0x3b5   :  { %4150 = vrcp.f32 %v3378_v55  ;;  %v3474_v57 = vsel %vm3473_vm4, %v3472_v11, %v3467_v53 }
 0x3b6   :  { %4152 = vrcp.f32 %v3379_v34 }
 0x3b7   :  { %4154 = vrcp.f32 %v3380_v41 }
 0x3b8   :  { %4156 = vrcp.f32 %v3382_v37 }
 0x3b9   :  { %4158 = vrcp.f32 %v3383_v61 }
 0x3bc   :  { %v4145_v14 = vpop.eup %4144 }
 0x3bd   :  { %v3381_v60 = vadd.f32 1.0, %v4145_v14  ;;  %v4147_v62 = vpop.eup %4146 }
 0x3be   :  { %v4149_v21 = vpop.eup %4148  ;;  %v3479_v56 = vrot.slane %v4147_v62, %v3478_v1 }
 0x3bf   :  { %4160 = vrcp.f32 %v3381_v60  ;;  %v4151_v63 = vpop.eup %4150  ;;  %v3486_v25 = vrot.slane %v4149_v21, %v3485_v52 }
 0x3c0   :  { %4162 = vrcp.f32 %v3384_v10  ;;  %v4153_v54 = vpop.eup %4152  ;;  %v3481_v23 = vsel %vm3480_vm5, %v3479_v56, %v3474_v57  ;;  %v3493_v18 = vrot.slane %v4151_v63, %v3492_v22 }
 0x3c1   :  { %4164 = vrcp.f32 %v3385_v46  ;;  %v4155_v59 = vpop.eup %4154  ;;  %v3488_v16 = vsel %vm3487_vm6, %v3486_v25, %v3481_v23  ;;  %v3500_v7 = vrot.slane %v4153_v54, %v3499_v15 }
 0x3c2   :  { %v4157_v29 = vpop.eup %4156  ;;  %v3507_v31 = vrot.slane %v4155_v59, %v3506_v43  ;;  %v3495_v8 = vsel %vm3494_vm7, %v3493_v18, %v3488_v16 }
 0x3c3   :  { %v4159_v30 = vpop.eup %4158  ;;  %v3502_v0 = vsel %vm3501_vm8, %v3500_v7, %v3495_v8  ;;  %v3521_v3 = vrot.slane %v4157_v29, %v3520_v45 }
 0x3c4   :  { %v3509_v34 = vsel %vm3508_vm9, %v3507_v31, %v3502_v0  ;;  %v3528_v41 = vrot.slane %v4159_v30, %v3527_v47 }
 0x3c9   :  { %v4161_v19 = vpop.eup %4160 }
 0x3ca   :  { %v4163_v58 = vpop.eup %4162  ;;  %v3514_v55 = vrot.slane %v4161_v19, %v3513_v26 }
 0x3cb   :  { %v4165_v33 = vpop.eup %4164  ;;  %v3535_v5 = vrot.slane %v4163_v58, %v3534_v28 }
 0x3cc   :  { %v3516_v39 = vsel %vm3515_vm10, %v3514_v55, %v3509_v34  ;;  %v3542_v24 = vrot.slane %v4165_v33, %v3541_v51 }
 0x3cd   :  { %v3523_v13 = vsel %vm3522_vm11, %v3521_v3, %v3516_v39 }
 0x3ce   :  { %v3530_v20 = vsel %vm3529_vm12, %v3528_v41, %v3523_v13 }
 0x3cf   :  { %v3537_v2 = vsel %vm3536_vm13, %v3535_v5, %v3530_v20 }
 0x3d0   :  { %v3544_v48 = vsel %vm3543_vm14, %v3542_v24, %v3537_v2 }
 0x3d1   :  { %3546 = vst [vmem:[#allocation10] sm:$0x1] %v3544_v48 }
 0x3d2   :  { %4243 = shalt.err (!%p4240_p0)
}
 0x3d3   :  { %s4244_s24 = scalar_lea.hbm %s4924_s7, 16 }
 0x3d4   :  { %p4245_p1 = scmp.ne.s32.totalorder %s4924_s7, %s4244_s24  ;;  %p4248_p2 = scmp.lt.u32.totalorder %s4244_s24, %s4924_s7 }
 0x3d6   :  { %p4250_p3 = pnand %p4248_p2, %p4245_p1 }
 0x3d8   :  { %4253 = shalt.err (!%p4250_p3)
}
 0x3d9   :  { %3556 = dma.vmem_to_hbm [thread:$0]  %s3554_s19, 16, %s4924_s7, [#allocation6]  }
 0x3da   :  { %4258 = dma.done.wait [#allocation6], 16  }
 0x3db   :  { %4259 = vsyncadd [#allocation6], 4294967280 }
 0x3dc   :  { %3560 = vsyncpa [#allocation5], 1 }
 0x3dd   :  { %3561 = vsyncpa [#allocation8], 1 }
 0x3de   :  { %3562 = vsyncpa [#allocation6], 1 }

</bundles_post_ra>
